<compile_context>
chip_gen: v6e
topology: v6e:2x2x1
jax: 0.10.0
libtpu: 0.0.40
codegen_flags: <defaults>
</compile_context>

<pallas_src>
import functools
import numpy as np

import jax
import jax.numpy as jnp
from jax import lax
from jax.experimental import pallas as pl
from jax.experimental.pallas import tpu as pltpu


# ----------------------------- positional encoding (numpy, matches PyTorch) ---
def get_angles(pos, i, d_model):
    angle_rates = 1.0 / np.power(10000, 2 * (i // 2) / np.float32(d_model))
    return pos * angle_rates


def positional_encoding(position, d_model):
    angle_rads = get_angles(np.arange(position)[:, np.newaxis],
                            np.arange(d_model)[np.newaxis, :], d_model)
    sines = np.sin(angle_rads[:, 0::2])
    cones = np.cos(angle_rads[:, 1::2])
    pos_encoding = np.concatenate([sines, cones], axis=-1)[np.newaxis, ...]
    return jnp.asarray(pos_encoding, dtype=jnp.float32)


# ------------------------------------------------ fused TransformerBlock kernel
def _transformer_block_kernel(
    q_ref, k_ref, v_ref,
    wq_bd_ref, wk_bd_ref, wv_bd_ref,
    wfc_t_ref, bfc_ref,
    g1_ref, beta1_ref,
    w1_t_ref, b1_ref,
    w2_t_ref, b2_ref,
    g2_ref, beta2_ref,
    out_ref, attn_ref,
    *, heads, head_dim, embed_size, block_b, q_len, kv_len,
):
    H, D, E = heads, head_dim, embed_size
    B, Lq, Lk = block_b, q_len, kv_len

    # flatten (B, L, E) -> (B*L, E): layout no-op, gives full-width MXU tiles
    q = q_ref[...].reshape(B * Lq, E)
    k = k_ref[...].reshape(B * Lk, E)
    v = v_ref[...].reshape(B * Lk, E)

    # single block-diagonal projection per tensor (one lane-dense matmul each)
    qp = jnp.dot(q, wq_bd_ref[...], preferred_element_type=jnp.float32)
    kp = jnp.dot(k, wk_bd_ref[...], preferred_element_type=jnp.float32)
    vp = jnp.dot(v, wv_bd_ref[...], preferred_element_type=jnp.float32)

    qp3 = qp.reshape(B, Lq, E)
    kp3 = kp.reshape(B, Lk, E)
    vp3 = vp.reshape(B, Lk, E)

    wfc_t = wfc_t_ref[...]                       # (E, E)
    scale = 1.0 / jnp.sqrt(jnp.float32(E))

    att_out = None
    attn_heads = []
    # static head loop; for the real model H == 1 so this is a single pass and
    # the lane slices below are full-width (D == E == 128).
    for h in range(H):
        lo = h * D
        qh = qp3[:, :, lo:lo + D]                # (B, Lq, D)
        kh = kp3[:, :, lo:lo + D]                # (B, Lk, D)
        vh = vp3[:, :, lo:lo + D]                # (B, Lk, D)

        energy = jnp.einsum("bqd,bkd->bqk", qh, kh,
                            preferred_element_type=jnp.float32) * scale
        energy = energy - jnp.max(energy, axis=-1, keepdims=True)
        p = jnp.exp(energy)
        attn = p * pl.reciprocal(jnp.sum(p, axis=-1, keepdims=True))
        attn_heads.append(attn)                  # (B, Lq, Lk)

        ctx = jnp.einsum("bqk,bkd->bqd", attn, vh,
                         preferred_element_type=jnp.float32)    # (B, Lq, D)
        # fold concat + fc_out into a per-head accumulate (no lane concat)
        contrib = jnp.dot(ctx.reshape(B * Lq, D), wfc_t[lo:lo + D, :],
                          preferred_element_type=jnp.float32)   # (B*Lq, E)
        att_out = contrib if att_out is None else att_out + contrib

    # single store of all heads' attention probabilities per grid step
    attn_ref[...] = jnp.stack(attn_heads, axis=1)    # (B, H, Lq, Lk)

    att_out = att_out + bfc_ref[...]

    # residual + LayerNorm 1 (dropout == identity in eval mode)
    x = att_out + q
    mu = jnp.mean(x, axis=-1, keepdims=True)
    xc = x - mu
    var = jnp.mean(xc * xc, axis=-1, keepdims=True)
    xn = xc * lax.rsqrt(var + 1e-5) * g1_ref[...] + beta1_ref[...]

    # feed-forward: Linear -> ReLU -> Linear
    h1 = jnp.dot(xn, w1_t_ref[...], preferred_element_type=jnp.float32) + b1_ref[...]
    h1 = jnp.maximum(h1, 0.0)
    ff = jnp.dot(h1, w2_t_ref[...], preferred_element_type=jnp.float32) + b2_ref[...]

    # residual + LayerNorm 2
    y = ff + xn
    mu2 = jnp.mean(y, axis=-1, keepdims=True)
    yc = y - mu2
    var2 = jnp.mean(yc * yc, axis=-1, keepdims=True)
    out = yc * lax.rsqrt(var2 + 1e-5) * g2_ref[...] + beta2_ref[...]

    out_ref[...] = out.reshape(B, Lq, E)


def _pick_block_b(n, rows_per_seq, target_rows=512):
    """Largest divisor of n whose block has <= target_rows rows, but keep the
    grid >= 2 steps (when n >= 2) so both v7x TensorCores get work."""
    divisors = [d for d in range(1, n + 1) if n % d == 0]
    best = 1
    for d in divisors:
        if d * rows_per_seq <= target_rows:
            best = d
    while best > 1 and n // best < 2:
        best = [d for d in divisors if d < best][-1]
    return best


def transformer_block(value, key, query, mask, params, *, block_b=None):
    """Pallas implementation of TransformerBlock.forward. `mask` is unused
    (the reference PyTorch forward never touches it)."""
    del mask
    N, Lq, E = query.shape
    _, Lk, _ = key.shape
    H = params["heads"]
    D = E // H
    Fh = params["w1"].shape[0]  # forward_expansion * embed_size

    if block_b is None:
        block_b = _pick_block_b(N, max(Lq, Lk))
    assert N % block_b == 0

    # --- plain-JAX glue: block-diagonal projection weights, transposed GEMM
    #     weights, 1-D params lifted to (1, dim) ---
    eye_h = jnp.eye(H, dtype=jnp.float32)
    wq_bd = jnp.kron(eye_h, params["wq"].T)      # (E, E)  x @ wq_bd == per-head x_h @ wq.T
    wk_bd = jnp.kron(eye_h, params["wk"].T)
    wv_bd = jnp.kron(eye_h, params["wv"].T)
    wfc_t = params["wfc"].T
    bfc = params["bfc"].reshape(1, E)
    g1 = params["g1"].reshape(1, E)
    beta1 = params["beta1"].reshape(1, E)
    w1_t = params["w1"].T
    b1 = params["b1"].reshape(1, Fh)
    w2_t = params["w2"].T
    b2 = params["b2"].reshape(1, E)
    g2 = params["g2"].reshape(1, E)
    beta2 = params["beta2"].reshape(1, E)

    q_spec = pl.BlockSpec((block_b, Lq, E), lambda n: (n, 0, 0))
    kv_spec = pl.BlockSpec((block_b, Lk, E), lambda n: (n, 0, 0))

    def full2d(a):
        # Constant weights: index_map never changes, so no re-fetch across the
        # grid. (On v7x with much larger E, add pipeline_mode=pl.Buffered(1)
        # and an explicit vmem_limit_bytes; unnecessary at these sizes.)
        return pl.BlockSpec(a.shape, lambda n: (0, 0))

    kernel = functools.partial(
        _transformer_block_kernel,
        heads=H, head_dim=D, embed_size=E,
        block_b=block_b, q_len=Lq, kv_len=Lk)

    out, attn = pl.pallas_call(
        kernel,
        grid=(N // block_b,),
        in_specs=[
            q_spec, kv_spec, kv_spec,              # q, k, v
            full2d(wq_bd), full2d(wk_bd), full2d(wv_bd),
            full2d(wfc_t), full2d(bfc),
            full2d(g1), full2d(beta1),
            full2d(w1_t), full2d(b1),
            full2d(w2_t), full2d(b2),
            full2d(g2), full2d(beta2),
        ],
        out_specs=[
            pl.BlockSpec((block_b, Lq, E), lambda n: (n, 0, 0)),
            pl.BlockSpec((block_b, H, Lq, Lk), lambda n: (n, 0, 0, 0)),
        ],
        out_shape=(
            jax.ShapeDtypeStruct((N, Lq, E), jnp.float32),
            jax.ShapeDtypeStruct((N, H, Lq, Lk), jnp.float32),
        ),
        compiler_params=pltpu.CompilerParams(
            dimension_semantics=("parallel",)),
    )(query, key, value,
      wq_bd, wk_bd, wv_bd, wfc_t, bfc, g1, beta1, w1_t, b1, w2_t, b2, g2, beta2)
    return out, attn


def smiles_fasta_model_xtd_forward(xd, protein, params):
    """SMILES_FASTAModel_xtd.forward(xd, protein).

    Positional-encoding adds are plain-JAX glue; the encoder runs every
    TransformerBlock on the SAME (v, k, q) and only the last layer's output is
    returned by the PyTorch code, so only the last block (whose params are
    given) is evaluated. src_mask is never consumed by the block -> omitted.
    """
    N, Ld, E = xd.shape
    _, Lp, _ = protein.shape
    pos_drug = positional_encoding(100, 128)[:, :Ld, :]     # drug pos-enc (d_model=128)
    pos_prot = positional_encoding(1000, 128)[:, :Lp, :]    # protein pos-enc (max_length=1000)
    v = xd + pos_drug
    k = xd + pos_drug
    q = protein + pos_prot
    return transformer_block(v, k, q, None, params)


# ----------------------- pure-JAX reference (for checking) -----------------------
def _reference_block(value, key, query, params):
    N, Lk, E = key.shape
    _, Lq, _ = query.shape
    H = params["heads"]
    D = E // H

    def proj(x, w):  # x: (N,L,H,D), w: (D,D) -> x @ w.T on last dim
        return jnp.einsum("nlhd,md->nlhm", x, w)

    v = proj(value.reshape(N, Lk, H, D), params["wv"])
    k = proj(key.reshape(N, Lk, H, D), params["wk"])
    q = proj(query.reshape(N, Lq, H, D), params["wq"])

    energy = jnp.einsum("nqhd,nkhd->nhqk", q, k)
    attn = jax.nn.softmax(energy / jnp.sqrt(jnp.float32(E)), axis=3)
    out = jnp.einsum("nhql,nlhd->nqhd", attn, v).reshape(N, Lq, E)
    out = out @ params["wfc"].T + params["bfc"]

    def ln(x, g, b):
        mu = jnp.mean(x, axis=-1, keepdims=True)
        var = jnp.mean((x - mu) ** 2, axis=-1, keepdims=True)
        return (x - mu) / jnp.sqrt(var + 1e-5) * g + b

    x = ln(out + query, params["g1"], params["beta1"])
    ff = jnp.maximum(x @ params["w1"].T + params["b1"], 0.0) @ params["w2"].T + params["b2"]
    out2 = ln(ff + x, params["g2"], params["beta2"])
    return out2, attn


if __name__ == "__main__":
    # shapes implied by the module: embed_size=128, heads=1, forward_expansion=4.
    # small batch / sequence lengths: N=8 sequences, drug len 16, protein len 32.
    N, Ld, Lp = 8, 16, 32
    E, H, FE = 128, 1, 4
    D = E // H
    Fh = FE * E

    key0 = jax.random.PRNGKey(0)
    ks = jax.random.split(key0, 16)

    params = {
        "heads": H,
        "wq": jax.random.normal(ks[0], (D, D), jnp.float32) * 0.1,
        "wk": jax.random.normal(ks[1], (D, D), jnp.float32) * 0.1,
        "wv": jax.random.normal(ks[2], (D, D), jnp.float32) * 0.1,
        "wfc": jax.random.normal(ks[3], (E, E), jnp.float32) * 0.1,
        "bfc": jax.random.normal(ks[4], (E,), jnp.float32) * 0.1,
        "g1": jnp.ones((E,), jnp.float32),
        "beta1": jnp.zeros((E,), jnp.float32),
        "w1": jax.random.normal(ks[5], (Fh, E), jnp.float32) * 0.1,
        "b1": jax.random.normal(ks[6], (Fh,), jnp.float32) * 0.1,
        "w2": jax.random.normal(ks[7], (E, Fh), jnp.float32) * 0.1,
        "b2": jax.random.normal(ks[8], (E,), jnp.float32) * 0.1,
        "g2": jnp.ones((E,), jnp.float32),
        "beta2": jnp.zeros((E,), jnp.float32),
    }

    xd = jax.random.normal(ks[9], (N, Ld, E), jnp.float32)        # drug (v and k)
    protein = jax.random.normal(ks[10], (N, Lp, E), jnp.float32)  # protein (q)

    out, attn = smiles_fasta_model_xtd_forward(xd, protein, params)
    out = jax.block_until_ready(out)
    attn = jax.block_until_ready(attn)

    # reference: identical positional encodings + pure-JAX block
    pos_drug = positional_encoding(100, 128)[:, :Ld, :]
    pos_prot = positional_encoding(1000, 128)[:, :Lp, :]
    ref_out, ref_attn = _reference_block(xd + pos_drug, xd + pos_drug,
                                         protein + pos_prot, params)

    np.testing.assert_allclose(np.asarray(out), np.asarray(ref_out),
                               rtol=1e-4, atol=1e-4)
    np.testing.assert_allclose(np.asarray(attn), np.asarray(ref_attn),
                               rtol=1e-4, atol=1e-4)

    print("KERNEL_OK")
</pallas_src>

<mosaic_0001>
module attributes {stable_mosaic.version = 11 : i64} {
  func.func @_transformer_block_kernel(%arg0: i32, %arg1: memref<4x32x128xf32, #tpu.memory_space<vmem>>, %arg2: memref<4x16x128xf32, #tpu.memory_space<vmem>>, %arg3: memref<4x16x128xf32, #tpu.memory_space<vmem>>, %arg4: memref<128x128xf32, #tpu.memory_space<vmem>>, %arg5: memref<128x128xf32, #tpu.memory_space<vmem>>, %arg6: memref<128x128xf32, #tpu.memory_space<vmem>>, %arg7: memref<128x128xf32, #tpu.memory_space<vmem>>, %arg8: memref<1x128xf32, #tpu.memory_space<vmem>>, %arg9: memref<1x128xf32, #tpu.memory_space<vmem>>, %arg10: memref<1x128xf32, #tpu.memory_space<vmem>>, %arg11: memref<128x512xf32, #tpu.memory_space<vmem>>, %arg12: memref<1x512xf32, #tpu.memory_space<vmem>>, %arg13: memref<512x128xf32, #tpu.memory_space<vmem>>, %arg14: memref<1x128xf32, #tpu.memory_space<vmem>>, %arg15: memref<1x128xf32, #tpu.memory_space<vmem>>, %arg16: memref<1x128xf32, #tpu.memory_space<vmem>>, %arg17: memref<4x32x128xf32, #tpu.memory_space<vmem>>, %arg18: memref<4x1x32x16xf32, #tpu.memory_space<vmem>>) attributes {dimension_semantics = [#tpu.dimension_semantics<parallel>], iteration_bounds = array<i64: 2>, scalar_prefetch = 0 : i64, scratch_operands = 0 : i64, tpu.core_type = #tpu.core_type<tc>, window_params = [{transform_indices = @transform_0, window_bounds = array<i64: 4, 32, 128>}, {transform_indices = @transform_1, window_bounds = array<i64: 4, 16, 128>}, {transform_indices = @transform_2, window_bounds = array<i64: 4, 16, 128>}, {pipeline_mode = #tpu.pipeline_mode<synchronous>, transform_indices = @transform_3, window_bounds = array<i64: 128, 128>}, {pipeline_mode = #tpu.pipeline_mode<synchronous>, transform_indices = @transform_4, window_bounds = array<i64: 128, 128>}, {pipeline_mode = #tpu.pipeline_mode<synchronous>, transform_indices = @transform_5, window_bounds = array<i64: 128, 128>}, {pipeline_mode = #tpu.pipeline_mode<synchronous>, transform_indices = @transform_6, window_bounds = array<i64: 128, 128>}, {pipeline_mode = #tpu.pipeline_mode<synchronous>, transform_indices = @transform_7, window_bounds = array<i64: 1, 128>}, {pipeline_mode = #tpu.pipeline_mode<synchronous>, transform_indices = @transform_8, window_bounds = array<i64: 1, 128>}, {pipeline_mode = #tpu.pipeline_mode<synchronous>, transform_indices = @transform_9, window_bounds = array<i64: 1, 128>}, {pipeline_mode = #tpu.pipeline_mode<synchronous>, transform_indices = @transform_10, window_bounds = array<i64: 128, 512>}, {pipeline_mode = #tpu.pipeline_mode<synchronous>, transform_indices = @transform_11, window_bounds = array<i64: 1, 512>}, {pipeline_mode = #tpu.pipeline_mode<synchronous>, transform_indices = @transform_12, window_bounds = array<i64: 512, 128>}, {pipeline_mode = #tpu.pipeline_mode<synchronous>, transform_indices = @transform_13, window_bounds = array<i64: 1, 128>}, {pipeline_mode = #tpu.pipeline_mode<synchronous>, transform_indices = @transform_14, window_bounds = array<i64: 1, 128>}, {pipeline_mode = #tpu.pipeline_mode<synchronous>, transform_indices = @transform_15, window_bounds = array<i64: 1, 128>}, {transform_indices = @transform_16, window_bounds = array<i64: 4, 32, 128>}, {transform_indices = @transform_17, window_bounds = array<i64: 4, 1, 32, 16>}]} {
    %c0 = arith.constant 0 : index
    %c0_0 = arith.constant 0 : index
    %c0_1 = arith.constant 0 : index
    %0 = vector.load %arg1[%c0, %c0_0, %c0_1] : memref<4x32x128xf32, #tpu.memory_space<vmem>>, vector<4x32x128xf32>
    %1 = vector.shape_cast %0 : vector<4x32x128xf32> to vector<128x128xf32>
    %c0_2 = arith.constant 0 : index
    %c0_3 = arith.constant 0 : index
    %c0_4 = arith.constant 0 : index
    %2 = vector.load %arg2[%c0_2, %c0_3, %c0_4] : memref<4x16x128xf32, #tpu.memory_space<vmem>>, vector<4x16x128xf32>
    %3 = vector.shape_cast %2 : vector<4x16x128xf32> to vector<64x128xf32>
    %c0_5 = arith.constant 0 : index
    %c0_6 = arith.constant 0 : index
    %c0_7 = arith.constant 0 : index
    %4 = vector.load %arg3[%c0_5, %c0_6, %c0_7] : memref<4x16x128xf32, #tpu.memory_space<vmem>>, vector<4x16x128xf32>
    %5 = vector.shape_cast %4 : vector<4x16x128xf32> to vector<64x128xf32>
    %c0_8 = arith.constant 0 : index
    %c0_9 = arith.constant 0 : index
    %6 = vector.load %arg4[%c0_8, %c0_9] : memref<128x128xf32, #tpu.memory_space<vmem>>, vector<128x128xf32>
    %cst = arith.constant dense<0.000000e+00> : vector<128x128xf32>
    %7 = tpu.matmul %1, %6, %cst {dimension_numbers = #tpu.dot_dimension_numbers<[1], [0], [0], [1], [0, 0, 1, 1], [], []>} : vector<128x128xf32>, vector<128x128xf32>, vector<128x128xf32> -> vector<128x128xf32>
    %c0_10 = arith.constant 0 : index
    %c0_11 = arith.constant 0 : index
    %8 = vector.load %arg5[%c0_10, %c0_11] : memref<128x128xf32, #tpu.memory_space<vmem>>, vector<128x128xf32>
    %cst_12 = arith.constant dense<0.000000e+00> : vector<64x128xf32>
    %9 = tpu.matmul %3, %8, %cst_12 {dimension_numbers = #tpu.dot_dimension_numbers<[1], [0], [0], [1], [0, 0, 1, 1], [], []>} : vector<64x128xf32>, vector<128x128xf32>, vector<64x128xf32> -> vector<64x128xf32>
    %c0_13 = arith.constant 0 : index
    %c0_14 = arith.constant 0 : index
    %10 = vector.load %arg6[%c0_13, %c0_14] : memref<128x128xf32, #tpu.memory_space<vmem>>, vector<128x128xf32>
    %cst_15 = arith.constant dense<0.000000e+00> : vector<64x128xf32>
    %11 = tpu.matmul %5, %10, %cst_15 {dimension_numbers = #tpu.dot_dimension_numbers<[1], [0], [0], [1], [0, 0, 1, 1], [], []>} : vector<64x128xf32>, vector<128x128xf32>, vector<64x128xf32> -> vector<64x128xf32>
    %12 = vector.shape_cast %7 : vector<128x128xf32> to vector<4x32x128xf32>
    %13 = vector.shape_cast %9 : vector<64x128xf32> to vector<4x16x128xf32>
    %14 = vector.shape_cast %11 : vector<64x128xf32> to vector<4x16x128xf32>
    %c0_16 = arith.constant 0 : index
    %c0_17 = arith.constant 0 : index
    %15 = vector.load %arg7[%c0_16, %c0_17] : memref<128x128xf32, #tpu.memory_space<vmem>>, vector<128x128xf32>
    %cst_18 = arith.constant 1.280000e+02 : f32
    %16 = math.sqrt %cst_18 : f32
    %cst_19 = arith.constant 1.000000e+00 : f32
    %17 = arith.divf %cst_19, %16 : f32
    "tpu.trace_start"() <{level = 10 : i32, message = "bqd,bkd->bqk"}> : () -> ()
    %cst_20 = arith.constant dense<0.000000e+00> : vector<4x32x16xf32>
    %18 = tpu.matmul %12, %13, %cst_20 {dimension_numbers = #tpu.dot_dimension_numbers<[2], [2], [1], [1], [0, 0, 0, 1, 1, 1], [0], [0]>} : vector<4x32x128xf32>, vector<4x16x128xf32>, vector<4x32x16xf32> -> vector<4x32x16xf32>
    "tpu.trace_stop"() : () -> ()
    %19 = vector.broadcast %17 : f32 to vector<4x32x16xf32>
    %20 = arith.mulf %18, %19 : vector<4x32x16xf32>
    %cst_21 = arith.constant dense<0xFF800000> : vector<4x32xf32>
    %21 = vector.multi_reduction <maximumf>, %20, %cst_21 [2] : vector<4x32x16xf32> to vector<4x32xf32>
    %22 = vector.shape_cast %21 : vector<4x32xf32> to vector<4x32x1xf32>
    %23 = vector.broadcast %22 : vector<4x32x1xf32> to vector<4x32x16xf32>
    %24 = arith.subf %20, %23 : vector<4x32x16xf32>
    %25 = math.exp %24 : vector<4x32x16xf32>
    %cst_22 = arith.constant dense<0.000000e+00> : vector<4x32xf32>
    %26 = vector.multi_reduction <add>, %25, %cst_22 [2] : vector<4x32x16xf32> to vector<4x32xf32>
    %27 = vector.shape_cast %26 : vector<4x32xf32> to vector<4x32x1xf32>
    %28 = tpu.reciprocal %27 : vector<4x32x1xf32> -> vector<4x32x1xf32>
    %29 = vector.broadcast %28 : vector<4x32x1xf32> to vector<4x32x16xf32>
    %30 = arith.mulf %25, %29 : vector<4x32x16xf32>
    "tpu.trace_start"() <{level = 10 : i32, message = "bqk,bkd->bqd"}> : () -> ()
    %cst_23 = arith.constant dense<0.000000e+00> : vector<4x32x128xf32>
    %31 = tpu.matmul %30, %14, %cst_23 {dimension_numbers = #tpu.dot_dimension_numbers<[2], [1], [1], [2], [0, 0, 0, 1, 1, 2], [0], [0]>} : vector<4x32x16xf32>, vector<4x16x128xf32>, vector<4x32x128xf32> -> vector<4x32x128xf32>
    "tpu.trace_stop"() : () -> ()
    %32 = vector.shape_cast %31 : vector<4x32x128xf32> to vector<128x128xf32>
    %cst_24 = arith.constant dense<0.000000e+00> : vector<128x128xf32>
    %33 = tpu.matmul %32, %15, %cst_24 {dimension_numbers = #tpu.dot_dimension_numbers<[1], [0], [0], [1], [0, 0, 1, 1], [], []>} : vector<128x128xf32>, vector<128x128xf32>, vector<128x128xf32> -> vector<128x128xf32>
    %34 = vector.shape_cast %30 : vector<4x32x16xf32> to vector<4x1x32x16xf32>
    %c0_25 = arith.constant 0 : index
    %c0_26 = arith.constant 0 : index
    %c0_27 = arith.constant 0 : index
    %c0_28 = arith.constant 0 : index
    %35 = vector.load %arg18[%c0_25, %c0_26, %c0_27, %c0_28] : memref<4x1x32x16xf32, #tpu.memory_space<vmem>>, vector<4x1x32x16xf32>
    tpu.vector_store %arg18[%c0_25, %c0_26, %c0_27, %c0_28], %34 {strides = array<i32>} : memref<4x1x32x16xf32, #tpu.memory_space<vmem>>, vector<4x1x32x16xf32>,
    %c0_29 = arith.constant 0 : index
    %c0_30 = arith.constant 0 : index
    %36 = vector.load %arg8[%c0_29, %c0_30] : memref<1x128xf32, #tpu.memory_space<vmem>>, vector<1x128xf32>
    %37 = vector.broadcast %36 : vector<1x128xf32> to vector<128x128xf32>
    %38 = arith.addf %33, %37 : vector<128x128xf32>
    %39 = arith.addf %38, %1 : vector<128x128xf32>
    %cst_31 = arith.constant dense<0.000000e+00> : vector<128xf32>
    %40 = vector.multi_reduction <add>, %39, %cst_31 [1] : vector<128x128xf32> to vector<128xf32>
    %41 = vector.shape_cast %40 : vector<128xf32> to vector<128x1xf32>
    %cst_32 = arith.constant 1.280000e+02 : f32
    %42 = vector.broadcast %cst_32 : f32 to vector<128x1xf32>
    %43 = arith.divf %41, %42 : vector<128x1xf32>
    %44 = vector.broadcast %43 : vector<128x1xf32> to vector<128x128xf32>
    %45 = arith.subf %39, %44 : vector<128x128xf32>
    %46 = arith.mulf %45, %45 : vector<128x128xf32>
    %cst_33 = arith.constant dense<0.000000e+00> : vector<128xf32>
    %47 = vector.multi_reduction <add>, %46, %cst_33 [1] : vector<128x128xf32> to vector<128xf32>
    %48 = vector.shape_cast %47 : vector<128xf32> to vector<128x1xf32>
    %cst_34 = arith.constant 1.280000e+02 : f32
    %49 = vector.broadcast %cst_34 : f32 to vector<128x1xf32>
    %50 = arith.divf %48, %49 : vector<128x1xf32>
    %cst_35 = arith.constant 9.99999974E-6 : f32
    %51 = vector.broadcast %cst_35 : f32 to vector<128x1xf32>
    %52 = arith.addf %50, %51 : vector<128x1xf32>
    %53 = math.rsqrt %52 : vector<128x1xf32>
    %54 = vector.broadcast %53 : vector<128x1xf32> to vector<128x128xf32>
    %55 = arith.mulf %45, %54 : vector<128x128xf32>
    %c0_36 = arith.constant 0 : index
    %c0_37 = arith.constant 0 : index
    %56 = vector.load %arg9[%c0_36, %c0_37] : memref<1x128xf32, #tpu.memory_space<vmem>>, vector<1x128xf32>
    %57 = vector.broadcast %56 : vector<1x128xf32> to vector<128x128xf32>
    %58 = arith.mulf %55, %57 : vector<128x128xf32>
    %c0_38 = arith.constant 0 : index
    %c0_39 = arith.constant 0 : index
    %59 = vector.load %arg10[%c0_38, %c0_39] : memref<1x128xf32, #tpu.memory_space<vmem>>, vector<1x128xf32>
    %60 = vector.broadcast %59 : vector<1x128xf32> to vector<128x128xf32>
    %61 = arith.addf %58, %60 : vector<128x128xf32>
    %c0_40 = arith.constant 0 : index
    %c0_41 = arith.constant 0 : index
    %62 = vector.load %arg11[%c0_40, %c0_41] : memref<128x512xf32, #tpu.memory_space<vmem>>, vector<128x512xf32>
    %cst_42 = arith.constant dense<0.000000e+00> : vector<128x512xf32>
    %63 = tpu.matmul %61, %62, %cst_42 {dimension_numbers = #tpu.dot_dimension_numbers<[1], [0], [0], [1], [0, 0, 1, 1], [], []>} : vector<128x128xf32>, vector<128x512xf32>, vector<128x512xf32> -> vector<128x512xf32>
    %c0_43 = arith.constant 0 : index
    %c0_44 = arith.constant 0 : index
    %64 = vector.load %arg12[%c0_43, %c0_44] : memref<1x512xf32, #tpu.memory_space<vmem>>, vector<1x512xf32>
    %65 = vector.broadcast %64 : vector<1x512xf32> to vector<128x512xf32>
    %66 = arith.addf %63, %65 : vector<128x512xf32>
    %cst_45 = arith.constant 0.000000e+00 : f32
    %67 = vector.broadcast %cst_45 : f32 to vector<128x512xf32>
    %68 = arith.maximumf %66, %67 : vector<128x512xf32>
    %c0_46 = arith.constant 0 : index
    %c0_47 = arith.constant 0 : index
    %69 = vector.load %arg13[%c0_46, %c0_47] : memref<512x128xf32, #tpu.memory_space<vmem>>, vector<512x128xf32>
    %cst_48 = arith.constant dense<0.000000e+00> : vector<128x128xf32>
    %70 = tpu.matmul %68, %69, %cst_48 {dimension_numbers = #tpu.dot_dimension_numbers<[1], [0], [0], [1], [0, 0, 1, 1], [], []>} : vector<128x512xf32>, vector<512x128xf32>, vector<128x128xf32> -> vector<128x128xf32>
    %c0_49 = arith.constant 0 : index
    %c0_50 = arith.constant 0 : index
    %71 = vector.load %arg14[%c0_49, %c0_50] : memref<1x128xf32, #tpu.memory_space<vmem>>, vector<1x128xf32>
    %72 = vector.broadcast %71 : vector<1x128xf32> to vector<128x128xf32>
    %73 = arith.addf %70, %72 : vector<128x128xf32>
    %74 = arith.addf %73, %61 : vector<128x128xf32>
    %cst_51 = arith.constant dense<0.000000e+00> : vector<128xf32>
    %75 = vector.multi_reduction <add>, %74, %cst_51 [1] : vector<128x128xf32> to vector<128xf32>
    %76 = vector.shape_cast %75 : vector<128xf32> to vector<128x1xf32>
    %cst_52 = arith.constant 1.280000e+02 : f32
    %77 = vector.broadcast %cst_52 : f32 to vector<128x1xf32>
    %78 = arith.divf %76, %77 : vector<128x1xf32>
    %79 = vector.broadcast %78 : vector<128x1xf32> to vector<128x128xf32>
    %80 = arith.subf %74, %79 : vector<128x128xf32>
    %81 = arith.mulf %80, %80 : vector<128x128xf32>
    %cst_53 = arith.constant dense<0.000000e+00> : vector<128xf32>
    %82 = vector.multi_reduction <add>, %81, %cst_53 [1] : vector<128x128xf32> to vector<128xf32>
    %83 = vector.shape_cast %82 : vector<128xf32> to vector<128x1xf32>
    %cst_54 = arith.constant 1.280000e+02 : f32
    %84 = vector.broadcast %cst_54 : f32 to vector<128x1xf32>
    %85 = arith.divf %83, %84 : vector<128x1xf32>
    %cst_55 = arith.constant 9.99999974E-6 : f32
    %86 = vector.broadcast %cst_55 : f32 to vector<128x1xf32>
    %87 = arith.addf %85, %86 : vector<128x1xf32>
    %88 = math.rsqrt %87 : vector<128x1xf32>
    %89 = vector.broadcast %88 : vector<128x1xf32> to vector<128x128xf32>
    %90 = arith.mulf %80, %89 : vector<128x128xf32>
    %c0_56 = arith.constant 0 : index
    %c0_57 = arith.constant 0 : index
    %91 = vector.load %arg15[%c0_56, %c0_57] : memref<1x128xf32, #tpu.memory_space<vmem>>, vector<1x128xf32>
    %92 = vector.broadcast %91 : vector<1x128xf32> to vector<128x128xf32>
    %93 = arith.mulf %90, %92 : vector<128x128xf32>
    %c0_58 = arith.constant 0 : index
    %c0_59 = arith.constant 0 : index
    %94 = vector.load %arg16[%c0_58, %c0_59] : memref<1x128xf32, #tpu.memory_space<vmem>>, vector<1x128xf32>
    %95 = vector.broadcast %94 : vector<1x128xf32> to vector<128x128xf32>
    %96 = arith.addf %93, %95 : vector<128x128xf32>
    %97 = vector.shape_cast %96 : vector<128x128xf32> to vector<4x32x128xf32>
    %c0_60 = arith.constant 0 : index
    %c0_61 = arith.constant 0 : index
    %c0_62 = arith.constant 0 : index
    %98 = vector.load %arg17[%c0_60, %c0_61, %c0_62] : memref<4x32x128xf32, #tpu.memory_space<vmem>>, vector<4x32x128xf32>
    tpu.vector_store %arg17[%c0_60, %c0_61, %c0_62], %97 {strides = array<i32>} : memref<4x32x128xf32, #tpu.memory_space<vmem>>, vector<4x32x128xf32>,
    return
  }
  func.func @transform_0(%arg0: i32) -> (i32, i32, i32) {
    %c0_i32 = arith.constant 0 : i32
    %c0_i32_0 = arith.constant 0 : i32
    %c0_i32_1 = arith.constant 0 : i32
    return %arg0, %c0_i32, %c0_i32_0 : i32, i32, i32
  }
  func.func @transform_1(%arg0: i32) -> (i32, i32, i32) {
    %c0_i32 = arith.constant 0 : i32
    %c0_i32_0 = arith.constant 0 : i32
    %c0_i32_1 = arith.constant 0 : i32
    return %arg0, %c0_i32, %c0_i32_0 : i32, i32, i32
  }
  func.func @transform_2(%arg0: i32) -> (i32, i32, i32) {
    %c0_i32 = arith.constant 0 : i32
    %c0_i32_0 = arith.constant 0 : i32
    %c0_i32_1 = arith.constant 0 : i32
    return %arg0, %c0_i32, %c0_i32_0 : i32, i32, i32
  }
  func.func @transform_3(%arg0: i32) -> (i32, i32) {
    %c0_i32 = arith.constant 0 : i32
    %c0_i32_0 = arith.constant 0 : i32
    %c0_i32_1 = arith.constant 0 : i32
    return %c0_i32, %c0_i32_0 : i32, i32
  }
  func.func @transform_4(%arg0: i32) -> (i32, i32) {
    %c0_i32 = arith.constant 0 : i32
    %c0_i32_0 = arith.constant 0 : i32
    %c0_i32_1 = arith.constant 0 : i32
    return %c0_i32, %c0_i32_0 : i32, i32
  }
  func.func @transform_5(%arg0: i32) -> (i32, i32) {
    %c0_i32 = arith.constant 0 : i32
    %c0_i32_0 = arith.constant 0 : i32
    %c0_i32_1 = arith.constant 0 : i32
    return %c0_i32, %c0_i32_0 : i32, i32
  }
  func.func @transform_6(%arg0: i32) -> (i32, i32) {
    %c0_i32 = arith.constant 0 : i32
    %c0_i32_0 = arith.constant 0 : i32
    %c0_i32_1 = arith.constant 0 : i32
    return %c0_i32, %c0_i32_0 : i32, i32
  }
  func.func @transform_7(%arg0: i32) -> (i32, i32) {
    %c0_i32 = arith.constant 0 : i32
    %c0_i32_0 = arith.constant 0 : i32
    %c0_i32_1 = arith.constant 0 : i32
    return %c0_i32, %c0_i32_0 : i32, i32
  }
  func.func @transform_8(%arg0: i32) -> (i32, i32) {
    %c0_i32 = arith.constant 0 : i32
    %c0_i32_0 = arith.constant 0 : i32
    %c0_i32_1 = arith.constant 0 : i32
    return %c0_i32, %c0_i32_0 : i32, i32
  }
  func.func @transform_9(%arg0: i32) -> (i32, i32) {
    %c0_i32 = arith.constant 0 : i32
    %c0_i32_0 = arith.constant 0 : i32
    %c0_i32_1 = arith.constant 0 : i32
    return %c0_i32, %c0_i32_0 : i32, i32
  }
  func.func @transform_10(%arg0: i32) -> (i32, i32) {
    %c0_i32 = arith.constant 0 : i32
    %c0_i32_0 = arith.constant 0 : i32
    %c0_i32_1 = arith.constant 0 : i32
    return %c0_i32, %c0_i32_0 : i32, i32
  }
  func.func @transform_11(%arg0: i32) -> (i32, i32) {
    %c0_i32 = arith.constant 0 : i32
    %c0_i32_0 = arith.constant 0 : i32
    %c0_i32_1 = arith.constant 0 : i32
    return %c0_i32, %c0_i32_0 : i32, i32
  }
  func.func @transform_12(%arg0: i32) -> (i32, i32) {
    %c0_i32 = arith.constant 0 : i32
    %c0_i32_0 = arith.constant 0 : i32
    %c0_i32_1 = arith.constant 0 : i32
    return %c0_i32, %c0_i32_0 : i32, i32
  }
  func.func @transform_13(%arg0: i32) -> (i32, i32) {
    %c0_i32 = arith.constant 0 : i32
    %c0_i32_0 = arith.constant 0 : i32
    %c0_i32_1 = arith.constant 0 : i32
    return %c0_i32, %c0_i32_0 : i32, i32
  }
  func.func @transform_14(%arg0: i32) -> (i32, i32) {
    %c0_i32 = arith.constant 0 : i32
    %c0_i32_0 = arith.constant 0 : i32
    %c0_i32_1 = arith.constant 0 : i32
    return %c0_i32, %c0_i32_0 : i32, i32
  }
  func.func @transform_15(%arg0: i32) -> (i32, i32) {
    %c0_i32 = arith.constant 0 : i32
    %c0_i32_0 = arith.constant 0 : i32
    %c0_i32_1 = arith.constant 0 : i32
    return %c0_i32, %c0_i32_0 : i32, i32
  }
  func.func @transform_16(%arg0: i32) -> (i32, i32, i32) {
    %c0_i32 = arith.constant 0 : i32
    %c0_i32_0 = arith.constant 0 : i32
    %c0_i32_1 = arith.constant 0 : i32
    return %arg0, %c0_i32, %c0_i32_0 : i32, i32, i32
  }
  func.func @transform_17(%arg0: i32) -> (i32, i32, i32, i32) {
    %c0_i32 = arith.constant 0 : i32
    %c0_i32_0 = arith.constant 0 : i32
    %c0_i32_1 = arith.constant 0 : i32
    %c0_i32_2 = arith.constant 0 : i32
    return %arg0, %c0_i32, %c0_i32_0, %c0_i32_1 : i32, i32, i32, i32
  }
}

</mosaic_0001>

<bundles_post_ra>
// kernel: tpu_custom_call.1
= control target key start
LH: loop header
LB: loop body
LE: loop exit
PB: predicated region body
PF: predicated region fallthrough
CT: control target
= control target key end

     0   :  { %s6615_s0 = inlined_call_operand.hbm [shape: f32[8,32,128], index: 0, kind: input, shape index: {}]   ;;  %s6616_s1 = inlined_call_operand.hbm [shape: f32[8,16,128], index: 1, kind: input, shape index: {}]   ;;  %s6617_s2 = inlined_call_operand.hbm [shape: f32[8,16,128], index: 2, kind: input, shape index: {}]   ;;  %s6618_s3 = inlined_call_operand.hbm [shape: f32[128,128], index: 3, kind: input, shape index: {}]   ;;  %s6619_s4 = inlined_call_operand.hbm [shape: f32[128,128], index: 4, kind: input, shape index: {}]   ;;  %s6620_s5 = inlined_call_operand.hbm [shape: f32[128,128], index: 5, kind: input, shape index: {}]   ;;  %s6621_s6 = inlined_call_operand.hbm [shape: f32[128,128], index: 6, kind: input, shape index: {}]   ;;  %s6622_s7 = inlined_call_operand.vmem [shape: f32[1,128], index: 7, kind: input, shape index: {}]   ;;  %s6623_s8 = inlined_call_operand.vmem [shape: f32[1,128], index: 8, kind: input, shape index: {}]   ;;  %s6624_s9 = inlined_call_operand.vmem [shape: f32[1,128], index: 9, kind: input, shape index: {}]   ;;  %s6625_s10 = inlined_call_operand.hbm [shape: f32[128,512], index: 10, kind: input, shape index: {}]   ;;  %s6626_s11 = inlined_call_operand.vmem [shape: f32[1,512], index: 11, kind: input, shape index: {}]   ;;  %s6627_s12 = inlined_call_operand.hbm [shape: f32[512,128], index: 12, kind: input, shape index: {}]   ;;  %s6628_s13 = inlined_call_operand.vmem [shape: f32[1,128], index: 13, kind: input, shape index: {}]   ;;  %s6629_s14 = inlined_call_operand.vmem [shape: f32[1,128], index: 14, kind: input, shape index: {}]   ;;  %s6630_s15 = inlined_call_operand.vmem [shape: f32[1,128], index: 15, kind: input, shape index: {}]   ;;  %s6631_s16 = inlined_call_operand.hbm [shape: f32[8,32,128], index: 16, kind: output, shape index: {0}]   ;;  %s6632_s17 = inlined_call_operand.vmem [shape: f32[8,1,32,16], index: 17, kind: output, shape index: {1}]  }
   0x1   :  { %6664 = sst [smem:[#allocation36_spill]] %s6615_s0 }
   0x2   :  { %6665 = sst [smem:[#allocation37_spill]] %s6616_s1 }
   0x3   :  { %6666 = sst [smem:[#allocation38_spill]] %s6618_s3 }
   0x4   :  { %6667 = sst [smem:[#allocation39_spill]] %s6620_s5 }
   0x5   :  { %6668 = sst [smem:[#allocation40_spill]] %s6622_s7 }
   0x6   :  { %6669 = sst [smem:[#allocation41_spill]] %s6623_s8 }
   0x7   :  { %6670 = sst [smem:[#allocation42_spill]] %s6624_s9 }
   0x8   :  { %6671 = sst [smem:[#allocation43_spill]] %s6625_s10 }
   0x9   :  { %6672 = sst [smem:[#allocation44_spill]] %s6626_s11 }
   0xa   :  { %6673 = sst [smem:[#allocation45_spill]] %s6628_s13 }
   0xb   :  { %6674 = sst [smem:[#allocation46_spill]] %s6629_s14 }
   0xc   :  { %6675 = sst [smem:[#allocation47_spill]] %s6630_s15 }
   0xd   :  { %6676 = sst [smem:[#allocation48_spill]] %s6631_s16 }
   0xe   :  { %6677 = sst [smem:[#allocation49_spill]] %s6632_s17 }
   0xf   :  { %23 = vsyncpa [#allocation3], 0 }
  0x10   :  { %25 = vsyncpa [#allocation3 + $0x1], 0 }
  0x11   :  { %26 = vsyncpa [#allocation6], 0 }
  0x12   :  { %28 = vsyncpa [#allocation6 + $0x1], 0 }
  0x13   :  { %29 = vsyncpa [#allocation9], 0 }
  0x14   :  { %30 = vsyncpa [#allocation12], 0 }
  0x15   :  { %31 = vsyncpa [#allocation15], 0 }
  0x16   :  { %32 = vsyncpa [#allocation4], 0 }
  0x17   :  { %34 = vsyncpa [#allocation4 + $0x1], 0  ;;  %s5245_s24 = smov 0   ;;  %s5247_s25 = smov 0  }
  0x18   :  { %s5249_s26 = smov 0   ;;  %s5251_s27 = smov 0  }
  0x19 LB: > { %6678 = sst [smem:[#allocation24_spill]] %s5124_s24  ;;  %s5138_s28 = smov [#allocation8]   ;;  %s5136_s27 = sphi %s5251_s27, %s6738_s27   ;;  %s5132_s26 = sphi %s5249_s26, %s6740_s26   ;;  %s5128_s25 = sphi %s5247_s25, %s6742_s25   ;;  %s5124_s24 = sphi %s5245_s24, %s6741_s24  }
  0x1a   : > { %6679 = sst [smem:[#allocation25_spill]] %s5132_s26  ;;  %s460_s29 = sshll.u32 %s5138_s28, 4  ;;  %s461_s29 = int_to_ptr.vmem [resolvable:$true] %s460_s29 }
  0x1b   : > { %s5266_s0 = sadd.s32 4294967295, %s5136_s27   ;;  %p3845_p0 = scmp.ge.s32.totalorder %s5136_s27, 1 }
  0x1c   : > { %p6650_p1 = scmp.eq.s32.totalorder %s5266_s0, 0  ;;  %p448_p2 = scmp.lt.s32.totalorder %s5136_s27, 3 }
  0x1d   : > { %s5139_s18 = smov [#allocation11]   ;;  %s5140_s20 = smov [#allocation14]  }
  0x1e   : > { %p5271_p3 = pnand %p3845_p0, %p448_p2  ;;  %s486_s19 = sshll.u32 %s5139_s18, 4  ;;  %s5284_s19 = int_to_ptr.vmem [resolvable:$true] %s486_s19 }
  0x1f   : > { %s521_s21 = sshll.u32 %s5140_s20, 4  ;;  %s4827_s23 = scalar_lea.vmem %s461_s29, 2048  ;;  %s5286_s21 = int_to_ptr.vmem [resolvable:$true] %s521_s21 }
  0x20   : > { %s6680_s30 = scalar_select %p5271_p3, 1, 0 }
  0x21   : > { %p4580_p5 = pneg %p5271_p3  ;;  %p4828_p8 = scmp.ne.s32.totalorder %s461_s29, %s4827_s23 }
  0x22   : > { %p4835_p11 = scmp.lt.s32.totalorder %s461_s29, %s461_s29  ;;  %p4836_p12 = scmp.lt.s32.totalorder %s4827_s23, %s4827_s23 }
  0x23   : > { %p5280_p6 = pnand %p4580_p5, %p6650_p1 }
  0x24   : > { %p4837_p13 = por %p4836_p12, %p4835_p11 }
  0x25   : > { %s6681_s1 = scalar_select %p5280_p6, 1, 0 }
  0x26   : > { %p5290_p7 = pneg %p5280_p6 }
  0x28   : > { %s6682_s22 = scalar_select %p5290_p7, 1, 0 }
  0x29   : > { %p4830_p9 = pnand %p4828_p8, %p5290_p7 }
  0x2b   : > { %p4831_p10 = pneg %p4830_p9 }
  0x2d   : > { %p4838_p0 = pnand %p4837_p13, %p4831_p10 }
  0x2f   : > { %4841 = shalt.err (!%p4838_p0)
}
  0x30   : > { %s6636_s28 = smov 128   ;;  %s6638_s18 = smov 8  }
  0x31   : > { %s6683_s3 = sld [smem:[#allocation38_spill]]  ;;  %s4853_s15 = scalar_lea.vmem %s5284_s19, 2048 }
  0x32   : > { %p4854_p2 = scmp.ne.s32.totalorder %s5284_s19, %s4853_s15  ;;  %p4861_p9 = scmp.lt.s32.totalorder %s5284_s19, %s5284_s19 }
  0x33   : > { %p4862_p10 = scmp.lt.s32.totalorder %s4853_s15, %s4853_s15 }
  0x34   : > { %p4856_p5 = pnand %p4854_p2, %p5290_p7 }
  0x35   : > { %p4863_p11 = por %p4862_p10, %p4861_p9 }
  0x36   : > { %p4857_p8 = pneg %p4856_p5 }
  0x37   : > { %4583 = dma.hbm_to_vmem [thread:$0]  (!%p5280_p6), %s6683_s3, 2048, %s461_s29, [#allocation9], %s6636_s28, %s6636_s28, %s6638_s18  }
  0x38   : > { %p4864_p12 = pnand %p4863_p11, %p4857_p8 }
  0x3a   : > { %4867 = shalt.err (!%p4864_p12)
}
  0x3b   : > { %s6684_s5 = sld [smem:[#allocation39_spill]]  ;;  %s4879_s29 = scalar_lea.vmem %s5286_s21, 8192 }
  0x3c   : > { %p4880_p13 = scmp.ne.s32.totalorder %s5286_s21, %s4879_s29  ;;  %p4887_p5 = scmp.lt.s32.totalorder %s5286_s21, %s5286_s21 }
  0x3d   : > { %p4888_p8 = scmp.lt.s32.totalorder %s4879_s29, %s4879_s29 }
  0x3e   : > { %p4882_p0 = pnand %p4880_p13, %p5290_p7 }
  0x3f   : > { %p4889_p9 = por %p4888_p8, %p4887_p5 }
  0x40   : > { %p4883_p2 = pneg %p4882_p0 }
  0x41   : > { %4589 = dma.hbm_to_vmem [thread:$0]  (!%p5280_p6), %s6684_s5, 2048, %s5284_s19, [#allocation12], %s6636_s28, %s6636_s28, %s6638_s18  }
  0x42   : > { %p4890_p10 = pnand %p4889_p9, %p4883_p2 }
  0x44   : > { %4893 = shalt.err (!%p4890_p10)
}
  0x45   : > { %s5143_s15 = smov 512   ;;  %s5144_s19 = smov 32  }
  0x46   : > { %s6685_s10 = sld [smem:[#allocation43_spill]]  ;;  %s3844_s16 = sadd.s32 4294967294, %s5136_s27  }
  0x47   : > { %s5333_s29 = sadd.s32 1, %s5136_s27   ;;  %s47_s28 = sadd.s32 1, %s5132_s26 }
  0x48   : > { %6686 = sst [smem:[#allocation26_spill]] %s5333_s29  ;;  %s44_s18 = ssub.s32 %s5136_s27, %s5333_s29 }
  0x49   : > { %p54_p11 = scmp.ne.s32.totalorder %s5132_s26, %s5128_s25  ;;  %p45_p12 = scmp.eq.s32.totalorder %s44_s18, 0 }
  0x4a   : > { %p55_p13 = scmp.eq.s32.totalorder %s5136_s27, 0  ;;  %p60_p0 = scmp.ne.s32.totalorder %s5128_s25, %s5124_s24 }
  0x4b   : > { %p409_p2 = scmp.eq.s32.totalorder %s5266_s0, 1  ;;  %p415_p10 = scmp.eq.s32.totalorder %s3844_s16, 1 }
  0x4c   : > { %4595 = dma.hbm_to_vmem [thread:$0]  (!%p5280_p6), %s6685_s10, 8192, %s5286_s21, [#allocation15], %s5143_s15, %s5143_s15, %s5144_s19  }
  0x4d   : > { %s5345_s3 = scalar_select %p45_p12, %s5132_s26, %s47_s28  }
  0x4e   : > { %p56_p5 = por %p55_p13, %p54_p11  ;;  %p5349_p8 = por %p6650_p1, %p60_p0 }
  0x4f   : > { %6687 = sst [smem:[#allocation27_spill]] %s5345_s3  ;;  %p5353_p9 = por %p409_p2, %p54_p11 }
  0x50   : > { %s6688_s21 = scalar_select %p5349_p8, 1, 0 }
  0x51   : > { %s6689_s15 = scalar_select %p5353_p9, 1, 0 }
  0x52   : > { %p4619_p4 = scmp.lt.s32.totalorder %s5136_s27, 2  ;;  %s5359_s19 = sand.u32 1, %s5132_s26  }
  0x53   : > { %6690 = sst [smem:[#allocation28_spill]] %s6689_s15  ;;  %p5361_p3 = por %p415_p10, %p60_p0 }
  0x54   : > { %s582_s28 = sand.u32 1, %s5136_s27   ;;  %p5366_p12 = pnand %p4619_p4, %p56_p5 }
  0x55   : > { %s6691_s18 = scalar_select %p5361_p3, 1, 0 }
  0x56   : > { %s6648_s23 = sshll.u32 %s5359_s19, 6  ;;  %s6649_s5 = sshll.u32 %s5136_s27, 10 }
  0x57   : > { %6692 = sst [smem:[#allocation29_spill]] %s6691_s18  ;;  %s586_s29 = scalar_lea.vmem [#allocation5], %s6648_s23 }
  0x58   : > { %s6694_s3 = sld [smem:[#allocation37_spill]]  ;;  %s594_s18 = sshll.u32 %s586_s29, 4  ;;  %s5381_s18 = int_to_ptr.vmem [resolvable:$true] %s594_s18 }
  0x59   : > { %s5383_s24 = scalar_lea.sflag [#allocation6], %s582_s28  ;;  %p5389_p11 = pneg %p5366_p12 }
  0x5e   : > { %s5377_s26 = scalar_lea.hbm %s6694_s3, %s6649_s5  ;;  %s4899_s23 = scalar_lea.hbm %s6694_s3, 2048 }
  0x5f   : > { %s4894_s15 = scalar_lea.hbm %s5377_s26, 1024  ;;  %p4900_p2 = scmp.lt.s32.totalorder %s5377_s26, %s6694_s3 }
  0x60   : > { %p4895_p4 = scmp.ne.s32.totalorder %s5377_s26, %s4894_s15  ;;  %p4901_p5 = scmp.lt.s32.totalorder %s4899_s23, %s4894_s15 }
  0x62   : > { %p4897_p13 = pnand %p5389_p11, %p4895_p4  ;;  %p4902_p10 = por %p4901_p5, %p4900_p2 }
  0x64   : > { %p4898_p0 = pneg %p4897_p13 }
  0x66   : > { %p4903_p1 = pnand %p4902_p10, %p4898_p0 }
  0x68   : > { %4906 = shalt.err (!%p4903_p1)
}
  0x69   : > { %s4907_s28 = scalar_lea.vmem %s5381_s18, 1024  ;;  %s5145_s13 = smov [#allocation5]  }
  0x6a   : > { %p4908_p3 = scmp.ne.s32.totalorder %s5381_s18, %s4907_s28  ;;  %s4912_s10 = sshll.u32 %s5145_s13, 4  ;;  %s4913_s10 = int_to_ptr.vmem [resolvable:$false] %s4912_s10 }
  0x6b   : > { %s4914_s16 = scalar_lea.vmem %s4913_s10, 2048  ;;  %p4915_p9 = scmp.lt.s32.totalorder %s5381_s18, %s4913_s10 }
  0x6c   : > { %p4910_p4 = pnand %p4908_p3, %p5389_p11  ;;  %p4916_p8 = scmp.lt.s32.totalorder %s4914_s16, %s4907_s28 }
  0x6e   : > { %p4911_p13 = pneg %p4910_p4  ;;  %p4917_p6 = por %p4916_p8, %p4915_p9 }
  0x70   : > { %p4918_p7 = pnand %p4917_p6, %p4911_p13 }
  0x72   : > { %4921 = shalt.err (!%p4918_p7)
}
  0x73   : > { %s6696_s5 = smov 8   ;;  %s6697_s15 = smov 128  }
  0x74   : > { %4605 = dma.hbm_to_vmem [thread:$0]  (!%p5366_p12), %s5377_s26, 1024, %s5381_s18, %s5383_s24, %s6697_s15, %s6697_s15, %s6696_s5  }
  0x75   : > { %s6698_s13 = sshll.u32 %s5136_s27, 10  ;;  %s6699_s10 = sshll.u32 %s5359_s19, 6 }
  0x76   : > { %s5420_s28 = scalar_lea.hbm %s6617_s2, %s6698_s13  ;;  %s608_s16 = scalar_lea.vmem [#allocation7], %s6699_s10 }
  0x77   : > { %s616_s3 = sshll.u32 %s608_s16, 4  ;;  %s5146_s11 = smov [#allocation10]   ;;  %s5424_s3 = int_to_ptr.vmem [resolvable:$true] %s616_s3 }
  0x78   : > { %s473_s9 = sshll.u32 %s5146_s11, 4  ;;  %s5147_s8 = smov [#allocation13]   ;;  %s474_s9 = int_to_ptr.vmem [resolvable:$true] %s473_s9 }
  0x79   : > { %s499_s7 = sshll.u32 %s5147_s8, 4  ;;  %s4933_s17 = scalar_lea.vmem %s474_s9, 2048  ;;  %s500_s7 = int_to_ptr.vmem [resolvable:$true] %s499_s7 }
  0x7a   : > { %p4934_p1 = scmp.ne.s32.totalorder %s474_s9, %s4933_s17  ;;  %p6700_p3 = scmp.ne.s32.totalorder %s6682_s22, 0 }
  0x7b   : > { %p4941_p8 = scmp.lt.s32.totalorder %s474_s9, %s474_s9  ;;  %p4942_p9 = scmp.lt.s32.totalorder %s4933_s17, %s4933_s17 }
  0x7c   : > { %p4936_p6 = pnand %p4934_p1, %p6700_p3 }
  0x7d   : > { %p4943_p0 = por %p4942_p9, %p4941_p8 }
  0x7e   : > { %p4937_p7 = pneg %p4936_p6 }
  0x80   : > { %p4944_p2 = pnand %p4943_p0, %p4937_p7 }
  0x82   : > { %4947 = shalt.err (!%p4944_p2)
}
  0x83   : > { %p6701_p5 = scmp.ne.s32.totalorder %s6681_s1, 0  ;;  %s4959_s8 = scalar_lea.vmem %s500_s7, 2048 }
  0x84   : > { %p4960_p10 = scmp.ne.s32.totalorder %s500_s7, %s4959_s8  ;;  %p4967_p1 = scmp.lt.s32.totalorder %s500_s7, %s500_s7 }
  0x85   : > { %4586 = dma.hbm_to_vmem [thread:$0]  (!%p6701_p5), %s6619_s4, 2048, %s474_s9, [#allocation9], %s6697_s15, %s6697_s15, %s6696_s5  }
  0x86   : > { %p4962_p4 = pnand %p4960_p10, %p6700_p3  ;;  %p4968_p6 = scmp.lt.s32.totalorder %s4959_s8, %s4959_s8 }
  0x88   : > { %p4963_p13 = pneg %p4962_p4  ;;  %p4969_p7 = por %p4968_p6, %p4967_p1 }
  0x8a   : > { %p4970_p8 = pnand %p4969_p7, %p4963_p13 }
  0x8c   : > { %4973 = shalt.err (!%p4970_p8)
}
  0x8d   : > { %4592 = dma.hbm_to_vmem [thread:$0]  (!%p6701_p5), %s6621_s6, 2048, %s500_s7, [#allocation12], %s6697_s15, %s6697_s15, %s6696_s5  }
  0x8e   : > { %s5148_s9 = smov [#allocation16]   ;;  %s3853_s23 = sshll.u32 %s5359_s19, 7 }
  0x8f   : > { %s537_s13 = sshll.u32 %s5148_s9, 4  ;;  %s538_s13 = int_to_ptr.vmem [resolvable:$true] %s537_s13 }
  0x90   : > { %s4985_s29 = scalar_lea.vmem %s538_s13, 8192  ;;  %p4993_p10 = scmp.lt.s32.totalorder %s538_s13, %s538_s13 }
  0x91   : > { %p4986_p9 = scmp.ne.s32.totalorder %s538_s13, %s4985_s29  ;;  %p4994_p4 = scmp.lt.s32.totalorder %s4985_s29, %s4985_s29 }
  0x93   : > { %p4988_p0 = pnand %p4986_p9, %p6700_p3  ;;  %p4995_p13 = por %p4994_p4, %p4993_p10 }
  0x95   : > { %p4989_p2 = pneg %p4988_p0 }
  0x97   : > { %p4996_p1 = pnand %p4995_p13, %p4989_p2 }
  0x99   : > { %4999 = shalt.err (!%p4996_p1)
}
  0x9a   : > { %4598 = dma.hbm_to_vmem [thread:$0]  (!%p6701_p5), %s6627_s12, 8192, %s538_s13, [#allocation15], %s6697_s15, %s6697_s15, %s6696_s5  }
  0x9b   : > { %s3908_s22 = sshll.u32 %s5136_s27, 11  ;;  %s6702_s11 = sld [smem:[#allocation36_spill]] }
  0x9c   : > { %s564_s1 = scalar_lea.vmem [#allocation2], %s3853_s23  ;;  %s561_s18 = scalar_lea.sflag [#allocation3], %s5359_s19 }
  0x9d   : > { %s572_s17 = sshll.u32 %s564_s1, 4  ;;  %s5463_s17 = int_to_ptr.vmem [resolvable:$true] %s572_s17 }
  0xa1   : > { %s5461_s8 = scalar_lea.hbm %s6702_s11, %s3908_s22  ;;  %s5005_s7 = scalar_lea.hbm %s6702_s11, 4096 }
  0xa2   : > { %s5000_s9 = scalar_lea.hbm %s5461_s8, 2048  ;;  %p5006_p5 = scmp.lt.s32.totalorder %s5461_s8, %s6702_s11 }
  0xa3   : > { %p5001_p3 = scmp.ne.s32.totalorder %s5461_s8, %s5000_s9  ;;  %p5007_p8 = scmp.lt.s32.totalorder %s5005_s7, %s5000_s9 }
  0xa5   : > { %p5003_p6 = pnand %p5001_p3, %p5389_p11  ;;  %p5008_p9 = por %p5007_p8, %p5006_p5 }
  0xa7   : > { %p5004_p7 = pneg %p5003_p6 }
  0xa9   : > { %p5009_p0 = pnand %p5008_p9, %p5004_p7 }
  0xab   : > { %5012 = shalt.err (!%p5009_p0)
}
  0xac   : > { %s5013_s19 = scalar_lea.vmem %s5463_s17, 2048  ;;  %s5149_s23 = smov [#allocation2]  }
  0xad   : > { %p5014_p2 = scmp.ne.s32.totalorder %s5463_s17, %s5013_s19  ;;  %s5018_s16 = sshll.u32 %s5149_s23, 4  ;;  %s5019_s16 = int_to_ptr.vmem [resolvable:$false] %s5018_s16 }
  0xae   : > { %s5020_s26 = scalar_lea.vmem %s5019_s16, 4096  ;;  %p5021_p13 = scmp.lt.s32.totalorder %s5463_s17, %s5019_s16 }
  0xaf   : > { %p5016_p10 = pnand %p5014_p2, %p5389_p11  ;;  %p5022_p1 = scmp.lt.s32.totalorder %s5020_s26, %s5013_s19 }
  0xb1   : > { %p5017_p4 = pneg %p5016_p10  ;;  %p5023_p3 = por %p5022_p1, %p5021_p13 }
  0xb3   : > { %p5024_p6 = pnand %p5023_p3, %p5017_p4 }
  0xb5   : > { %5027 = shalt.err (!%p5024_p6)
}
  0xb6   : > { %4602 = dma.hbm_to_vmem [thread:$0]  (!%p5366_p12), %s5461_s8, 2048, %s5463_s17, %s561_s18, %s6697_s15, %s6697_s15, %s6696_s5  }
  0xb7   : > { %s5028_s1 = scalar_lea.hbm %s5420_s28, 1024  ;;  %s5033_s29 = scalar_lea.hbm %s6617_s2, 2048 }
  0xb8   : > { %p5029_p7 = scmp.ne.s32.totalorder %s5420_s28, %s5028_s1  ;;  %p5034_p9 = scmp.lt.s32.totalorder %s5420_s28, %s6617_s2 }
  0xb9   : > { %p5035_p0 = scmp.lt.s32.totalorder %s5033_s29, %s5028_s1 }
  0xba   : > { %p5031_p5 = pnand %p5029_p7, %p5389_p11 }
  0xbb   : > { %p5036_p2 = por %p5035_p0, %p5034_p9 }
  0xbc   : > { %p5032_p8 = pneg %p5031_p5 }
  0xbe   : > { %p5037_p10 = pnand %p5036_p2, %p5032_p8 }
  0xc0   : > { %5040 = shalt.err (!%p5037_p10)
}
  0xc1   : > { %s5041_s8 = scalar_lea.vmem %s5424_s3, 1024  ;;  %s5150_s17 = smov [#allocation7]  }
  0xc2   : > { %p5042_p4 = scmp.ne.s32.totalorder %s5424_s3, %s5041_s8  ;;  %s5046_s18 = sshll.u32 %s5150_s17, 4  ;;  %s5047_s18 = int_to_ptr.vmem [resolvable:$false] %s5046_s18 }
  0xc3   : > { %s5048_s22 = scalar_lea.vmem %s5047_s18, 2048  ;;  %p5049_p3 = scmp.lt.s32.totalorder %s5424_s3, %s5047_s18 }
  0xc4   : > { %p5044_p13 = pnand %p5042_p4, %p5389_p11  ;;  %p5050_p6 = scmp.lt.s32.totalorder %s5048_s22, %s5041_s8 }
  0xc6   : > { %p5045_p1 = pneg %p5044_p13  ;;  %p5051_p7 = por %p5050_p6, %p5049_p3 }
  0xc8   : > { %p5052_p5 = pnand %p5051_p7, %p5045_p1 }
  0xca   : > { %5055 = shalt.err (!%p5052_p5)
}
  0xcb   : > { %4608 = dma.hbm_to_vmem [thread:$0]  (!%p5366_p12), %s5420_s28, 1024, %s5424_s3, %s5383_s24, %s6697_s15, %s6697_s15, %s6696_s5  }
  0xcc   : > { %p6703_p11 = scmp.ne.s32.totalorder %s6680_s30, 0 }
  0xce   : > { %628 = sbr.rel (%p6703_p11) target bundleno = 2473 (0x9a9), region = 84 }
  0xd3   : > { %s5516_s14 = sand.u32 1, %s5128_s25   ;;  %p6704_p8 = scmp.ne.s32.totalorder %s6688_s21, 0 }
  0xd4   : > { %s3866_s19 = sshll.u32 %s5516_s14, 7  ;;  %s631_s23 = scalar_lea.sflag [#allocation3], %s5516_s14 }
  0xd5   : > { %s5522_s20 = scalar_lea.vmem [#allocation2], %s3866_s19 }
  0xd6   : > { %5099 = dma.done.wait (%p6704_p8), %s631_s23, 2048  }
  0xd7   : > { %5101 = vsyncadd (%p6704_p8), %s631_s23, 4294965248  ;;  %s639_s3 = sand.u32 1, %s5266_s0   ;;  %s3867_s24 = sshll.u32 %s5516_s14, 6 }
  0xd8   : > { %s640_s30 = scalar_lea.sflag [#allocation6], %s639_s3  ;;  %s5530_s5 = scalar_lea.vmem [#allocation5], %s3867_s24 }
  0xd9   : > { %5103 = dma.done.wait (%p6704_p8), %s640_s30, 2048  }
  0xda   : > { %5105 = vsyncadd (%p6704_p8), %s640_s30, 4294965248  ;;  %s5536_s15 = scalar_lea.vmem [#allocation7], %s3867_s24  ;;  %p6705_p12 = scmp.eq.s32.totalorder %s5266_s0, 0 }
  0xdc   : > { %5107 = dma.done.wait (%p6705_p12), [#allocation9], 4096   ;;  %p6706_p9 = pmov %p6705_p12 }
  0xde   : > { %5109 = vsyncadd (%p6706_p9), [#allocation9], 4294963200  ;;  %p6707_p0 = pmov %p6706_p9 }
  0xe0   : > { %5111 = dma.done.wait (%p6707_p0), [#allocation12], 4096   ;;  %p6708_p2 = pmov %p6707_p0 }
  0xe1   : > { %p6709_p10 = pmov %p6707_p0 }
  0xe2   : > { %5113 = vsyncadd (%p6708_p2), [#allocation12], 4294963200 }
  0xe3   : > { %5115 = dma.done.wait (%p6709_p10), [#allocation15], 16384   ;;  %p6710_p4 = pmov %p6707_p0 }
  0xe4   : > { %v962_v0 = vld [vmem:[#allocation10 + $0x78] sm:$0xff]  ;;  %v961_v1 = vld [vmem:[#allocation10 + $0x70] sm:$0xff]  ;;  %v960_v4 = vld [vmem:[#allocation10 + $0x68] sm:$0xff]  ;;  %vm1561_vm0 = vcmask 130048   ;;  %s3876_s21 = sshll.u32 %s5266_s0, 2  ;;  %s6711_s1 = sld [smem:[#allocation49_spill]] }
  0xe5   : > { %5117 = vsyncadd (%p6710_p4), [#allocation15], 4294950912  ;;  %4292 = vmatprep.subr.mxu1 %v962_v0  ;;  %v801_v2 = vld [vmem:[#allocation8 + $0x78] sm:$0xff]  ;;  %v800_v3 = vld [vmem:[#allocation8 + $0x70] sm:$0xff]  ;;  %p748_p13 = scmp.lt.s32.totalorder %s3876_s21, 7  ;;  %s6712_s7 = sld [smem:[#allocation40_spill]] }
  0xe6   : > { %4293 = vmatpush3.msra.mxu1 %v962_v0  ;;  %4236 = vmatprep.subr.mxu0 %v801_v2  ;;  %v799_v5 = vld [vmem:[#allocation8 + $0x68] sm:$0xff]  ;;  %v959_v6 = vld [vmem:[#allocation10 + $0x60] sm:$0xff]  ;;  %v958_v8 = vld [vmem:[#allocation10 + $0x58] sm:$0xff]  ;;  %s6713_s17 = sld [smem:[#allocation41_spill]]  ;;  %s6503_s13 = scalar_lea.vmem [#allocation17], %s3866_s19 }
  0xe7   : > { %4294 = vmatprep.subr.mxu1 %v961_v1  ;;  %4237 = vmatpush3.msra.mxu0 %v801_v2  ;;  %v798_v7 = vld [vmem:[#allocation8 + $0x60] sm:$0xff]  ;;  %v797_v9 = vld [vmem:[#allocation8 + $0x58] sm:$0xff]  ;;  %v957_v10 = vld [vmem:[#allocation10 + $0x50] sm:$0xff]  ;;  %s6744_s21 = smov (!%p748_p13, %s3876_s21), 7  ;;  %s6714_s23 = sld [smem:[#allocation42_spill]] }
  0xe8   : > { %4295 = vmatpush3.msra.mxu1 %v961_v1  ;;  %4238 = vmatprep.subr.mxu0 %v800_v3  ;;  %v796_v11 = vld [vmem:[#allocation8 + $0x50] sm:$0xff]  ;;  %v956_v12 = vld [vmem:[#allocation10 + $0x48] sm:$0xff]  ;;  %v955_v14 = vld [vmem:[#allocation10 + $0x40] sm:$0xff]  ;;  %s3913_s28 = sshll.u32 %s6744_s21, 5  ;;  %s6721_s24 = sld [smem:[#allocation44_spill]] }
  0xe9   : > { %4296 = vmatprep.subr.mxu1 %v960_v4  ;;  %4239 = vmatpush3.msra.mxu0 %v800_v3  ;;  %v795_v13 = vld [vmem:[#allocation8 + $0x48] sm:$0xff]  ;;  %v794_v15 = vld [vmem:[#allocation8 + $0x40] sm:$0xff]  ;;  %v954_v16 = vld [vmem:[#allocation10 + $0x38] sm:$0xff]  ;;  %s6729_s16 = sld [smem:[#allocation46_spill]]  ;;  %s3915_s29 = sshll.u32 %s5266_s0, 11 }
  0xea   : > { %4297 = vmatpush3.msra.mxu1 %v960_v4  ;;  %4240 = vmatprep.subr.mxu0 %v799_v5  ;;  %v793_v17 = vld [vmem:[#allocation8 + $0x38] sm:$0xff]  ;;  %v953_v18 = vld [vmem:[#allocation10 + $0x30] sm:$0xff]  ;;  %v952_v20 = vld [vmem:[#allocation10 + $0x28] sm:$0xff]  ;;  %s5733_s9 = scalar_lea.vmem %s6711_s1, %s3913_s28  ;;  %s6731_s19 = sld [smem:[#allocation28_spill]] }
  0xeb   : > { %4298 = vmatprep.subr.mxu1 %v959_v6  ;;  %4241 = vmatpush3.msra.mxu0 %v799_v5  ;;  %v792_v19 = vld [vmem:[#allocation8 + $0x30] sm:$0xff]  ;;  %v791_v21 = vld [vmem:[#allocation8 + $0x28] sm:$0xff]  ;;  %v951_v22 = vld [vmem:[#allocation10 + $0x20] sm:$0xff]  ;;  %s3621_s22 = scalar_lea.sflag [#allocation4], %s5516_s14  ;;  %s5152_s0 = smov [#allocation17]  }
  0xec   : > { %4299 = vmatpush3.msra.mxu1 %v959_v6  ;;  %4242 = vmatprep.subr.mxu0 %v798_v7  ;;  %v790_v23 = vld [vmem:[#allocation8 + $0x20] sm:$0xff]  ;;  %v950_v24 = vld [vmem:[#allocation10 + $0x18] sm:$0xff]  ;;  %v949_v26 = vld [vmem:[#allocation10 + $0x10] sm:$0xff] }
  0xed   : > { %4300 = vmatprep.subr.mxu1 %v958_v8  ;;  %4243 = vmatpush3.msra.mxu0 %v798_v7  ;;  %v789_v25 = vld [vmem:[#allocation8 + $0x18] sm:$0xff]  ;;  %v788_v27 = vld [vmem:[#allocation8 + $0x10] sm:$0xff]  ;;  %v948_v28 = vld [vmem:[#allocation10 + $0x8] sm:$0xff] }
  0xee   : > { %4301 = vmatpush3.msra.mxu1 %v958_v8  ;;  %4244 = vmatprep.subr.mxu0 %v797_v9  ;;  %v770_v29 = vld [vmem:[%s5530_s5] sm:$0xff]  ;;  %v787_v31 = vld [vmem:[#allocation8 + $0x8] sm:$0xff]  ;;  %v772_v36 = vld [vmem:[%s5530_s5 + $0x10] sm:$0xff] }
  0xef   : > { %4302 = vmatprep.subr.mxu1 %v957_v10  ;;  %4245 = vmatpush3.msra.mxu0 %v797_v9  ;;  %v947_v30 = vld [vmem:[#allocation10] sm:$0xff]  ;;  %v771_v32 = vld [vmem:[%s5530_s5 + $0x8] sm:$0xff]  ;;  %v756_v37 = vld [vmem:[%s5522_s20 + $0x10] sm:$0xff] }
  0xf0   : > { %4303 = vmatpush3.msra.mxu1 %v957_v10  ;;  %4246 = vmatprep.subr.mxu0 %v796_v11  ;;  %v786_v33 = vld [vmem:[#allocation8] sm:$0xff]  ;;  %v755_v35 = vld [vmem:[%s5522_s20 + $0x8] sm:$0xff]  ;;  %v773_v38 = vld [vmem:[%s5530_s5 + $0x18] sm:$0xff]  ;;  %p6733_p3 = scmp.ne.s32.totalorder %s6731_s19, 0 }
  0xf1   : > { %4304 = vmatprep.subr.mxu1 %v956_v12  ;;  %4247 = vmatpush3.msra.mxu0 %v796_v11  ;;  %v754_v34 = vld [vmem:[%s5522_s20] sm:$0xff]  ;;  %v757_v40 = vld [vmem:[%s5522_s20 + $0x18] sm:$0xff]  ;;  %v775_v42 = vld [vmem:[%s5530_s5 + $0x28] sm:$0xff] }
  0xf2   : > { %4305 = vmatpush3.msra.mxu1 %v956_v12  ;;  %4248 = vmatprep.subr.mxu0 %v795_v13  ;;  %v774_v39 = vld [vmem:[%s5530_s5 + $0x20] sm:$0xff]  ;;  %v776_v43 = vld [vmem:[%s5530_s5 + $0x30] sm:$0xff]  ;;  %v759_v44 = vld [vmem:[%s5522_s20 + $0x28] sm:$0xff] }
  0xf3   : > { %4306 = vmatprep.subr.mxu1 %v955_v14  ;;  %4249 = vmatpush3.msra.mxu0 %v795_v13  ;;  %v758_v41 = vld [vmem:[%s5522_s20 + $0x20] sm:$0xff]  ;;  %v760_v45 = vld [vmem:[%s5522_s20 + $0x30] sm:$0xff]  ;;  %v777_v46 = vld [vmem:[%s5530_s5 + $0x38] sm:$0xff] }
  0xf4   : > { %4307 = vmatpush3.msra.mxu1 %v955_v14  ;;  %4250 = vmatprep.subr.mxu0 %v794_v15  ;;  %v761_v47 = vld [vmem:[%s5522_s20 + $0x38] sm:$0xff]  ;;  %v762_v48 = vld [vmem:[%s5522_s20 + $0x40] sm:$0xff]  ;;  %v763_v49 = vld [vmem:[%s5522_s20 + $0x48] sm:$0xff] }
  0xf5   : > { %4308 = vmatprep.subr.mxu1 %v954_v16  ;;  %4251 = vmatpush3.msra.mxu0 %v794_v15  ;;  %v764_v50 = vld [vmem:[%s5522_s20 + $0x50] sm:$0xff]  ;;  %v765_v51 = vld [vmem:[%s5522_s20 + $0x58] sm:$0xff]  ;;  %v766_v52 = vld [vmem:[%s5522_s20 + $0x60] sm:$0xff] }
  0xf6   : > { %4309 = vmatpush3.msra.mxu1 %v954_v16  ;;  %4252 = vmatprep.subr.mxu0 %v793_v17  ;;  %v767_v53 = vld [vmem:[%s5522_s20 + $0x68] sm:$0xff]  ;;  %v768_v54 = vld [vmem:[%s5522_s20 + $0x70] sm:$0xff]  ;;  %v769_v55 = vld [vmem:[%s5522_s20 + $0x78] sm:$0xff] }
  0xf7   : > { %4310 = vmatprep.subr.mxu1 %v953_v18  ;;  %4253 = vmatpush3.msra.mxu0 %v793_v17  ;;  %v1083_v16 = vld [vmem:[#allocation11 + $0x78] sm:$0xff]  ;;  %v1082_v17 = vld [vmem:[#allocation11 + $0x70] sm:$0xff] }
  0xf8   : > { %4311 = vmatpush3.msra.mxu1 %v953_v18  ;;  %4254 = vmatprep.subr.mxu0 %v792_v19  ;;  %v1081_v18 = vld [vmem:[#allocation11 + $0x68] sm:$0xff] }
  0xf9   : > { %4312 = vmatprep.subr.mxu1 %v952_v20  ;;  %4255 = vmatpush3.msra.mxu0 %v792_v19  ;;  %v1080_v19 = vld [vmem:[#allocation11 + $0x60] sm:$0xff] }
  0xfa   : > { %4313 = vmatpush3.msra.mxu1 %v952_v20  ;;  %4256 = vmatprep.subr.mxu0 %v791_v21  ;;  %v778_v20 = vld [vmem:[%s5536_s15] sm:$0xff] }
  0xfb   : > { %4314 = vmatprep.subr.mxu1 %v951_v22  ;;  %4257 = vmatpush3.msra.mxu0 %v791_v21  ;;  %v1079_v21 = vld [vmem:[#allocation11 + $0x58] sm:$0xff] }
  0xfc   : > { %4315 = vmatpush3.msra.mxu1 %v951_v22  ;;  %4258 = vmatprep.subr.mxu0 %v790_v23  ;;  %v1078_v22 = vld [vmem:[#allocation11 + $0x50] sm:$0xff] }
  0xfd   : > { %4316 = vmatprep.subr.mxu1 %v950_v24  ;;  %4259 = vmatpush3.msra.mxu0 %v790_v23  ;;  %v1077_v23 = vld [vmem:[#allocation11 + $0x48] sm:$0xff] }
  0xfe   : > { %4317 = vmatpush3.msra.mxu1 %v950_v24  ;;  %4260 = vmatprep.subr.mxu0 %v789_v25  ;;  %v1076_v24 = vld [vmem:[#allocation11 + $0x40] sm:$0xff] }
  0xff   : > { %4318 = vmatprep.subr.mxu1 %v949_v26  ;;  %4261 = vmatpush3.msra.mxu0 %v789_v25  ;;  %v1075_v25 = vld [vmem:[#allocation11 + $0x38] sm:$0xff] }
 0x100   : > { %4319 = vmatpush3.msra.mxu1 %v949_v26  ;;  %4262 = vmatprep.subr.mxu0 %v788_v27  ;;  %v1074_v26 = vld [vmem:[#allocation11 + $0x30] sm:$0xff] }
 0x101   : > { %4320 = vmatprep.subr.mxu1 %v948_v28  ;;  %4324 = vmatprep.mubr.f32.mxu1 %v770_v29  ;;  %v1071_v29 = vld [vmem:[#allocation11 + $0x18] sm:$0xff] }
 0x102   : > { %4321 = vmatpush3.msra.mxu1 %v948_v28  ;;  %4263 = vmatpush3.msra.mxu0 %v788_v27  ;;  %v1073_v27 = vld [vmem:[#allocation11 + $0x28] sm:$0xff]  ;;  %v1072_v28 = vld [vmem:[#allocation11 + $0x20] sm:$0xff] }
 0x103   : > { %4322 = vmatprep.subr.mxu1 %v947_v30  ;;  %4264 = vmatprep.subr.mxu0 %v787_v31 }
 0x104   : > { %4323 = vmatpush3.msra.mxu1 %v947_v30  ;;  %4265 = vmatpush3.msra.mxu0 %v787_v31  ;;  %v1070_v30 = vld [vmem:[#allocation11 + $0x10] sm:$0xff]  ;;  %v1069_v31 = vld [vmem:[#allocation11 + $0x8] sm:$0xff] }
 0x105   : > { %4325 = vmatmul.mubr.f32.vlgmr.msra.gmra.mxu1 %v771_v32  ;;  %4266 = vmatprep.subr.mxu0 %v786_v33  ;;  %v1068_v32 = vld [vmem:[#allocation11] sm:$0xff] }
 0x106   : > { %4267 = vmatpush3.msra.mxu0 %v786_v33  ;;  %4268 = vmatprep.mubr.f32.mxu0 %v754_v34  ;;  %v779_v33 = vld [vmem:[%s5536_s15 + $0x8] sm:$0xff]  ;;  %v780_v34 = vld [vmem:[%s5536_s15 + $0x10] sm:$0xff] }
 0x107   : > { %4269 = vmatmul.mubr.f32.vlgmr.msra.gmra.mxu0 %v755_v35  ;;  %4327 = vmatprep.mubr.f32.mxu1 %v772_v36  ;;  %v781_v35 = vld [vmem:[%s5536_s15 + $0x18] sm:$0xff]  ;;  %v782_v36 = vld [vmem:[%s5536_s15 + $0x20] sm:$0xff] }
 0x108   : > { %4271 = vmatprep.mubr.f32.mxu0 %v756_v37  ;;  %4336 = vmatprep.subr.mxu0 %v1083_v16  ;;  %v783_v37 = vld [vmem:[%s5536_s15 + $0x28] sm:$0xff] }
 0x109   : > { %4328 = vmatmul.mubr.f32.gmra.mxu1 %v773_v38  ;;  %4337 = vmatpush3.msra.mxu0 %v1083_v16 }
 0x10a   : > { %4330 = vmatprep.mubr.f32.mxu1 %v774_v39  ;;  %4338 = vmatprep.subr.mxu0 %v1082_v17 }
 0x10b   : > { %4272 = vmatmul.mubr.f32.gmra.mxu0 %v757_v40 }
 0x10c   : > { %4274 = vmatprep.mubr.f32.mxu0 %v758_v41  ;;  %4339 = vmatpush3.msra.mxu0 %v1082_v17 }
 0x10d   : > { %4331 = vmatmul.mubr.f32.gmra.mxu1 %v775_v42  ;;  %4340 = vmatprep.subr.mxu0 %v1081_v18 }
 0x10e   : > { %4333 = vmatprep.mubr.f32.mxu1 %v776_v43  ;;  %4341 = vmatpush3.msra.mxu0 %v1081_v18 }
 0x10f   : > { %4275 = vmatmul.mubr.f32.gmra.mxu0 %v759_v44  ;;  %4342 = vmatprep.subr.mxu0 %v1080_v19 }
 0x110   : > { %4277 = vmatprep.mubr.f32.mxu0 %v760_v45  ;;  %4343 = vmatpush3.msra.mxu0 %v1080_v19 }
 0x111   : > { %4334 = vmatmul.mubr.f32.gmra.mxu1 %v777_v46  ;;  %4344 = vmatprep.subr.mxu0 %v1079_v21 }
 0x112   : > { %4345 = vmatpush3.msra.mxu0 %v1079_v21 }
 0x113   : > { %4278 = vmatmul.mubr.f32.gmra.mxu0 %v761_v47  ;;  %4346 = vmatprep.subr.mxu0 %v1078_v22 }
 0x114   : > { %4280 = vmatprep.mubr.f32.mxu0 %v762_v48  ;;  %4347 = vmatpush3.msra.mxu0 %v1078_v22 }
 0x115   : > { %4348 = vmatprep.subr.mxu0 %v1077_v23 }
 0x116   : > { %4349 = vmatpush3.msra.mxu0 %v1077_v23 }
 0x117   : > { %4281 = vmatmul.mubr.f32.gmra.mxu0 %v763_v49  ;;  %4350 = vmatprep.subr.mxu0 %v1076_v24 }
 0x118   : > { %4283 = vmatprep.mubr.f32.mxu0 %v764_v50  ;;  %4351 = vmatpush3.msra.mxu0 %v1076_v24 }
 0x119   : > { %4352 = vmatprep.subr.mxu0 %v1075_v25 }
 0x11a   : > { %4353 = vmatpush3.msra.mxu0 %v1075_v25 }
 0x11b   : > { %4284 = vmatmul.mubr.f32.gmra.mxu0 %v765_v51  ;;  %4354 = vmatprep.subr.mxu0 %v1074_v26 }
 0x11c   : > { %4286 = vmatprep.mubr.f32.mxu0 %v766_v52  ;;  %4355 = vmatpush3.msra.mxu0 %v1074_v26 }
 0x11d   : > { %4356 = vmatprep.subr.mxu0 %v1073_v27 }
 0x11e   : > { %4357 = vmatpush3.msra.mxu0 %v1073_v27 }
 0x11f   : > { %4287 = vmatmul.mubr.f32.gmra.mxu0 %v767_v53  ;;  %4358 = vmatprep.subr.mxu0 %v1072_v28 }
 0x120   : > { %4289 = vmatprep.mubr.f32.mxu0 %v768_v54  ;;  %4359 = vmatpush3.msra.mxu0 %v1072_v28 }
 0x121   : > { %4360 = vmatprep.subr.mxu0 %v1071_v29 }
 0x122   : > { %4361 = vmatpush3.msra.mxu0 %v1071_v29 }
 0x123   : > { %4290 = vmatmul.mubr.f32.gmra.mxu0 %v769_v55  ;;  %4362 = vmatprep.subr.mxu0 %v1070_v30 }
 0x124   : > { %4368 = vmatprep.mubr.f32.mxu0 %v778_v20  ;;  %4363 = vmatpush3.msra.mxu0 %v1070_v30 }
 0x125   : > { %4364 = vmatprep.subr.mxu0 %v1069_v31 }
 0x126   : > { %4365 = vmatpush3.msra.mxu0 %v1069_v31 }
 0x127   : > { %4366 = vmatprep.subr.mxu0 %v1068_v32 }
 0x128   : > { %4367 = vmatpush3.msra.mxu0 %v1068_v32 }
 0x129   : > { %4369 = vmatmul.mubr.f32.vlgmr.msra.gmra.mxu0 %v779_v33 }
 0x12a   : > { %4371 = vmatprep.mubr.f32.mxu0 %v780_v34 }
 0x12d   : > { %4372 = vmatmul.mubr.f32.gmra.mxu0 %v781_v35 }
 0x12e   : > { %4374 = vmatprep.mubr.f32.mxu0 %v782_v36 }
 0x131   : > { %4375 = vmatmul.mubr.f32.gmra.mxu0 %v783_v37 }
 0x1c5   : > { %v4326_v56 = vpop.f32.mrf.mxu1 }
 0x1c6   : > { %4380 = vmatprep.subr.mxu1 %v4326_v56 }
 0x1c7   : > { %v1029_v57 = vpop.f32.mrf.mxu1  ;;  %4381 = vmatpush3.xpose.msra.mxu1 %v4326_v56  ;;  %v4270_v58 = vpop.f32.mrf.mxu0 }
 0x1c8   : > { %4382 = vmatprep.subr.mxu1 %v1029_v57 }
 0x1c9   : > { %v868_v59 = vpop.f32.mrf.mxu0  ;;  %v4329_v60 = vpop.f32.mrf.mxu1 }
 0x1ca   : > { %4384 = vmatprep.mubr.f32.mxu1 %v868_v59 }
 0x1cb   : > { %4383 = vmatpush3.xpose.msra.mxu1 %v1029_v57  ;;  %v4273_v61 = vpop.f32.mrf.mxu0  ;;  %v1039_v63 = vpop.f32.mrf.mxu1 }
 0x1cc   : > { %4390 = vmatprep.subr.mxu1 %v4329_v60 }
 0x1cd   : > { %v878_v62 = vpop.f32.mrf.mxu0  ;;  %v4332_v2 = vpop.f32.mrf.mxu1 }
 0x1ce   : > { %4385 = vmatmul.mubr.f32.vlgmr.msra.gmra.mxu1 %v4270_v58 }
 0x1cf   : > { %4391 = vmatpush3.xpose.msra.mxu1 %v4329_v60  ;;  %4387 = vmatprep.mubr.f32.mxu1 %v878_v62  ;;  %v4276_v0 = vpop.f32.mrf.mxu0  ;;  %v1049_v5 = vpop.f32.mrf.mxu1 }
 0x1d0   : > { %4392 = vmatprep.subr.mxu1 %v1039_v63 }
 0x1d1   : > { %v888_v1 = vpop.f32.mrf.mxu0  ;;  %v4335_v8 = vpop.f32.mrf.mxu1 }
 0x1d2   : > { %4388 = vmatmul.mubr.f32.gmra.mxu1 %v4273_v61 }
 0x1d3   : > { %4393 = vmatpush3.xpose.msra.mxu1 %v1039_v63  ;;  %4394 = vmatprep.mubr.f32.mxu1 %v888_v1  ;;  %v4279_v3 = vpop.f32.mrf.mxu0  ;;  %v1059_v11 = vpop.f32.mrf.mxu1  ;;  %v784_v63 = vld [vmem:[%s5536_s15 + $0x30] sm:$0xff] }
 0x1d4   : > { %4400 = vmatprep.subr.mxu1 %v4332_v2  ;;  %4377 = vmatprep.mubr.f32.mxu0 %v784_v63 }
 0x1d5   : > { %v898_v4 = vpop.f32.mrf.mxu0 }
 0x1d6   : > { %4395 = vmatmul.mubr.f32.vlgmr.msra.gmra.mxu1 %v4276_v0 }
 0x1d7   : > { %4401 = vmatpush3.xpose.msra.mxu1 %v4332_v2  ;;  %4397 = vmatprep.mubr.f32.mxu1 %v898_v4  ;;  %v4282_v6 = vpop.f32.mrf.mxu0  ;;  %v785_v4 = vld [vmem:[%s5536_s15 + $0x38] sm:$0xff]  ;;  %s6722_s15 = sld [smem:[#allocation45_spill]] }
 0x1d8   : > { %4402 = vmatprep.subr.mxu1 %v1049_v5  ;;  %4378 = vmatmul.mubr.f32.gmra.mxu0 %v785_v4 }
 0x1d9   : > { %v908_v7 = vpop.f32.mrf.mxu0 }
 0x1da   : > { %4398 = vmatmul.mubr.f32.gmra.mxu1 %v4279_v3 }
 0x1db   : > { %4403 = vmatpush3.xpose.msra.mxu1 %v1049_v5  ;;  %4404 = vmatprep.mubr.f32.mxu1 %v908_v7  ;;  %v4285_v9 = vpop.f32.mrf.mxu0 }
 0x1dc   : > { %4410 = vmatprep.subr.mxu1 %v4335_v8 }
 0x1dd   : > { %v918_v10 = vpop.f32.mrf.mxu0 }
 0x1de   : > { %4405 = vmatmul.mubr.f32.vlgmr.msra.gmra.mxu1 %v4282_v6 }
 0x1df   : > { %4411 = vmatpush3.xpose.msra.mxu1 %v4335_v8  ;;  %4407 = vmatprep.mubr.f32.mxu1 %v918_v10  ;;  %v4288_v12 = vpop.f32.mrf.mxu0 }
 0x1e0   : > { %4412 = vmatprep.subr.mxu1 %v1059_v11 }
 0x1e1   : > { %v928_v13 = vpop.f32.mrf.mxu0 }
 0x1e2   : > { %4408 = vmatmul.mubr.f32.gmra.mxu1 %v4285_v9 }
 0x1e3   : > { %4413 = vmatpush3.xpose.msra.mxu1 %v1059_v11  ;;  %4414 = vmatprep.mubr.f32.mxu1 %v928_v13  ;;  %v4291_v14 = vpop.f32.mrf.mxu0 }
 0x1e5   : > { %v938_v15 = vpop.f32.mrf.mxu0 }
 0x1e6   : > { %4415 = vmatmul.mubr.f32.vlgmr.msra.gmra.mxu1 %v4288_v12 }
 0x1e7   : > { %4417 = vmatprep.mubr.f32.mxu1 %v938_v15 }
 0x1ea   : > { %4418 = vmatmul.mubr.f32.gmra.mxu1 %v4291_v14 }
 0x28e   : > { %v4386_v38 = vpop.f32.mrf.mxu1 }
 0x28f   : > { %v5582_v42 = vmul.f32 0.088388346, %v4386_v38 }
 0x290   : > { %v1271_v39 = vpop.f32.mrf.mxu1 }
 0x291   : > { %v5580_v40 = vmul.f32 0.088388346, %v1271_v39  ;;  %v1565_v48 = vsel %vm1561_vm0, %v5582_v42, -inf }
 0x292   : > { %v4389_v41 = vpop.f32.mrf.mxu1 }
 0x293   : > { %v1562_v43 = vsel %vm1561_vm0, %v5580_v40, -inf  ;;  %v5588_v47 = vmul.f32 0.088388346, %v4389_v41 }
 0x294   : > { %1563 = vmax.xlane.f32.xlu0 %v1562_v43  ;;  %v1281_v44 = vpop.f32.mrf.mxu1 }
 0x295   : > { %v5586_v45 = vmul.f32 0.088388346, %v1281_v44  ;;  %v1571_v54 = vsel %vm1561_vm0, %v5588_v47, -inf }
 0x296   : > { %v4396_v46 = vpop.f32.mrf.mxu1 }
 0x297   : > { %v1568_v49 = vsel %vm1561_vm0, %v5586_v45, -inf  ;;  %v5594_v51 = vmul.f32 0.088388346, %v4396_v46 }
 0x298   : > { %1566 = vmax.xlane.f32.xlu0 %v1565_v48  ;;  %1569 = vmax.xlane.f32.xlu1 %v1568_v49  ;;  %v1356_v50 = vpop.f32.mrf.mxu1 }
 0x299   : > { %v5596_v52 = vmul.f32 0.088388346, %v1356_v50  ;;  %v1577_v59 = vsel %vm1561_vm0, %v5594_v51, -inf }
 0x29a   : > { %v4399_v53 = vpop.f32.mrf.mxu1 }
 0x29b   : > { %v1574_v55 = vsel %vm1561_vm0, %v5596_v52, -inf  ;;  %v5602_v57 = vmul.f32 0.088388346, %v4399_v53 }
 0x29c   : > { %1572 = vmax.xlane.f32.xlu1 %v1571_v54  ;;  %1575 = vmax.xlane.f32.xlu0 %v1574_v55  ;;  %v1366_v56 = vpop.f32.mrf.mxu1 }
 0x29d   : > { %v5604_v58 = vmul.f32 0.088388346, %v1366_v56  ;;  %v1583_v2 = vsel %vm1561_vm0, %v5602_v57, -inf }
 0x29e   : > { %v4406_v60 = vpop.f32.mrf.mxu1 }
 0x29f   : > { %v1580_v61 = vsel %vm1561_vm0, %v5604_v58, -inf  ;;  %v5611_v0 = vmul.f32 0.088388346, %v4406_v60 }
 0x2a0   : > { %1578 = vmax.xlane.f32.xlu1 %v1577_v59  ;;  %1581 = vmax.xlane.f32.xlu0 %v1580_v61  ;;  %v1441_v62 = vpop.f32.mrf.mxu1 }
 0x2a1   : > { %v5613_v1 = vmul.f32 0.088388346, %v1441_v62  ;;  %v1589_v9 = vsel %vm1561_vm0, %v5611_v0, -inf }
 0x2a2   : > { %v4409_v3 = vpop.f32.mrf.mxu1 }
 0x2a3   : > { %v1586_v5 = vsel %vm1561_vm0, %v5613_v1, -inf  ;;  %v5620_v7 = vmul.f32 0.088388346, %v4409_v3 }
 0x2a4   : > { %1584 = vmax.xlane.f32.xlu1 %v1583_v2  ;;  %1587 = vmax.xlane.f32.xlu0 %v1586_v5  ;;  %v1451_v6 = vpop.f32.mrf.mxu1 }
 0x2a5   : > { %v5622_v8 = vmul.f32 0.088388346, %v1451_v6  ;;  %v1595_v15 = vsel %vm1561_vm0, %v5620_v7, -inf }
 0x2a6   : > { %v4416_v10 = vpop.f32.mrf.mxu1 }
 0x2a7   : > { %v1592_v11 = vsel %vm1561_vm0, %v5622_v8, -inf  ;;  %v5628_v13 = vmul.f32 0.088388346, %v4416_v10 }
 0x2a8   : > { %1590 = vmax.xlane.f32.xlu1 %v1589_v9  ;;  %1593 = vmax.xlane.f32.xlu0 %v1592_v11  ;;  %v1526_v12 = vpop.f32.mrf.mxu1 }
 0x2a9   : > { %v5630_v14 = vmul.f32 0.088388346, %v1526_v12  ;;  %v1601_v21 = vsel %vm1561_vm0, %v5628_v13, -inf }
 0x2aa   : > { %v4419_v16 = vpop.f32.mrf.mxu1 }
 0x2ab   : > { %v1598_v17 = vsel %vm1561_vm0, %v5630_v14, -inf  ;;  %v5636_v19 = vmul.f32 0.088388346, %v4419_v16 }
 0x2ac   : > { %1596 = vmax.xlane.f32.xlu1 %v1595_v15  ;;  %1599 = vmax.xlane.f32.xlu0 %v1598_v17  ;;  %v1536_v18 = vpop.f32.mrf.mxu1 }
 0x2ad   : > { %v5638_v20 = vmul.f32 0.088388346, %v1536_v18  ;;  %v1607_v23 = vsel %vm1561_vm0, %v5636_v19, -inf }
 0x2af   : > { %v1604_v22 = vsel %vm1561_vm0, %v5638_v20, -inf }
 0x2b0   : > { %1602 = vmax.xlane.f32.xlu1 %v1601_v21  ;;  %1605 = vmax.xlane.f32.xlu0 %v1604_v22 }
 0x2b4   : > { %1608 = vmax.xlane.f32.xlu1 %v1607_v23 }
 0x31d   : > { %v1564_v24 = vpop.xlane.xlu0 %1563 }
 0x31e   : > { %v1610_v25 = vsub.f32 %v5580_v40, %v1564_v24 }
 0x320   : > { %v1626_v26 = vmul.f32 1.442695, %v1610_v25 }
 0x321   : > { %v1567_v27 = vpop.xlane.xlu0 %1566  ;;  %v1570_v28 = vpop.xlane.xlu1 %1569 }
 0x322   : > { %4672 = vpow2.f32 %v1626_v26  ;;  %v1611_v29 = vsub.f32 %v5582_v42, %v1567_v27  ;;  %v1612_v30 = vsub.f32 %v5586_v45, %v1570_v28 }
 0x324   : > { %v1628_v31 = vmul.f32 1.442695, %v1611_v29  ;;  %v1630_v32 = vmul.f32 1.442695, %v1612_v30 }
 0x325   : > { %v1573_v33 = vpop.xlane.xlu1 %1572  ;;  %v1576_v34 = vpop.xlane.xlu0 %1575 }
 0x326   : > { %4674 = vpow2.f32 %v1628_v31  ;;  %v1613_v35 = vsub.f32 %v5588_v47, %v1573_v33  ;;  %v1614_v36 = vsub.f32 %v5596_v52, %v1576_v34  ;;  %v4370_v33 = vpop.f32.mrf.mxu0 }
 0x327   : > { %4676 = vpow2.f32 %v1630_v32  ;;  %4420 = vmatprep.subr.mxu0 %v4370_v33 }
 0x328   : > { %v1632_v37 = vmul.f32 1.442695, %v1613_v35  ;;  %v1634_v38 = vmul.f32 1.442695, %v1614_v36  ;;  %v1150_v35 = vpop.f32.mrf.mxu0  ;;  %4421 = vmatpush3.msra.mxu0 %v4370_v33  ;;  %v1200_v33 = vld [vmem:[#allocation13 + $0x58] sm:$0xff] }
 0x329   : > { %v1579_v39 = vpop.xlane.xlu1 %1578  ;;  %v1582_v40 = vpop.xlane.xlu0 %1581  ;;  %4422 = vmatprep.subr.mxu0 %v1150_v35 }
 0x32a   : > { %4678 = vpow2.f32 %v1632_v37  ;;  %v1615_v41 = vsub.f32 %v5594_v51, %v1579_v39  ;;  %v1616_v42 = vsub.f32 %v5604_v58, %v1582_v40  ;;  %4423 = vmatpush3.msra.mxu0 %v1150_v35  ;;  %v1199_v35 = vld [vmem:[#allocation13 + $0x50] sm:$0xff] }
 0x32b   : > { %4680 = vpow2.f32 %v1634_v38 }
 0x32c   : > { %v1636_v43 = vmul.f32 1.442695, %v1615_v41  ;;  %v1638_v44 = vmul.f32 1.442695, %v1616_v42  ;;  %v4373_v42 = vpop.f32.mrf.mxu0 }
 0x32d   : > { %v1585_v45 = vpop.xlane.xlu1 %1584  ;;  %v1588_v46 = vpop.xlane.xlu0 %1587  ;;  %4430 = vmatprep.subr.mxu1 %v4373_v42 }
 0x32e   : > { %4682 = vpow2.f32 %v1636_v43  ;;  %v1617_v47 = vsub.f32 %v5602_v57, %v1585_v45  ;;  %v1618_v48 = vsub.f32 %v5613_v1, %v1588_v46  ;;  %v1160_v43 = vpop.f32.mrf.mxu0  ;;  %4431 = vmatpush3.msra.mxu1 %v4373_v42  ;;  %v1195_v42 = vld [vmem:[#allocation13 + $0x30] sm:$0xff] }
 0x32f   : > { %v5655_v49 = vpop.eup %4672  ;;  %4684 = vpow2.f32 %v1638_v44  ;;  %4432 = vmatprep.subr.mxu1 %v1160_v43 }
 0x330   : > { %v1640_v50 = vmul.f32 1.442695, %v1617_v47  ;;  %v1642_v52 = vmul.f32 1.442695, %v1618_v48  ;;  %v1658_v51 = vsel %vm1561_vm0, %v5655_v49, 0.0  ;;  %4433 = vmatpush3.msra.mxu1 %v1160_v43  ;;  %v4376_v44 = vpop.f32.mrf.mxu0  ;;  %v1194_v43 = vld [vmem:[#allocation13 + $0x28] sm:$0xff] }
 0x331   : > { %v1591_v53 = vpop.xlane.xlu1 %1590  ;;  %v1594_v54 = vpop.xlane.xlu0 %1593  ;;  %1659 = vadd.xlane.f32.xlu0 %v1658_v51  ;;  %4440 = vmatprep.subr.mxu0 %v4376_v44 }
 0x332   : > { %4686 = vpow2.f32 %v1640_v50  ;;  %v1619_v55 = vsub.f32 %v5611_v0, %v1591_v53  ;;  %v1620_v56 = vsub.f32 %v5622_v8, %v1594_v54  ;;  %v1170_v45 = vpop.f32.mrf.mxu0 }
 0x333   : > { %v5661_v58 = vpop.eup %4674  ;;  %4688 = vpow2.f32 %v1642_v52 }
 0x334   : > { %v5663_v57 = vpop.eup %4676  ;;  %v1644_v59 = vmul.f32 1.442695, %v1619_v55  ;;  %v1646_v60 = vmul.f32 1.442695, %v1620_v56  ;;  %v1661_v61 = vsel %vm1561_vm0, %v5661_v58, 0.0  ;;  %v5726_v46 = vpop.f32.mrf.mxu0 }
 0x335   : > { %v1597_v62 = vpop.xlane.xlu1 %1596  ;;  %v1600_v63 = vpop.xlane.xlu0 %1599  ;;  %1662 = vadd.xlane.f32.xlu1 %v1661_v61  ;;  %v1664_v1 = vsel %vm1561_vm0, %v5663_v57, 0.0  ;;  %4450 = vmatprep.subr.mxu1 %v5726_v46 }
 0x336   : > { %4690 = vpow2.f32 %v1644_v59  ;;  %v1621_v0 = vsub.f32 %v5620_v7, %v1597_v62  ;;  %v1622_v2 = vsub.f32 %v5630_v14, %v1600_v63  ;;  %1665 = vadd.xlane.f32.xlu0 %v1664_v1 }
 0x337   : > { %v5671_v3 = vpop.eup %4678  ;;  %4692 = vpow2.f32 %v1646_v60 }
 0x338   : > { %v5673_v4 = vpop.eup %4680  ;;  %v1648_v5 = vmul.f32 1.442695, %v1621_v0  ;;  %v1650_v6 = vmul.f32 1.442695, %v1622_v2  ;;  %v1667_v8 = vsel %vm1561_vm0, %v5671_v3, 0.0 }
 0x339   : > { %v1603_v9 = vpop.xlane.xlu1 %1602  ;;  %1668 = vadd.xlane.f32.xlu1 %v1667_v8  ;;  %v1670_v10 = vsel %vm1561_vm0, %v5673_v4, 0.0  ;;  %v1606_v11 = vpop.xlane.xlu0 %1605 }
 0x33a   : > { %4694 = vpow2.f32 %v1648_v5  ;;  %v1623_v7 = vsub.f32 %v5628_v13, %v1603_v9  ;;  %1671 = vadd.xlane.f32.xlu0 %v1670_v10  ;;  %v1624_v12 = vsub.f32 %v5638_v20, %v1606_v11  ;;  %v1204_v5 = vld [vmem:[#allocation13 + $0x78] sm:$0xff] }
 0x33b   : > { %v5681_v14 = vpop.eup %4682  ;;  %4696 = vpow2.f32 %v1650_v6 }
 0x33c   : > { %v5683_v15 = vpop.eup %4684  ;;  %v1652_v16 = vmul.f32 1.442695, %v1623_v7  ;;  %v1654_v17 = vmul.f32 1.442695, %v1624_v12  ;;  %v1673_v18 = vsel %vm1561_vm0, %v5681_v14, 0.0  ;;  %v1180_v12 = vpop.f32.mrf.mxu0 }
 0x33d   : > { %1674 = vadd.xlane.f32.xlu1 %v1673_v18  ;;  %v1609_v21 = vpop.xlane.xlu1 %1608  ;;  %v1676_v22 = vsel %vm1561_vm0, %v5683_v15, 0.0 }
 0x33e   : > { %4698 = vpow2.f32 %v1652_v16  ;;  %v1625_v13 = vsub.f32 %v5636_v19, %v1609_v21  ;;  %1677 = vadd.xlane.f32.xlu0 %v1676_v22 }
 0x33f   : > { %v5690_v20 = vpop.eup %4686  ;;  %4700 = vpow2.f32 %v1654_v17 }
 0x340   : > { %v5692_v23 = vpop.eup %4688  ;;  %v1656_v24 = vmul.f32 1.442695, %v1625_v13  ;;  %v1679_v25 = vsel %vm1561_vm0, %v5690_v20, 0.0 }
 0x341   : > { %1680 = vadd.xlane.f32.xlu1 %v1679_v25  ;;  %v1682_v26 = vsel %vm1561_vm0, %v5692_v23, 0.0  ;;  %v1203_v25 = vld [vmem:[#allocation13 + $0x70] sm:$0xff] }
 0x342   : > { %4702 = vpow2.f32 %v1656_v24  ;;  %1683 = vadd.xlane.f32.xlu0 %v1682_v26  ;;  %v1202_v26 = vld [vmem:[#allocation13 + $0x68] sm:$0xff] }
 0x343   : > { %v5698_v27 = vpop.eup %4690 }
 0x344   : > { %v5700_v28 = vpop.eup %4692  ;;  %v1685_v19 = vsel %vm1561_vm0, %v5698_v27, 0.0 }
 0x345   : > { %1686 = vadd.xlane.f32.xlu1 %v1685_v19  ;;  %v1688_v29 = vsel %vm1561_vm0, %v5700_v28, 0.0 }
 0x346   : > { %1689 = vadd.xlane.f32.xlu0 %v1688_v29 }
 0x347   : > { %v5706_v30 = vpop.eup %4694 }
 0x348   : > { %v5708_v31 = vpop.eup %4696  ;;  %v1691_v32 = vsel %vm1561_vm0, %v5706_v30, 0.0 }
 0x349   : > { %1692 = vadd.xlane.f32.xlu1 %v1691_v32  ;;  %v1694_v34 = vsel %vm1561_vm0, %v5708_v31, 0.0 }
 0x34a   : > { %1695 = vadd.xlane.f32.xlu0 %v1694_v34 }
 0x34b   : > { %v5714_v36 = vpop.eup %4698 }
 0x34c   : > { %v5716_v37 = vpop.eup %4700  ;;  %v1697_v38 = vsel %vm1561_vm0, %v5714_v36, 0.0 }
 0x34d   : > { %1698 = vadd.xlane.f32.xlu1 %v1697_v38  ;;  %v1700_v39 = vsel %vm1561_vm0, %v5716_v37, 0.0 }
 0x34e   : > { %1701 = vadd.xlane.f32.xlu0 %v1700_v39  ;;  %v1198_v39 = vld [vmem:[#allocation13 + $0x48] sm:$0xff] }
 0x34f   : > { %v5722_v40 = vpop.eup %4702 }
 0x350   : > { %v1703_v41 = vsel %vm1561_vm0, %v5722_v40, 0.0 }
 0x351   : > { %1704 = vadd.xlane.f32.xlu1 %v1703_v41  ;;  %v1196_v41 = vld [vmem:[#allocation13 + $0x38] sm:$0xff] }
 0x3ba   : > { %v1660_v47 = vpop.xlane.xlu0 %1659 }
 0x3bb   : > { %4704 = vrcp.f32 %v1660_v47  ;;  %v1189_v47 = vld [vmem:[#allocation13] sm:$0xff] }
 0x3be   : > { %v1663_v48 = vpop.xlane.xlu1 %1662 }
 0x3bf   : > { %4706 = vrcp.f32 %v1663_v48  ;;  %v1666_v50 = vpop.xlane.xlu0 %1665 }
 0x3c0   : > { %4708 = vrcp.f32 %v1666_v50 }
 0x3c2   : > { %v1669_v52 = vpop.xlane.xlu1 %1668 }
 0x3c3   : > { %4710 = vrcp.f32 %v1669_v52  ;;  %v1672_v51 = vpop.xlane.xlu0 %1671 }
 0x3c4   : > { %4712 = vrcp.f32 %v1672_v51 }
 0x3c6   : > { %v1675_v53 = vpop.xlane.xlu1 %1674 }
 0x3c7   : > { %4714 = vrcp.f32 %v1675_v53  ;;  %v1678_v54 = vpop.xlane.xlu0 %1677 }
 0x3c8   : > { %v4705_v55 = vpop.eup %4704  ;;  %4716 = vrcp.f32 %v1678_v54 }
 0x3c9   : > { %v1722_v56 = vmul.f32 %v4705_v55, %v5655_v49 }
 0x3ca   : > { %v1681_v59 = vpop.xlane.xlu1 %1680 }
 0x3cb   : > { %4718 = vrcp.f32 %v1681_v59  ;;  %v1684_v60 = vpop.xlane.xlu0 %1683  ;;  %4424 = vmatprep.mubr.msk.f32.mxu0 %vm1561_vm0, %v1722_v56  ;;  %2126 = vst.msk [vmem:[%s5733_s9] sm:$0xff] %vm1561_vm0, %v1722_v56 }
 0x3cc   : > { %v4707_v61 = vpop.eup %4706  ;;  %4720 = vrcp.f32 %v1684_v60 }
 0x3cd   : > { %v4709_v62 = vpop.eup %4708  ;;  %v1723_v63 = vmul.f32 %v4707_v61, %v5661_v58 }
 0x3ce   : > { %v1687_v1 = vpop.xlane.xlu1 %1686  ;;  %v1724_v0 = vmul.f32 %v4709_v62, %v5663_v57 }
 0x3cf   : > { %2127 = vst.msk [vmem:[%s5733_s9 + $0x8] sm:$0xff] %vm1561_vm0, %v1723_v63  ;;  %4722 = vrcp.f32 %v1687_v1  ;;  %v1690_v49 = vpop.xlane.xlu0 %1689  ;;  %4425 = vmatmul.mubr.msk.f32.vlgmr.msra.gmra.mxu0 %vm1561_vm0, %v1723_v63 }
 0x3d0   : > { %v4711_v2 = vpop.eup %4710  ;;  %4724 = vrcp.f32 %v1690_v49  ;;  %4427 = vmatprep.mubr.msk.f32.mxu0 %vm1561_vm0, %v1724_v0  ;;  %2128 = vst.msk [vmem:[%s5733_s9 + $0x10] sm:$0xff] %vm1561_vm0, %v1724_v0  ;;  %4441 = vmatpush3.msra.mxu0 %v4376_v44  ;;  %v1193_v44 = vld [vmem:[#allocation13 + $0x20] sm:$0xff] }
 0x3d1   : > { %v4713_v58 = vpop.eup %4712  ;;  %v1725_v6 = vmul.f32 %v4711_v2, %v5671_v3  ;;  %4442 = vmatprep.subr.mxu0 %v1170_v45  ;;  %v5803_v2 = vld [vmem:[%s6712_s7] ss:$0 sm:$0xff]  ;;  %s3641_s7 = sshll.u32 %s6503_s13, 4  ;;  %s6570_s7 = int_to_ptr.vmem [resolvable:$true] %s3641_s7 }
 0x3d2   : > { %v1693_v57 = vpop.xlane.xlu1 %1692  ;;  %v1726_v8 = vmul.f32 %v4713_v58, %v5673_v4  ;;  %4443 = vmatpush3.msra.mxu0 %v1170_v45  ;;  %v1191_v45 = vld [vmem:[#allocation13 + $0x10] sm:$0xff] }
 0x3d3   : > { %4726 = vrcp.f32 %v1693_v57  ;;  %v1696_v9 = vpop.xlane.xlu0 %1695  ;;  %4428 = vmatmul.mubr.msk.f32.gmra.mxu0 %vm1561_vm0, %v1725_v6  ;;  %2129 = vst.msk [vmem:[%s5733_s9 + $0x18] sm:$0xff] %vm1561_vm0, %v1725_v6  ;;  %4460 = vmatprep.subr.mxu0 %v1204_v5 }
 0x3d4   : > { %v4715_v10 = vpop.eup %4714  ;;  %4728 = vrcp.f32 %v1696_v9  ;;  %4434 = vmatprep.mubr.msk.f32.mxu1 %vm1561_vm0, %v1726_v8  ;;  %2130 = vst.msk [vmem:[%s5733_s9 + $0x20] sm:$0xff] %vm1561_vm0, %v1726_v8  ;;  %v4800_v8 = vld [vmem:[%s5522_s20 + $0x8] sm:$0xff] }
 0x3d5   : > { %v4717_v3 = vpop.eup %4716  ;;  %v1727_v11 = vmul.f32 %v4715_v10, %v5681_v14 }
 0x3d6   : > { %v1699_v4 = vpop.xlane.xlu1 %1698  ;;  %v1728_v7 = vmul.f32 %v4717_v3, %v5683_v15 }
 0x3d7   : > { %2131 = vst.msk [vmem:[%s5733_s9 + $0x28] sm:$0xff] %vm1561_vm0, %v1727_v11  ;;  %4730 = vrcp.f32 %v1699_v4  ;;  %v1702_v16 = vpop.xlane.xlu0 %1701  ;;  %4435 = vmatmul.mubr.msk.f32.vlgmr.msra.gmra.mxu1 %vm1561_vm0, %v1727_v11  ;;  %v4801_v11 = vld [vmem:[%s5522_s20] sm:$0xff] }
 0x3d8   : > { %v4719_v17 = vpop.eup %4718  ;;  %4732 = vrcp.f32 %v1702_v16  ;;  %4437 = vmatprep.mubr.msk.f32.mxu1 %vm1561_vm0, %v1728_v7  ;;  %2132 = vst.msk [vmem:[%s5733_s9 + $0x30] sm:$0xff] %vm1561_vm0, %v1728_v7  ;;  %4451 = vmatpush3.msra.mxu1 %v5726_v46  ;;  %v1190_v46 = vld [vmem:[#allocation13 + $0x8] sm:$0xff]  ;;  %v4802_v16 = vld [vmem:[%s5522_s20 + $0x18] sm:$0xff] }
 0x3d9   : > { %v4721_v14 = vpop.eup %4720  ;;  %v1729_v15 = vmul.f32 %v4719_v17, %v5690_v20  ;;  %4452 = vmatprep.subr.mxu1 %v1180_v12 }
 0x3da   : > { %v1705_v18 = vpop.xlane.xlu1 %1704  ;;  %v1730_v21 = vmul.f32 %v4721_v14, %v5692_v23  ;;  %4453 = vmatpush3.msra.mxu1 %v1180_v12 }
 0x3db   : > { %4734 = vrcp.f32 %v1705_v18  ;;  %4438 = vmatmul.mubr.msk.f32.gmra.mxu1 %vm1561_vm0, %v1729_v15  ;;  %2133 = vst.msk [vmem:[%s5733_s9 + $0x38] sm:$0xff] %vm1561_vm0, %v1729_v15  ;;  %v4803_v18 = vld [vmem:[%s5522_s20 + $0x10] sm:$0xff] }
 0x3dc   : > { %v4723_v22 = vpop.eup %4722  ;;  %4444 = vmatprep.mubr.msk.f32.mxu0 %vm1561_vm0, %v1730_v21  ;;  %2134 = vst.msk [vmem:[%s5733_s9 + $0x40] sm:$0xff] %vm1561_vm0, %v1730_v21 }
 0x3dd   : > { %v4725_v13 = vpop.eup %4724  ;;  %v1731_v24 = vmul.f32 %v4723_v22, %v5698_v27 }
 0x3de   : > { %v1732_v20 = vmul.f32 %v4725_v13, %v5700_v28  ;;  %v1201_v28 = vld [vmem:[#allocation13 + $0x60] sm:$0xff] }
 0x3df   : > { %2135 = vst.msk [vmem:[%s5733_s9 + $0x48] sm:$0xff] %vm1561_vm0, %v1731_v24  ;;  %4445 = vmatmul.mubr.msk.f32.vlgmr.msra.gmra.mxu0 %vm1561_vm0, %v1731_v24  ;;  %v4804_v24 = vld [vmem:[%s5522_s20 + $0x28] sm:$0xff] }
 0x3e0   : > { %v4727_v23 = vpop.eup %4726  ;;  %4447 = vmatprep.mubr.msk.f32.mxu0 %vm1561_vm0, %v1732_v20  ;;  %2136 = vst.msk [vmem:[%s5733_s9 + $0x50] sm:$0xff] %vm1561_vm0, %v1732_v20  ;;  %4461 = vmatpush3.msra.mxu0 %v1204_v5 }
 0x3e1   : > { %v4729_v19 = vpop.eup %4728  ;;  %v1733_v29 = vmul.f32 %v4727_v23, %v5706_v30  ;;  %4462 = vmatprep.subr.mxu0 %v1203_v25 }
 0x3e2   : > { %v1734_v27 = vmul.f32 %v4729_v19, %v5708_v31  ;;  %4463 = vmatpush3.msra.mxu0 %v1203_v25 }
 0x3e3   : > { %4448 = vmatmul.mubr.msk.f32.gmra.mxu0 %vm1561_vm0, %v1733_v29  ;;  %2137 = vst.msk [vmem:[%s5733_s9 + $0x58] sm:$0xff] %vm1561_vm0, %v1733_v29  ;;  %4464 = vmatprep.subr.mxu0 %v1202_v26 }
 0x3e4   : > { %v4731_v32 = vpop.eup %4730  ;;  %4454 = vmatprep.mubr.msk.f32.mxu1 %vm1561_vm0, %v1734_v27  ;;  %2138 = vst.msk [vmem:[%s5733_s9 + $0x60] sm:$0xff] %vm1561_vm0, %v1734_v27  ;;  %4465 = vmatpush3.msra.mxu0 %v1202_v26  ;;  %v4805_v26 = vld [vmem:[%s5522_s20 + $0x20] sm:$0xff] }
 0x3e5   : > { %v4733_v30 = vpop.eup %4732  ;;  %v1735_v34 = vmul.f32 %v4731_v32, %v5714_v36  ;;  %4466 = vmatprep.subr.mxu0 %v1201_v28 }
 0x3e6   : > { %v1736_v31 = vmul.f32 %v4733_v30, %v5716_v37  ;;  %4467 = vmatpush3.msra.mxu0 %v1201_v28  ;;  %v1197_v37 = vld [vmem:[#allocation13 + $0x40] sm:$0xff]  ;;  %v4806_v28 = vld [vmem:[%s5522_s20 + $0x38] sm:$0xff] }
 0x3e7   : > { %2139 = vst.msk [vmem:[%s5733_s9 + $0x68] sm:$0xff] %vm1561_vm0, %v1735_v34  ;;  %4455 = vmatmul.mubr.msk.f32.vlgmr.msra.gmra.mxu1 %vm1561_vm0, %v1735_v34  ;;  %4468 = vmatprep.subr.mxu0 %v1200_v33  ;;  %v4807_v34 = vld [vmem:[%s5522_s20 + $0x30] sm:$0xff] }
 0x3e8   : > { %v4735_v38 = vpop.eup %4734  ;;  %4457 = vmatprep.mubr.msk.f32.mxu1 %vm1561_vm0, %v1736_v31  ;;  %2140 = vst.msk [vmem:[%s5733_s9 + $0x70] sm:$0xff] %vm1561_vm0, %v1736_v31  ;;  %4469 = vmatpush3.msra.mxu0 %v1200_v33 }
 0x3e9   : > { %v1737_v36 = vmul.f32 %v4735_v38, %v5722_v40  ;;  %4470 = vmatprep.subr.mxu0 %v1199_v35  ;;  %v1192_v40 = vld [vmem:[#allocation13 + $0x18] sm:$0xff] }
 0x3ea   : > { %4471 = vmatpush3.msra.mxu0 %v1199_v35 }
 0x3eb   : > { %4458 = vmatmul.mubr.msk.f32.gmra.mxu1 %vm1561_vm0, %v1737_v36  ;;  %2141 = vst.msk [vmem:[%s5733_s9 + $0x78] sm:$0xff] %vm1561_vm0, %v1737_v36  ;;  %4472 = vmatprep.subr.mxu0 %v1198_v39  ;;  %s6730_s9 = sld [smem:[#allocation47_spill]] }
 0x3ec   : > { %4473 = vmatpush3.msra.mxu0 %v1198_v39  ;;  %v4808_v39 = vld [vmem:[%s5522_s20 + $0x48] sm:$0xff] }
 0x3ed   : > { %4474 = vmatprep.subr.mxu0 %v1197_v37 }
 0x3ee   : > { %4475 = vmatpush3.msra.mxu0 %v1197_v37 }
 0x3ef   : > { %4476 = vmatprep.subr.mxu0 %v1196_v41 }
 0x3f0   : > { %4477 = vmatpush3.msra.mxu0 %v1196_v41 }
 0x3f1   : > { %4478 = vmatprep.subr.mxu0 %v1195_v42 }
 0x3f2   : > { %4479 = vmatpush3.msra.mxu0 %v1195_v42  ;;  %v4809_v42 = vld [vmem:[%s5522_s20 + $0x40] sm:$0xff] }
 0x3f3   : > { %4480 = vmatprep.subr.mxu0 %v1194_v43 }
 0x3f4   : > { %4481 = vmatpush3.msra.mxu0 %v1194_v43 }
 0x3f5   : > { %4482 = vmatprep.subr.mxu0 %v1193_v44 }
 0x3f6   : > { %4483 = vmatpush3.msra.mxu0 %v1193_v44 }
 0x3f7   : > { %4484 = vmatprep.subr.mxu0 %v1192_v40 }
 0x3f8   : > { %4485 = vmatpush3.msra.mxu0 %v1192_v40 }
 0x3f9   : > { %4486 = vmatprep.subr.mxu0 %v1191_v45 }
 0x3fa   : > { %4487 = vmatpush3.msra.mxu0 %v1191_v45  ;;  %v4810_v45 = vld [vmem:[%s5522_s20 + $0x58] sm:$0xff] }
 0x3fb   : > { %4488 = vmatprep.subr.mxu0 %v1190_v46 }
 0x3fc   : > { %4489 = vmatpush3.msra.mxu0 %v1190_v46 }
 0x3fd   : > { %4490 = vmatprep.subr.mxu0 %v1189_v47 }
 0x3fe   : > { %4491 = vmatpush3.msra.mxu0 %v1189_v47 }
 0x48f   : > { %v4426_v48 = vpop.f32.mrf.mxu0 }
 0x491   : > { %v1816_v50 = vpop.f32.mrf.mxu0 }
 0x492   : > { %4492 = vmatprep.mubr.f32.mxu0 %v1816_v50  ;;  %v4811_v50 = vld [vmem:[%s5522_s20 + $0x50] sm:$0xff] }
 0x493   : > { %v4429_v52 = vpop.f32.mrf.mxu0  ;;  %4493 = vmatmul.mubr.f32.vlgmr.msra.gmra.mxu0 %v4426_v48 }
 0x495   : > { %v1826_v51 = vpop.f32.mrf.mxu0 }
 0x496   : > { %4495 = vmatprep.mubr.f32.mxu0 %v1826_v51 }
 0x497   : > { %v4436_v53 = vpop.f32.mrf.mxu1  ;;  %4496 = vmatmul.mubr.f32.gmra.mxu0 %v4429_v52 }
 0x499   : > { %v1913_v54 = vpop.f32.mrf.mxu1 }
 0x49a   : > { %4498 = vmatprep.mubr.f32.mxu0 %v1913_v54  ;;  %v4812_v54 = vld [vmem:[%s5522_s20 + $0x68] sm:$0xff] }
 0x49b   : > { %v4439_v55 = vpop.f32.mrf.mxu1  ;;  %4499 = vmatmul.mubr.f32.gmra.mxu0 %v4436_v53 }
 0x49d   : > { %v1923_v56 = vpop.f32.mrf.mxu1 }
 0x49e   : > { %4501 = vmatprep.mubr.f32.mxu0 %v1923_v56 }
 0x49f   : > { %v4446_v59 = vpop.f32.mrf.mxu0  ;;  %4502 = vmatmul.mubr.f32.gmra.mxu0 %v4439_v55 }
 0x4a1   : > { %v2010_v60 = vpop.f32.mrf.mxu0 }
 0x4a2   : > { %4504 = vmatprep.mubr.f32.mxu0 %v2010_v60  ;;  %v4813_v60 = vld [vmem:[%s5522_s20 + $0x60] sm:$0xff] }
 0x4a3   : > { %v4449_v61 = vpop.f32.mrf.mxu0  ;;  %4505 = vmatmul.mubr.f32.gmra.mxu0 %v4446_v59 }
 0x4a5   : > { %v2020_v62 = vpop.f32.mrf.mxu0 }
 0x4a6   : > { %4507 = vmatprep.mubr.f32.mxu0 %v2020_v62 }
 0x4a7   : > { %v4456_v63 = vpop.f32.mrf.mxu1  ;;  %4508 = vmatmul.mubr.f32.gmra.mxu0 %v4449_v61 }
 0x4a9   : > { %v2107_v1 = vpop.f32.mrf.mxu1 }
 0x4aa   : > { %4510 = vmatprep.mubr.f32.mxu0 %v2107_v1  ;;  %v4814_v1 = vld [vmem:[%s5522_s20 + $0x78] sm:$0xff] }
 0x4ab   : > { %v4459_v0 = vpop.f32.mrf.mxu1  ;;  %4511 = vmatmul.mubr.f32.gmra.mxu0 %v4456_v63 }
 0x4ad   : > { %v2117_v49 = vpop.f32.mrf.mxu1 }
 0x4ae   : > { %4513 = vmatprep.mubr.f32.mxu0 %v2117_v49  ;;  %v4815_v49 = vld [vmem:[%s5522_s20 + $0x70] sm:$0xff]  ;;  %s5060_s20 = sshll.u32 %s5152_s0, 4  ;;  %s5061_s20 = int_to_ptr.vmem [resolvable:$false] %s5060_s20 }
 0x4af   : > { %4514 = vmatmul.mubr.f32.gmra.mxu0 %v4459_v0  ;;  %s5062_s3 = scalar_lea.vmem %s5061_s20, 4096  ;;  %p5063_p5 = scmp.lt.s32.totalorder %s6570_s7, %s5061_s20 }
 0x553   : > { %v4494_v5 = vpop.f32.mrf.mxu0 }
 0x554   : > { %v2221_v58 = vadd.f32 %v4494_v5, %v5803_v2 }
 0x555   : > { %v2215_v6 = vpop.f32.mrf.mxu0 }
 0x556   : > { %v2216_v57 = vadd.f32 %v5803_v2, %v2215_v6  ;;  %v5808_v9 = vadd.f32 %v4800_v8, %v2221_v58  ;;  %v2594_v58 = vld [vmem:[#allocation14 + $0x1e8] sm:$0xff]  ;;  %v2596_v6 = vld [vmem:[#allocation14 + $0x1f8] sm:$0xff]  ;;  %v2595_v8 = vld [vmem:[#allocation14 + $0x1f0] sm:$0xff] }
 0x557   : > { %v4497_v10 = vpop.f32.mrf.mxu0  ;;  %2619 = vmatprep.subr.mxu1 %v2594_v58  ;;  %2780 = vmatprep.subr.mxu0 %v2596_v6  ;;  %v2577_v58 = vld [vmem:[#allocation14 + $0x160] sm:$0xff]  ;;  %v2579_v6 = vld [vmem:[#allocation14 + $0x170] sm:$0xff] }
 0x558   : > { %v2231_v3 = vadd.f32 %v4497_v10, %v5803_v2  ;;  %2312 = vadd.xlane.f32.xlu1 %v5808_v9  ;;  %v5813_v4 = vadd.f32 %v4801_v11, %v2216_v57  ;;  %v2593_v57 = vld [vmem:[#allocation14 + $0x1e0] sm:$0xff]  ;;  %v2590_v10 = vld [vmem:[#allocation14 + $0x1c8] sm:$0xff]  ;;  %2781 = vmatpush1.msra.mxu0 %v2595_v8  ;;  %v2591_v11 = vld [vmem:[#allocation14 + $0x1d0] sm:$0xff] }
 0x559   : > { %v2225_v7 = vpop.f32.mrf.mxu0  ;;  %2620 = vmatpush1.msra.mxu1 %v2593_v57 }
 0x55a   : > { %v2226_v12 = vadd.f32 %v5803_v2, %v2225_v7  ;;  %2310 = vadd.xlane.f32.xlu0 %v5813_v4  ;;  %v5818_v17 = vadd.f32 %v4802_v16, %v2231_v3  ;;  %v2589_v3 = vld [vmem:[#allocation14 + $0x1c0] sm:$0xff]  ;;  %v2586_v7 = vld [vmem:[#allocation14 + $0x1a8] sm:$0xff]  ;;  %2621 = vmatprep.subr.mxu1 %v2590_v10 }
 0x55b   : > { %v4500_v14 = vpop.f32.mrf.mxu0  ;;  %v2585_v16 = vld [vmem:[#allocation14 + $0x1a0] sm:$0xff]  ;;  %2622 = vmatpush1.msra.mxu1 %v2589_v3  ;;  %v2574_v10 = vld [vmem:[#allocation14 + $0x148] sm:$0xff] }
 0x55c   : > { %v2241_v15 = vadd.f32 %v4500_v14, %v5803_v2  ;;  %2316 = vadd.xlane.f32.xlu1 %v5818_v17  ;;  %v5823_v21 = vadd.f32 %v4803_v18, %v2226_v12  ;;  %v2588_v12 = vld [vmem:[#allocation14 + $0x1b8] sm:$0xff]  ;;  %v2587_v14 = vld [vmem:[#allocation14 + $0x1b0] sm:$0xff]  ;;  %2623 = vmatprep.subr.mxu1 %v2586_v7 }
 0x55d   : > { %v2235_v22 = vpop.f32.mrf.mxu0  ;;  %2624 = vmatpush1.msra.mxu1 %v2585_v16  ;;  %v2575_v7 = vld [vmem:[#allocation14 + $0x150] sm:$0xff] }
 0x55e   : > { %v2236_v13 = vadd.f32 %v5803_v2, %v2235_v22  ;;  %2314 = vadd.xlane.f32.xlu0 %v5823_v21  ;;  %v5828_v20 = vadd.f32 %v4804_v24, %v2241_v15 }
 0x55f   : > { %v4503_v25 = vpop.f32.mrf.mxu0 }
 0x560   : > { %v2251_v23 = vadd.f32 %v4503_v25, %v5803_v2  ;;  %2320 = vadd.xlane.f32.xlu1 %v5828_v20  ;;  %v5833_v19 = vadd.f32 %v4805_v26, %v2236_v13 }
 0x561   : > { %v2245_v29 = vpop.f32.mrf.mxu0 }
 0x562   : > { %v2246_v27 = vadd.f32 %v5803_v2, %v2245_v29  ;;  %2318 = vadd.xlane.f32.xlu0 %v5833_v19  ;;  %v5838_v32 = vadd.f32 %v4806_v28, %v2251_v23 }
 0x563   : > { %v4506_v33 = vpop.f32.mrf.mxu0 }
 0x564   : > { %v2261_v30 = vadd.f32 %v4506_v33, %v5803_v2  ;;  %2324 = vadd.xlane.f32.xlu1 %v5838_v32  ;;  %v5843_v31 = vadd.f32 %v4807_v34, %v2246_v27 }
 0x565   : > { %v2255_v35 = vpop.f32.mrf.mxu0 }
 0x566   : > { %v2256_v38 = vadd.f32 %v5803_v2, %v2255_v35  ;;  %2322 = vadd.xlane.f32.xlu0 %v5843_v31  ;;  %v5848_v36 = vadd.f32 %v4808_v39, %v2261_v30 }
 0x567   : > { %v4509_v37 = vpop.f32.mrf.mxu0 }
 0x568   : > { %v2271_v41 = vadd.f32 %v4509_v37, %v5803_v2  ;;  %2328 = vadd.xlane.f32.xlu1 %v5848_v36  ;;  %v5853_v43 = vadd.f32 %v4809_v42, %v2256_v38 }
 0x569   : > { %v2265_v44 = vpop.f32.mrf.mxu0 }
 0x56a   : > { %v2266_v40 = vadd.f32 %v5803_v2, %v2265_v44  ;;  %2326 = vadd.xlane.f32.xlu0 %v5853_v43  ;;  %v5858_v46 = vadd.f32 %v4810_v45, %v2271_v41 }
 0x56b   : > { %v4512_v47 = vpop.f32.mrf.mxu0 }
 0x56c   : > { %v2281_v48 = vadd.f32 %v4512_v47, %v5803_v2  ;;  %2332 = vadd.xlane.f32.xlu1 %v5858_v46  ;;  %v5863_v52 = vadd.f32 %v4811_v50, %v2266_v40 }
 0x56d   : > { %v2275_v51 = vpop.f32.mrf.mxu0 }
 0x56e   : > { %v2276_v53 = vadd.f32 %v5803_v2, %v2275_v51  ;;  %2330 = vadd.xlane.f32.xlu0 %v5863_v52  ;;  %v5868_v55 = vadd.f32 %v4812_v54, %v2281_v48  ;;  %v2584_v54 = vld [vmem:[#allocation14 + $0x198] sm:$0xff] }
 0x56f   : > { %v4515_v56 = vpop.f32.mrf.mxu0 }
 0x570   : > { %v2291_v59 = vadd.f32 %v4515_v56, %v5803_v2  ;;  %2336 = vadd.xlane.f32.xlu1 %v5868_v55  ;;  %v5873_v61 = vadd.f32 %v4813_v60, %v2276_v53  ;;  %v2582_v53 = vld [vmem:[#allocation14 + $0x188] sm:$0xff] }
 0x571   : > { %v2285_v62 = vpop.f32.mrf.mxu0  ;;  %2625 = vmatprep.subr.mxu1 %v2582_v53  ;;  %v2557_v53 = vld [vmem:[#allocation14 + $0xc0] sm:$0xff] }
 0x572   : > { %v2286_v63 = vadd.f32 %v5803_v2, %v2285_v62  ;;  %2334 = vadd.xlane.f32.xlu0 %v5873_v61  ;;  %v5878_v0 = vadd.f32 %v4814_v1, %v2291_v59  ;;  %v2592_v2 = vld [vmem:[#allocation14 + $0x1d8] sm:$0xff]  ;;  %v2583_v59 = vld [vmem:[#allocation14 + $0x190] sm:$0xff] }
 0x573   : > { %2782 = vmatprep.subr.mxu0 %v2592_v2  ;;  %v2580_v1 = vld [vmem:[#allocation14 + $0x178] sm:$0xff] }
 0x574   : > { %2340 = vadd.xlane.f32.xlu1 %v5878_v0  ;;  %v5882_v5 = vadd.f32 %v4815_v49, %v2286_v63  ;;  %2783 = vmatpush1.msra.mxu0 %v2591_v11  ;;  %v2578_v63 = vld [vmem:[#allocation14 + $0x168] sm:$0xff]  ;;  %v2576_v2 = vld [vmem:[#allocation14 + $0x158] sm:$0xff]  ;;  %v2573_v11 = vld [vmem:[#allocation14 + $0x140] sm:$0xff] }
 0x575   : > { %2784 = vmatprep.subr.mxu0 %v2588_v12 }
 0x576   : > { %2338 = vadd.xlane.f32.xlu0 %v5882_v5  ;;  %2785 = vmatpush1.msra.mxu0 %v2587_v14  ;;  %v2570_v14 = vld [vmem:[#allocation14 + $0x128] sm:$0xff] }
 0x577   : > { %2786 = vmatprep.subr.mxu0 %v2584_v54 }
 0x578   : > { %2787 = vmatpush1.msra.mxu0 %v2583_v59  ;;  %v2556_v59 = vld [vmem:[#allocation14 + $0xb8] sm:$0xff] }
 0x579   : > { %2788 = vmatprep.subr.mxu0 %v2580_v1  ;;  %v2552_v1 = vld [vmem:[#allocation14 + $0x98] sm:$0xff] }
 0x57a   : > { %2789 = vmatpush1.msra.mxu0 %v2579_v6  ;;  %v2546_v6 = vld [vmem:[#allocation14 + $0x68] sm:$0xff] }
 0x57b   : > { %2790 = vmatprep.subr.mxu0 %v2576_v2  ;;  %v2542_v2 = vld [vmem:[#allocation14 + $0x48] sm:$0xff] }
 0x57c   : > { %2791 = vmatpush1.msra.mxu0 %v2575_v7  ;;  %v2543_v7 = vld [vmem:[#allocation14 + $0x50] sm:$0xff] }
 0x5e1   : > { %v2313_v15 = vpop.xlane.xlu1 %2312 }
 0x5e2   : > { %v2344_v18 = vmul.f32 0.0078125, %v2313_v15  ;;  %v2572_v15 = vld [vmem:[#allocation14 + $0x138] sm:$0xff] }
 0x5e3   : > { %v2311_v22 = vpop.xlane.xlu0 %2310  ;;  %2792 = vmatprep.subr.mxu0 %v2572_v15  ;;  %v2539_v15 = vld [vmem:[#allocation14 + $0x30] sm:$0xff] }
 0x5e4   : > { %v5886_v13 = vsub.f32 %v5808_v9, %v2344_v18  ;;  %v2343_v24 = vmul.f32 0.0078125, %v2311_v22  ;;  %v2569_v22 = vld [vmem:[#allocation14 + $0x120] sm:$0xff] }
 0x5e5   : > { %v2317_v25 = vpop.xlane.xlu1 %2316 }
 0x5e6   : > { %v5889_v23 = vsub.f32 %v5813_v4, %v2343_v24  ;;  %v2346_v26 = vmul.f32 0.0078125, %v2317_v25  ;;  %v2376_v29 = vmul.f32 %v5886_v13, %v5886_v13 }
 0x5e7   : > { %v2315_v27 = vpop.xlane.xlu0 %2314 }
 0x5e8   : > { %v5894_v28 = vsub.f32 %v5818_v17, %v2346_v26  ;;  %v2345_v33 = vmul.f32 0.0078125, %v2315_v27  ;;  %2393 = vadd.xlane.f32.xlu1 %v2376_v29  ;;  %v2375_v30 = vmul.f32 %v5889_v23, %v5889_v23  ;;  %v2571_v26 = vld [vmem:[#allocation14 + $0x130] sm:$0xff]  ;;  %v2566_v29 = vld [vmem:[#allocation14 + $0x108] sm:$0xff] }
 0x5e9   : > { %v2321_v9 = vpop.xlane.xlu1 %2320  ;;  %2793 = vmatpush1.msra.mxu0 %v2571_v26  ;;  %v5151_v26 = vmov 0.0  }
 0x5ea   : > { %v5899_v34 = vsub.f32 %v5823_v21, %v2345_v33  ;;  %v2348_v35 = vmul.f32 0.0078125, %v2321_v9  ;;  %2391 = vadd.xlane.f32.xlu0 %v2375_v30  ;;  %v2378_v4 = vmul.f32 %v5894_v28, %v5894_v28  ;;  %v2568_v33 = vld [vmem:[#allocation14 + $0x118] sm:$0xff]  ;;  %2683 = vmatprep.mubr.f32.mxu1 %v5151_v26 }
 0x5eb   : > { %v2319_v38 = vpop.xlane.xlu0 %2318  ;;  %2794 = vmatprep.subr.mxu0 %v2568_v33  ;;  %2844 = vmatprep.mubr.f32.mxu0 %v5151_v26 }
 0x5ec   : > { %v5904_v39 = vsub.f32 %v5828_v20, %v2348_v35  ;;  %v2347_v17 = vmul.f32 0.0078125, %v2319_v38  ;;  %2397 = vadd.xlane.f32.xlu1 %v2378_v4  ;;  %v2377_v37 = vmul.f32 %v5899_v34, %v5899_v34  ;;  %v2565_v35 = vld [vmem:[#allocation14 + $0x100] sm:$0xff]  ;;  %v2567_v4 = vld [vmem:[#allocation14 + $0x110] sm:$0xff] }
 0x5ed   : > { %v2325_v41 = vpop.xlane.xlu1 %2324  ;;  %2795 = vmatpush1.msra.mxu0 %v2567_v4 }
 0x5ee   : > { %v5909_v42 = vsub.f32 %v5833_v19, %v2347_v17  ;;  %v2350_v21 = vmul.f32 0.0078125, %v2325_v41  ;;  %2395 = vadd.xlane.f32.xlu0 %v2377_v37  ;;  %v2380_v44 = vmul.f32 %v5904_v39, %v5904_v39  ;;  %v2562_v17 = vld [vmem:[#allocation14 + $0xe8] sm:$0xff] }
 0x5ef   : > { %v2323_v40 = vpop.xlane.xlu0 %2322 }
 0x5f0   : > { %v5914_v45 = vsub.f32 %v5838_v32, %v2350_v21  ;;  %v2349_v20 = vmul.f32 0.0078125, %v2323_v40  ;;  %2401 = vadd.xlane.f32.xlu1 %v2380_v44  ;;  %v2379_v47 = vmul.f32 %v5909_v42, %v5909_v42  ;;  %v2581_v32 = vld [vmem:[#allocation14 + $0x180] sm:$0xff]  ;;  %v2564_v21 = vld [vmem:[#allocation14 + $0xf8] sm:$0xff] }
 0x5f1   : > { %v2329_v48 = vpop.xlane.xlu1 %2328  ;;  %2626 = vmatpush1.msra.mxu1 %v2581_v32  ;;  %v2561_v44 = vld [vmem:[#allocation14 + $0xe0] sm:$0xff]  ;;  %2796 = vmatprep.subr.mxu0 %v2564_v21  ;;  %v2554_v32 = vld [vmem:[#allocation14 + $0xa8] sm:$0xff] }
 0x5f2   : > { %v5919_v50 = vsub.f32 %v5843_v31, %v2349_v20  ;;  %v2352_v19 = vmul.f32 0.0078125, %v2329_v48  ;;  %2399 = vadd.xlane.f32.xlu0 %v2379_v47  ;;  %v2382_v51 = vmul.f32 %v5914_v45, %v5914_v45  ;;  %2627 = vmatprep.subr.mxu1 %v2578_v63  ;;  %v2563_v20 = vld [vmem:[#allocation14 + $0xf0] sm:$0xff] }
 0x5f3   : > { %v2327_v56 = vpop.xlane.xlu0 %2326  ;;  %2628 = vmatpush1.msra.mxu1 %v2577_v58  ;;  %2797 = vmatpush1.msra.mxu0 %v2563_v20  ;;  %v2555_v63 = vld [vmem:[#allocation14 + $0xb0] sm:$0xff] }
 0x5f4   : > { %v5924_v60 = vsub.f32 %v5848_v36, %v2352_v19  ;;  %v2351_v62 = vmul.f32 0.0078125, %v2327_v56  ;;  %2405 = vadd.xlane.f32.xlu1 %v2382_v51  ;;  %v2381_v31 = vmul.f32 %v5919_v50, %v5919_v50  ;;  %2629 = vmatprep.subr.mxu1 %v2574_v10  ;;  %v2558_v19 = vld [vmem:[#allocation14 + $0xc8] sm:$0xff]  ;;  %v2560_v51 = vld [vmem:[#allocation14 + $0xd8] sm:$0xff]  ;;  %v2551_v58 = vld [vmem:[#allocation14 + $0x90] sm:$0xff] }
 0x5f5   : > { %v2333_v49 = vpop.xlane.xlu1 %2332  ;;  %2630 = vmatpush1.msra.mxu1 %v2573_v11  ;;  %2798 = vmatprep.subr.mxu0 %v2560_v51  ;;  %v2547_v10 = vld [vmem:[#allocation14 + $0x70] sm:$0xff]  ;;  %v2541_v11 = vld [vmem:[#allocation14 + $0x40] sm:$0xff] }
 0x5f6   : > { %v5929_v57 = vsub.f32 %v5853_v43, %v2351_v62  ;;  %v2354_v8 = vmul.f32 0.0078125, %v2333_v49  ;;  %2403 = vadd.xlane.f32.xlu0 %v2381_v31  ;;  %v2384_v36 = vmul.f32 %v5924_v60, %v5924_v60  ;;  %2631 = vmatprep.subr.mxu1 %v2570_v14  ;;  %v2553_v31 = vld [vmem:[#allocation14 + $0xa0] sm:$0xff] }
 0x5f7   : > { %v2331_v3 = vpop.xlane.xlu0 %2330  ;;  %2632 = vmatpush1.msra.mxu1 %v2569_v22  ;;  %v2549_v49 = vld [vmem:[#allocation14 + $0x80] sm:$0xff]  ;;  %v2536_v22 = vld [vmem:[#allocation14 + $0x18] sm:$0xff] }
 0x5f8   : > { %v5934_v12 = vsub.f32 %v5858_v46, %v2354_v8  ;;  %v2353_v16 = vmul.f32 0.0078125, %v2331_v3  ;;  %2409 = vadd.xlane.f32.xlu1 %v2384_v36  ;;  %v2383_v43 = vmul.f32 %v5929_v57, %v5929_v57  ;;  %2633 = vmatprep.subr.mxu1 %v2566_v29  ;;  %v2548_v8 = vld [vmem:[#allocation14 + $0x78] sm:$0xff]  ;;  %v2545_v36 = vld [vmem:[#allocation14 + $0x60] sm:$0xff] }
 0x5f9   : > { %v2337_v18 = vpop.xlane.xlu1 %2336  ;;  %2634 = vmatpush1.msra.mxu1 %v2565_v35  ;;  %v2544_v3 = vld [vmem:[#allocation14 + $0x58] sm:$0xff]  ;;  %v2537_v14 = vld [vmem:[#allocation14 + $0x20] sm:$0xff] }
 0x5fa   : > { %v5939_v24 = vsub.f32 %v5863_v52, %v2353_v16  ;;  %v2356_v25 = vmul.f32 0.0078125, %v2337_v18  ;;  %2407 = vadd.xlane.f32.xlu0 %v2383_v43  ;;  %v2386_v46 = vmul.f32 %v5934_v12, %v5934_v12  ;;  %2635 = vmatprep.subr.mxu1 %v2562_v17  ;;  %v2538_v16 = vld [vmem:[#allocation14 + $0x28] sm:$0xff]  ;;  %v2540_v43 = vld [vmem:[#allocation14 + $0x38] sm:$0xff] }
 0x5fb   : > { %v2335_v27 = vpop.xlane.xlu0 %2334  ;;  %2636 = vmatpush1.msra.mxu1 %v2561_v44  ;;  %v2534_v18 = vld [vmem:[#allocation14 + $0x8] sm:$0xff]  ;;  %v3036_v29 = vld [vmem:[#allocation16 + $0xf8] sm:$0xff] }
 0x5fc   : > { %v5944_v30 = vsub.f32 %v5868_v55, %v2356_v25  ;;  %v2355_v9 = vmul.f32 0.0078125, %v2335_v27  ;;  %2413 = vadd.xlane.f32.xlu1 %v2386_v46  ;;  %v2385_v52 = vmul.f32 %v5939_v24, %v5939_v24  ;;  %2637 = vmatprep.subr.mxu1 %v2558_v19  ;;  %v2533_v25 = vld [vmem:[#allocation14] sm:$0xff]  ;;  %v2535_v46 = vld [vmem:[#allocation14 + $0x10] sm:$0xff]  ;;  %v5967_v27 = vld [vmem:[#allocation16 + $0x1f8] sm:$0xff] }
 0x5fd   : > { %v2341_v38 = vpop.xlane.xlu1 %2340  ;;  %2638 = vmatpush1.msra.mxu1 %v2557_v53 }
 0x5fe   : > { %v5949_v37 = vsub.f32 %v5873_v61, %v2355_v9  ;;  %v2358_v41 = vmul.f32 0.0078125, %v2341_v38  ;;  %2411 = vadd.xlane.f32.xlu0 %v2385_v52  ;;  %v2388_v55 = vmul.f32 %v5944_v30, %v5944_v30  ;;  %2639 = vmatprep.subr.mxu1 %v2554_v32 }
 0x5ff   : > { %v2339_v40 = vpop.xlane.xlu0 %2338  ;;  %2640 = vmatpush1.msra.mxu1 %v2553_v31 }
 0x600   : > { %v5954_v47 = vsub.f32 %v5878_v0, %v2358_v41  ;;  %v2357_v48 = vmul.f32 0.0078125, %v2339_v40  ;;  %2417 = vadd.xlane.f32.xlu1 %v2388_v55  ;;  %v2387_v61 = vmul.f32 %v5949_v37, %v5949_v37  ;;  %v2559_v0 = vld [vmem:[#allocation14 + $0xd0] sm:$0xff] }
 0x601   : > { %2799 = vmatpush1.msra.mxu0 %v2559_v0 }
 0x602   : > { %v5959_v54 = vsub.f32 %v5882_v5, %v2357_v48  ;;  %2415 = vadd.xlane.f32.xlu0 %v2387_v61  ;;  %v2390_v56 = vmul.f32 %v5954_v47, %v5954_v47  ;;  %v2550_v5 = vld [vmem:[#allocation14 + $0x88] sm:$0xff]  ;;  %2800 = vmatprep.subr.mxu0 %v2556_v59 }
 0x603   : > { %2801 = vmatpush1.msra.mxu0 %v2555_v63  ;;  %2641 = vmatprep.subr.mxu1 %v2550_v5 }
 0x604   : > { %2421 = vadd.xlane.f32.xlu1 %v2390_v56  ;;  %v2389_v62 = vmul.f32 %v5959_v54, %v5959_v54  ;;  %2802 = vmatprep.subr.mxu0 %v2552_v1 }
 0x605   : > { %2642 = vmatpush1.msra.mxu1 %v2549_v49  ;;  %2803 = vmatpush1.msra.mxu0 %v2551_v58  ;;  %v5975_v58 = vld [vmem:[%s6713_s17] ss:$0 sm:$0xff]  ;;  %s6732_s17 = sld [smem:[#allocation48_spill]] }
 0x606   : > { %2419 = vadd.xlane.f32.xlu0 %v2389_v62  ;;  %2643 = vmatprep.subr.mxu1 %v2546_v6 }
 0x607   : > { %2804 = vmatprep.subr.mxu0 %v2548_v8  ;;  %2644 = vmatpush1.msra.mxu1 %v2545_v36 }
 0x608   : > { %2805 = vmatpush1.msra.mxu0 %v2547_v10  ;;  %2645 = vmatprep.subr.mxu1 %v2542_v2  ;;  %v5981_v10 = vld [vmem:[%s6714_s23] ss:$0 sm:$0xff]  ;;  %s5056_s23 = scalar_lea.vmem %s6570_s7, 2048 }
 0x609   : > { %2806 = vmatprep.subr.mxu0 %v2544_v3  ;;  %2646 = vmatpush1.msra.mxu1 %v2541_v11  ;;  %p5057_p1 = scmp.ne.s32.totalorder %s6570_s7, %s5056_s23  ;;  %p5064_p11 = scmp.lt.s32.totalorder %s5062_s3, %s5056_s23 }
 0x60a   : > { %2807 = vmatpush1.msra.mxu0 %v2543_v7  ;;  %2647 = vmatprep.subr.mxu1 %v2538_v16  ;;  %v3020_v16 = vld [vmem:[#allocation16 + $0x78] sm:$0xff] }
 0x60b   : > { %2808 = vmatprep.subr.mxu0 %v2540_v43  ;;  %2648 = vmatpush1.msra.mxu1 %v2537_v14  ;;  %v5988_v43 = vld [vmem:[#allocation16 + $0x178] sm:$0xff]  ;;  %v3035_v14 = vld [vmem:[#allocation16 + $0xf0] sm:$0xff]  ;;  %s6568_s18 = scalar_lea.hbm %s6732_s17, %s3915_s29  ;;  %p5058_p6 = pnand %p5057_p1, %p6733_p3 }
 0x60c   : > { %2809 = vmatpush1.msra.mxu0 %v2539_v15  ;;  %2649 = vmatprep.subr.mxu1 %v2534_v18  ;;  %v5992_v15 = vld [vmem:[#allocation16 + $0x1f0] sm:$0xff]  ;;  %p5065_p8 = por %p5064_p11, %p5063_p5 }
 0x60d   : > { %2810 = vmatprep.subr.mxu0 %v2536_v22  ;;  %2650 = vmatpush1.msra.mxu1 %v2533_v25  ;;  %p5059_p7 = pneg %p5058_p6 }
 0x60e   : > { %2811 = vmatpush1.msra.mxu0 %v2535_v46  ;;  %4076 = vmatprep.subr.mxu1 %v3036_v29 }
 0x60f   : > { %4156 = vmatprep.subr.mxu0 %v5967_v27  ;;  %p5066_p12 = pnand %p5065_p8, %p5059_p7 }
 0x671   : > { %v2394_v33 = vpop.xlane.xlu1 %2393 }
 0x672   : > { %v2424_v9 = vmul.f32 0.0078125, %v2394_v33 }
 0x673   : > { %v2392_v52 = vpop.xlane.xlu0 %2391 }
 0x674   : > { %v2440_v35 = vadd.f32 1e-05, %v2424_v9  ;;  %v2423_v4 = vmul.f32 0.0078125, %v2392_v52  ;;  %v3019_v9 = vld [vmem:[#allocation16 + $0x70] sm:$0xff] }
 0x675   : > { %v2398_v38 = vpop.xlane.xlu1 %2397  ;;  %v6003_v52 = vld [vmem:[#allocation16 + $0x170] sm:$0xff] }
 0x676   : > { %4736 = vrsqrt.f32 %v2440_v35  ;;  %v2439_v17 = vadd.f32 1e-05, %v2423_v4  ;;  %v2426_v41 = vmul.f32 0.0078125, %v2398_v38  ;;  %v3034_v35 = vld [vmem:[#allocation16 + $0xe8] sm:$0xff] }
 0x677   : > { %v2396_v55 = vpop.xlane.xlu0 %2395  ;;  %v6007_v4 = vld [vmem:[#allocation16 + $0x1e8] sm:$0xff] }
 0x678   : > { %4738 = vrsqrt.f32 %v2439_v17  ;;  %v2425_v21 = vmul.f32 0.0078125, %v2396_v55  ;;  %v2442_v44 = vadd.f32 1e-05, %v2426_v41 }
 0x679   : > { %v2402_v20 = vpop.xlane.xlu1 %2401 }
 0x67a   : > { %v2441_v40 = vadd.f32 1e-05, %v2425_v21  ;;  %v2428_v19 = vmul.f32 0.0078125, %v2402_v20  ;;  %v6018_v20 = vld [vmem:[#allocation16 + $0x168] sm:$0xff] }
 0x67b   : > { %v2400_v48 = vpop.xlane.xlu0 %2399 }
 0x67c   : > { %4740 = vrsqrt.f32 %v2441_v40  ;;  %v2427_v61 = vmul.f32 0.0078125, %v2400_v48  ;;  %v2444_v56 = vadd.f32 1e-05, %v2428_v19  ;;  %v3018_v40 = vld [vmem:[#allocation16 + $0x68] sm:$0xff]  ;;  %v3033_v48 = vld [vmem:[#allocation16 + $0xe0] sm:$0xff] }
 0x67d   : > { %4742 = vrsqrt.f32 %v2442_v44  ;;  %v2406_v59 = vpop.xlane.xlu1 %2405 }
 0x67e   : > { %v2443_v51 = vadd.f32 1e-05, %v2427_v61  ;;  %v2430_v63 = vmul.f32 0.0078125, %v2406_v59  ;;  %v6022_v61 = vld [vmem:[#allocation16 + $0x1e0] sm:$0xff] }
 0x67f   : > { %v2404_v53 = vpop.xlane.xlu0 %2403  ;;  %v3017_v59 = vld [vmem:[#allocation16 + $0x60] sm:$0xff] }
 0x680   : > { %4744 = vrsqrt.f32 %v2443_v51  ;;  %v2429_v0 = vmul.f32 0.0078125, %v2404_v53 }
 0x681   : > { %4746 = vrsqrt.f32 %v2444_v56  ;;  %v2410_v2 = vpop.xlane.xlu1 %2409 }
 0x682   : > { %v2445_v5 = vadd.f32 1e-05, %v2429_v0  ;;  %v2432_v18 = vmul.f32 0.0078125, %v2410_v2  ;;  %v6048_v2 = vld [vmem:[#allocation16 + $0x158] sm:$0xff] }
 0x683   : > { %v4737_v32 = vpop.eup %4736  ;;  %v2408_v1 = vpop.xlane.xlu0 %2407 }
 0x684   : > { %v2472_v49 = vmul.f32 %v4737_v32, %v5886_v13  ;;  %v2431_v36 = vmul.f32 0.0078125, %v2408_v1  ;;  %4748 = vrsqrt.f32 %v2445_v5  ;;  %v2448_v38 = vadd.f32 1e-05, %v2432_v18 }
 0x685   : > { %v4739_v62 = vpop.eup %4738  ;;  %v2414_v17 = vpop.xlane.xlu1 %2413 }
 0x686   : > { %v2471_v31 = vmul.f32 %v4739_v62, %v5889_v23  ;;  %v2446_v23 = vadd.f32 1e-05, %v2430_v63  ;;  %v2495_v13 = vmul.f32 %v5975_v58, %v2472_v49  ;;  %v2447_v22 = vadd.f32 1e-05, %v2431_v36  ;;  %v6033_v62 = vld [vmem:[#allocation16 + $0x160] sm:$0xff]  ;;  %v6037_v63 = vld [vmem:[#allocation16 + $0x1d8] sm:$0xff] }
 0x687   : > { %v2412_v33 = vpop.xlane.xlu0 %2411  ;;  %v2434_v19 = vmul.f32 0.0078125, %v2414_v17 }
 0x688   : > { %v2494_v6 = vmul.f32 %v5975_v58, %v2471_v31  ;;  %4750 = vrsqrt.f32 %v2446_v23  ;;  %v5997_v25 = vadd.f32 %v5981_v10, %v2495_v13  ;;  %v2433_v41 = vmul.f32 0.0078125, %v2412_v33  ;;  %v3032_v31 = vld [vmem:[#allocation16 + $0xd8] sm:$0xff]  ;;  %v3031_v13 = vld [vmem:[#allocation16 + $0xd0] sm:$0xff]  ;;  %v3030_v33 = vld [vmem:[#allocation16 + $0xc8] sm:$0xff] }
 0x689   : > { %v4741_v8 = vpop.eup %4740  ;;  %4752 = vrsqrt.f32 %v2447_v22  ;;  %v2450_v5 = vadd.f32 1e-05, %v2434_v19  ;;  %v3016_v23 = vld [vmem:[#allocation16 + $0x58] sm:$0xff]  ;;  %v6082_v19 = vld [vmem:[#allocation16 + $0x1c0] sm:$0xff] }
 0x68a   : > { %v5984_v3 = vadd.f32 %v5981_v10, %v2494_v6  ;;  %v4743_v11 = vpop.eup %4742  ;;  %v2473_v7 = vmul.f32 %v4741_v8, %v5899_v34  ;;  %4754 = vrsqrt.f32 %v2448_v38 }
 0x68b   : > { %v2474_v46 = vmul.f32 %v4743_v11, %v5894_v28  ;;  %v2416_v51 = vpop.xlane.xlu0 %2415  ;;  %v6052_v11 = vld [vmem:[#allocation16 + $0x1d0] sm:$0xff] }
 0x68c   : > { %2684 = vmatmul.mubr.f32.vlgmr.msra.gmra.mxu1 %v5984_v3  ;;  %2845 = vmatmul.mubr.f32.vlgmr.msra.gmra.mxu0 %v5984_v3  ;;  %v2496_v34 = vmul.f32 %v5975_v58, %v2473_v7  ;;  %v2435_v1 = vmul.f32 0.0078125, %v2416_v51 }
 0x68d   : > { %2689 = vmatprep.mubr.f32.mxu1 %v5151_v26  ;;  %2850 = vmatprep.mubr.f32.mxu0 %v5151_v26  ;;  %v4745_v29 = vpop.eup %4744  ;;  %v2497_v21 = vmul.f32 %v5975_v58, %v2474_v46  ;;  %v3015_v46 = vld [vmem:[#allocation16 + $0x50] sm:$0xff] }
 0x68e   : > { %4077 = vmatpush3.msra.mxu1 %v3020_v16  ;;  %4157 = vmatpush3.msra.mxu0 %v5988_v43  ;;  %v4747_v28 = vpop.eup %4746  ;;  %v6012_v55 = vadd.f32 %v5981_v10, %v2496_v34  ;;  %v2475_v44 = vmul.f32 %v4745_v29, %v5909_v42  ;;  %v2449_v42 = vadd.f32 1e-05, %v2433_v41  ;;  %v2451_v16 = vadd.f32 1e-05, %v2435_v1  ;;  %v6063_v29 = vld [vmem:[#allocation16 + $0x150] sm:$0xff]  ;;  %v6097_v1 = vld [vmem:[#allocation16 + $0x1b8] sm:$0xff] }
 0x68f   : > { %4078 = vmatprep.subr.mxu1 %v3035_v14  ;;  %4158 = vmatprep.subr.mxu0 %v5992_v15  ;;  %v6027_v53 = vadd.f32 %v5981_v10, %v2497_v21  ;;  %v2476_v0 = vmul.f32 %v4747_v28, %v5904_v39  ;;  %v2418_v39 = vpop.xlane.xlu1 %2417  ;;  %v2420_v34 = vpop.xlane.xlu0 %2419 }
 0x690   : > { %2690 = vmatmul.mubr.f32.gmra.mxu1 %v5997_v25  ;;  %2851 = vmatmul.mubr.f32.gmra.mxu0 %v5997_v25  ;;  %v2498_v56 = vmul.f32 %v5975_v58, %v2475_v44  ;;  %4756 = vrsqrt.f32 %v2449_v42  ;;  %v2436_v7 = vmul.f32 0.0078125, %v2418_v39  ;;  %v2437_v28 = vmul.f32 0.0078125, %v2420_v34  ;;  %v3014_v44 = vld [vmem:[#allocation16 + $0x48] sm:$0xff]  ;;  %v3011_v34 = vld [vmem:[#allocation16 + $0x30] sm:$0xff] }
 0x691   : > { %2695 = vmatprep.mubr.f32.mxu1 %v5151_v26  ;;  %2856 = vmatprep.mubr.f32.mxu0 %v5151_v26  ;;  %v4749_v32 = vpop.eup %4748  ;;  %v2499_v6 = vmul.f32 %v5975_v58, %v2476_v0  ;;  %4758 = vrsqrt.f32 %v2450_v5  ;;  %v3028_v5 = vld [vmem:[#allocation16 + $0xb8] sm:$0xff] }
 0x692   : > { %4079 = vmatpush3.msra.mxu1 %v3019_v9  ;;  %4159 = vmatpush3.msra.mxu0 %v6003_v52  ;;  %v6042_v49 = vadd.f32 %v5981_v10, %v2498_v56  ;;  %v2477_v8 = vmul.f32 %v4749_v32, %v5919_v50  ;;  %v6067_v9 = vld [vmem:[#allocation16 + $0x1c8] sm:$0xff]  ;;  %4760 = vrsqrt.f32 %v2451_v16  ;;  %v6112_v16 = vld [vmem:[#allocation16 + $0x1b0] sm:$0xff] }
 0x693   : > { %4080 = vmatprep.subr.mxu1 %v3034_v35  ;;  %4160 = vmatprep.subr.mxu0 %v6007_v4  ;;  %v6057_v14 = vadd.f32 %v5981_v10, %v2499_v6  ;;  %v2452_v35 = vadd.f32 1e-05, %v2436_v7  ;;  %v2422_v38 = vpop.xlane.xlu1 %2421  ;;  %v3027_v7 = vld [vmem:[#allocation16 + $0xb0] sm:$0xff] }
 0x694   : > { %2696 = vmatmul.mubr.f32.gmra.mxu1 %v6012_v55  ;;  %2857 = vmatmul.mubr.f32.gmra.mxu0 %v6012_v55  ;;  %v2500_v18 = vmul.f32 %v5975_v58, %v2477_v8  ;;  %v2438_v42 = vmul.f32 0.0078125, %v2422_v38 }
 0x695   : > { %2701 = vmatprep.mubr.f32.mxu1 %v5151_v26  ;;  %2862 = vmatprep.mubr.f32.mxu0 %v5151_v26  ;;  %v4751_v36 = vpop.eup %4750  ;;  %4762 = vrsqrt.f32 %v2452_v35  ;;  %v6127_v35 = vld [vmem:[#allocation16 + $0x1a8] sm:$0xff] }
 0x696   : > { %4081 = vmatpush3.msra.mxu1 %v3018_v40  ;;  %4161 = vmatpush3.msra.mxu0 %v6018_v20  ;;  %v4753_v50 = vpop.eup %4752  ;;  %v2478_v22 = vmul.f32 %v4751_v36, %v5914_v45  ;;  %v6072_v17 = vadd.f32 %v5981_v10, %v2500_v18  ;;  %v6078_v40 = vld [vmem:[#allocation16 + $0x148] sm:$0xff]  ;;  %v2454_v39 = vadd.f32 1e-05, %v2438_v42 }
 0x697   : > { %4082 = vmatprep.subr.mxu1 %v3033_v48  ;;  %4162 = vmatprep.subr.mxu0 %v6022_v61  ;;  %v4755_v45 = vpop.eup %4754  ;;  %v2479_v21 = vmul.f32 %v4753_v50, %v5929_v57  ;;  %v3029_v48 = vld [vmem:[#allocation16 + $0xc0] sm:$0xff]  ;;  %v2453_v57 = vadd.f32 1e-05, %v2437_v28 }
 0x698   : > { %2702 = vmatmul.mubr.f32.gmra.mxu1 %v6027_v53  ;;  %2863 = vmatmul.mubr.f32.gmra.mxu0 %v6027_v53  ;;  %v2501_v41 = vmul.f32 %v5975_v58, %v2478_v22  ;;  %v2480_v0 = vmul.f32 %v4755_v45, %v5924_v60 }
 0x699   : > { %2707 = vmatprep.mubr.f32.mxu1 %v5151_v26  ;;  %2868 = vmatprep.mubr.f32.mxu0 %v5151_v26  ;;  %v2502_v56 = vmul.f32 %v5975_v58, %v2479_v21  ;;  %4764 = vrsqrt.f32 %v2453_v57  ;;  %v6138_v21 = vld [vmem:[#allocation16 + $0x128] sm:$0xff] }
 0x69a   : > { %4083 = vmatpush3.msra.mxu1 %v3017_v59  ;;  %4163 = vmatpush3.msra.mxu0 %v6033_v62  ;;  %v6087_v51 = vadd.f32 %v5981_v10, %v2501_v41  ;;  %v3013_v59 = vld [vmem:[#allocation16 + $0x40] sm:$0xff]  ;;  %v2503_v6 = vmul.f32 %v5975_v58, %v2480_v0  ;;  %4766 = vrsqrt.f32 %v2454_v39  ;;  %v3010_v41 = vld [vmem:[#allocation16 + $0x28] sm:$0xff] }
 0x69b   : > { %4084 = vmatprep.subr.mxu1 %v3032_v31  ;;  %4164 = vmatprep.subr.mxu0 %v6037_v63  ;;  %v6093_v31 = vld [vmem:[#allocation16 + $0x140] sm:$0xff]  ;;  %v6102_v60 = vadd.f32 %v5981_v10, %v2502_v56 }
 0x69c   : > { %2708 = vmatmul.mubr.f32.gmra.mxu1 %v6042_v49  ;;  %2869 = vmatmul.mubr.f32.gmra.mxu0 %v6042_v49  ;;  %v6117_v50 = vadd.f32 %v5981_v10, %v2503_v6  ;;  %v3009_v0 = vld [vmem:[#allocation16 + $0x20] sm:$0xff] }
 0x69d   : > { %2713 = vmatprep.mubr.f32.mxu1 %v5151_v26  ;;  %2874 = vmatprep.mubr.f32.mxu0 %v5151_v26  ;;  %v4757_v32 = vpop.eup %4756 }
 0x69e   : > { %4085 = vmatpush3.msra.mxu1 %v3016_v23  ;;  %4165 = vmatpush3.msra.mxu0 %v6048_v2  ;;  %v2481_v8 = vmul.f32 %v4757_v32, %v5939_v24  ;;  %v4759_v36 = vpop.eup %4758  ;;  %v3012_v23 = vld [vmem:[#allocation16 + $0x38] sm:$0xff]  ;;  %v6153_v32 = vld [vmem:[#allocation16 + $0x120] sm:$0xff] }
 0x69f   : > { %4086 = vmatprep.subr.mxu1 %v3031_v13  ;;  %4166 = vmatprep.subr.mxu0 %v6052_v11  ;;  %v6108_v13 = vld [vmem:[#allocation16 + $0x138] sm:$0xff]  ;;  %v4761_v24 = vpop.eup %4760  ;;  %v2482_v22 = vmul.f32 %v4759_v36, %v5934_v12 }
 0x6a0   : > { %2714 = vmatmul.mubr.f32.gmra.mxu1 %v6057_v14  ;;  %2875 = vmatmul.mubr.f32.gmra.mxu0 %v6057_v14  ;;  %v2504_v18 = vmul.f32 %v5975_v58, %v2481_v8  ;;  %v2483_v28 = vmul.f32 %v4761_v24, %v5949_v37  ;;  %v6191_v24 = vld [vmem:[#allocation16 + $0x198] sm:$0xff] }
 0x6a1   : > { %2719 = vmatprep.mubr.f32.mxu1 %v5151_v26  ;;  %2880 = vmatprep.mubr.f32.mxu0 %v5151_v26  ;;  %v2505_v38 = vmul.f32 %v5975_v58, %v2482_v22  ;;  %v6197_v22 = vld [vmem:[#allocation16 + $0x190] sm:$0xff] }
 0x6a2   : > { %4087 = vmatpush3.msra.mxu1 %v3015_v46  ;;  %4167 = vmatpush3.msra.mxu0 %v6063_v29  ;;  %v6123_v46 = vld [vmem:[#allocation16 + $0x130] sm:$0xff]  ;;  %v4763_v12 = vpop.eup %4762  ;;  %v6132_v45 = vadd.f32 %v5981_v10, %v2504_v18  ;;  %v2506_v42 = vmul.f32 %v5975_v58, %v2483_v28  ;;  %v6194_v18 = vld [vmem:[#allocation16 + $0x118] sm:$0xff]  ;;  %v6206_v28 = vld [vmem:[#allocation16 + $0x108] sm:$0xff] }
 0x6a3   : > { %4088 = vmatprep.subr.mxu1 %v3030_v33  ;;  %4168 = vmatprep.subr.mxu0 %v6067_v9  ;;  %v3026_v33 = vld [vmem:[#allocation16 + $0xa8] sm:$0xff]  ;;  %v6147_v37 = vadd.f32 %v5981_v10, %v2505_v38  ;;  %v2484_v57 = vmul.f32 %v4763_v12, %v5944_v30 }
 0x6a4   : > { %2720 = vmatmul.mubr.f32.gmra.mxu1 %v6072_v17  ;;  %2881 = vmatmul.mubr.f32.gmra.mxu0 %v6072_v17  ;;  %6715 = vst [vmem:[#allocation30_spill] sm:$0xff] %v6132_v45  ;;  %v6160_v30 = vadd.f32 %v5981_v10, %v2506_v42  ;;  %v6203_v12 = vld [vmem:[#allocation16 + $0x188] sm:$0xff]  ;;  %v3005_v42 = vld [vmem:[#allocation16] sm:$0xff] }
 0x6a5   : > { %2725 = vmatprep.mubr.f32.mxu1 %v5151_v26  ;;  %2886 = vmatprep.mubr.f32.mxu0 %v5151_v26  ;;  %6716 = vst [vmem:[#allocation31_spill] sm:$0xff] %v6147_v37  ;;  %v3006_v38 = vld [vmem:[#allocation16 + $0x8] sm:$0xff] }
 0x6a6   : > { %4089 = vmatpush3.msra.mxu1 %v3014_v44  ;;  %4169 = vmatpush3.msra.mxu0 %v6078_v40  ;;  %v3025_v44 = vld [vmem:[#allocation16 + $0xa0] sm:$0xff]  ;;  %v4765_v56 = vpop.eup %4764  ;;  %6717 = vst [vmem:[#allocation32_spill] sm:$0xff] %v6160_v30 }
 0x6a7   : > { %4090 = vmatprep.subr.mxu1 %v3029_v48  ;;  %4170 = vmatprep.subr.mxu0 %v6082_v19  ;;  %v6142_v48 = vld [vmem:[#allocation16 + $0x1a0] sm:$0xff]  ;;  %v4767_v39 = vpop.eup %4766 }
 0x6a8   : > { %2726 = vmatmul.mubr.f32.gmra.mxu1 %v6087_v51  ;;  %2887 = vmatmul.mubr.f32.gmra.mxu0 %v6087_v51  ;;  %v2486_v36 = vmul.f32 %v4767_v39, %v5954_v47  ;;  %v2597_v39 = vld [vmem:[%s6721_s24] sm:$0xf] }
 0x6a9   : > { %2731 = vmatprep.mubr.f32.mxu1 %v5151_v26  ;;  %2892 = vmatprep.mubr.f32.mxu0 %v5151_v26 }
 0x6aa   : > { %4091 = vmatpush3.msra.mxu1 %v3013_v59  ;;  %4171 = vmatpush3.msra.mxu0 %v6093_v31  ;;  %v2507_v59 = vmul.f32 %v5975_v58, %v2484_v57  ;;  %v6212_v57 = vld [vmem:[#allocation16 + $0x100] sm:$0xff] }
 0x6ab   : > { %4092 = vmatprep.subr.mxu1 %v3028_v5  ;;  %4172 = vmatprep.subr.mxu0 %v6097_v1  ;;  %v2485_v5 = vmul.f32 %v4765_v56, %v5959_v54  ;;  %v2599_v56 = vlaneseq }
 0x6ac   : > { %2732 = vmatmul.mubr.f32.gmra.mxu1 %v6102_v60  ;;  %2893 = vmatmul.mubr.f32.gmra.mxu0 %v6102_v60  ;;  %v6170_v6 = vadd.f32 %v5981_v10, %v2507_v59 }
 0x6ad   : > { %2737 = vmatprep.mubr.f32.mxu1 %v5151_v26  ;;  %2898 = vmatprep.mubr.f32.mxu0 %v5151_v26  ;;  %v2508_v8 = vmul.f32 %v5975_v58, %v2485_v5 }
 0x6ae   : > { %4093 = vmatpush3.msra.mxu1 %v3012_v23  ;;  %4173 = vmatpush3.msra.mxu0 %v6108_v13  ;;  %6718 = vst [vmem:[#allocation33_spill] sm:$0xff] %v6170_v6  ;;  %v2509_v23 = vmul.f32 %v5975_v58, %v2486_v36  ;;  %v3008_v58 = vld [vmem:[#allocation16 + $0x18] sm:$0xff] }
 0x6af   : > { %4094 = vmatprep.subr.mxu1 %v3027_v7  ;;  %4174 = vmatprep.subr.mxu0 %v6112_v16  ;;  %v6179_v54 = vadd.f32 %v5981_v10, %v2508_v8  ;;  %v3024_v7 = vld [vmem:[#allocation16 + $0x98] sm:$0xff] }
 0x6b0   : > { %2738 = vmatmul.mubr.f32.gmra.mxu1 %v6117_v50  ;;  %2899 = vmatmul.mubr.f32.gmra.mxu0 %v6117_v50  ;;  %v6187_v47 = vadd.f32 %v5981_v10, %v2509_v23  ;;  %v3007_v10 = vld [vmem:[#allocation16 + $0x10] sm:$0xff] }
 0x6b1   : > { %2743 = vmatprep.mubr.f32.mxu1 %v5151_v26  ;;  %2904 = vmatprep.mubr.f32.mxu0 %v5151_v26  ;;  %6719 = vst [vmem:[#allocation34_spill] sm:$0xff] %v6179_v54 }
 0x6b2   : > { %4095 = vmatpush3.msra.mxu1 %v3011_v34  ;;  %4175 = vmatpush3.msra.mxu0 %v6123_v46  ;;  %6720 = vst [vmem:[#allocation35_spill] sm:$0xff] %v6187_v47  ;;  %v6200_v34 = vld [vmem:[#allocation16 + $0x110] sm:$0xff] }
 0x6b3   : > { %4096 = vmatprep.subr.mxu1 %v3026_v33  ;;  %4176 = vmatprep.subr.mxu0 %v6127_v35  ;;  %v3022_v33 = vld [vmem:[#allocation16 + $0x88] sm:$0xff] }
 0x6b4   : > { %2744 = vmatmul.mubr.f32.gmra.mxu1 %v6132_v45  ;;  %2905 = vmatmul.mubr.f32.gmra.mxu0 %v6132_v45 }
 0x6b5   : > { %2749 = vmatprep.mubr.f32.mxu1 %v5151_v26  ;;  %2910 = vmatprep.mubr.f32.mxu0 %v5151_v26 }
 0x6b6   : > { %4097 = vmatpush3.msra.mxu1 %v3010_v41  ;;  %4177 = vmatpush3.msra.mxu0 %v6138_v21  ;;  %v3021_v41 = vld [vmem:[#allocation16 + $0x80] sm:$0xff] }
 0x6b7   : > { %4098 = vmatprep.subr.mxu1 %v3025_v44  ;;  %4178 = vmatprep.subr.mxu0 %v6142_v48  ;;  %v6209_v44 = vld [vmem:[#allocation16 + $0x180] sm:$0xff] }
 0x6b8   : > { %2750 = vmatmul.mubr.f32.gmra.mxu1 %v6147_v37  ;;  %2911 = vmatmul.mubr.f32.gmra.mxu0 %v6147_v37 }
 0x6b9   : > { %2755 = vmatprep.mubr.f32.mxu1 %v5151_v26  ;;  %2916 = vmatprep.mubr.f32.mxu0 %v5151_v26 }
 0x6ba   : > { %4099 = vmatpush3.msra.mxu1 %v3009_v0  ;;  %4179 = vmatpush3.msra.mxu0 %v6153_v32  ;;  %v2600_v0 = vshrl.u32 %v2599_v56, 7 }
 0x6bb   : > { %4100 = vmatprep.subr.mxu1 %v3024_v7  ;;  %4180 = vmatprep.subr.mxu0 %v6191_v24 }
 0x6bc   : > { %2756 = vmatmul.mubr.f32.gmra.mxu1 %v6160_v30  ;;  %2917 = vmatmul.mubr.f32.gmra.mxu0 %v6160_v30  ;;  %v2601_v59 = vsub.s32 0, %v2600_v0  ;;  %v2609_v5 = vsub.s32 2, %v2600_v0  ;;  %v2605_v8 = vsub.s32 1, %v2600_v0  ;;  %v2613_v36 = vsub.s32 3, %v2600_v0 }
 0x6bd   : > { %2761 = vmatprep.mubr.f32.mxu1 %v5151_v26  ;;  %2922 = vmatprep.mubr.f32.mxu0 %v5151_v26 }
 0x6be   : > { %4101 = vmatpush3.msra.mxu1 %v3008_v58  ;;  %4181 = vmatpush3.msra.mxu0 %v6194_v18  ;;  %v6219_v23 = vrot.slane %v2597_v39, %v2601_v59  ;;  %v6221_v7 = vrot.slane %v2597_v39, %v2609_v5  ;;  %v6223_v58 = vrot.slane %v2597_v39, %v2605_v8 }
 0x6bf   : > { %4182 = vmatprep.subr.mxu0 %v6197_v22 }
 0x6c0   : > { %2762 = vmatmul.mubr.f32.gmra.mxu1 %v6170_v6  ;;  %2923 = vmatmul.mubr.f32.gmra.mxu0 %v6170_v6 }
 0x6c1   : > { %2767 = vmatprep.mubr.f32.mxu1 %v5151_v26  ;;  %2928 = vmatprep.mubr.f32.mxu0 %v5151_v26 }
 0x6c2   : > { %4183 = vmatpush3.msra.mxu0 %v6200_v34 }
 0x6c3   : > { %4184 = vmatprep.subr.mxu0 %v6203_v12 }
 0x6c4   : > { %2768 = vmatmul.mubr.f32.gmra.mxu1 %v6179_v54  ;;  %2929 = vmatmul.mubr.f32.gmra.mxu0 %v6179_v54 }
 0x6c5   : > { %2773 = vmatprep.mubr.f32.mxu1 %v5151_v26  ;;  %2934 = vmatprep.mubr.f32.mxu0 %v5151_v26  ;;  %v3023_v26 = vld [vmem:[#allocation16 + $0x90] sm:$0xff] }
 0x6c6   : > { %4102 = vmatprep.subr.mxu1 %v3023_v26  ;;  %4185 = vmatpush3.msra.mxu0 %v6206_v28  ;;  %v6225_v26 = vrot.slane %v2597_v39, %v2613_v36 }
 0x6c7   : > { %4103 = vmatpush3.msra.mxu1 %v3007_v10  ;;  %4186 = vmatprep.subr.mxu0 %v6209_v44 }
 0x6c8   : > { %2774 = vmatmul.mubr.f32.gmra.mxu1 %v6187_v47  ;;  %2935 = vmatmul.mubr.f32.gmra.mxu0 %v6187_v47 }
 0x6c9   : > { %4104 = vmatprep.subr.mxu1 %v3022_v33  ;;  %4187 = vmatpush3.msra.mxu0 %v6212_v57 }
 0x6ca   : > { %4105 = vmatpush3.msra.mxu1 %v3006_v38 }
 0x6cb   : > { %4106 = vmatprep.subr.mxu1 %v3021_v41 }
 0x6cc   : > { %4107 = vmatpush3.msra.mxu1 %v3005_v42 }
 0x6cd   : > { %4516 = vmatprep.subr.mxu1 %v5967_v27 }
 0x74c   : > { %v2685_v10 = vpop.f32.mrf.mxu1  ;;  %v2846_v27 = vpop.f32.mrf.mxu0 }
 0x74d   : > { %v2686_v33 = vadd.f32 %v2685_v10, %v6219_v23  ;;  %v2847_v38 = vadd.f32 %v2846_v27, %v6221_v7 }
 0x74e   : > { %v2687_v41 = vpop.f32.mrf.mxu1  ;;  %v2848_v42 = vpop.f32.mrf.mxu0 }
 0x74f   : > { %v2688_v56 = vadd.f32 %v2687_v41, %v6223_v58  ;;  %v2849_v0 = vadd.f32 %v2848_v42, %v6225_v26  ;;  %v2941_v8 = vmax.f32 %v2686_v33, 0.0  ;;  %v2943_v6 = vmax.f32 %v2847_v38, 0.0 }
 0x750   : > { %v2691_v59 = vpop.f32.mrf.mxu1  ;;  %v2852_v47 = vpop.f32.mrf.mxu0 }
 0x751   : > { %v2942_v5 = vmax.f32 %v2688_v56, 0.0  ;;  %v2944_v54 = vmax.f32 %v2849_v0, 0.0  ;;  %v2692_v39 = vadd.f32 %v2691_v59, %v6219_v23  ;;  %v2853_v36 = vadd.f32 %v2852_v47, %v6221_v7 }
 0x752   : > { %v2693_v30 = vpop.f32.mrf.mxu1  ;;  %v2854_v10 = vpop.f32.mrf.mxu0 }
 0x753   : > { %v2694_v27 = vadd.f32 %v2693_v30, %v6223_v58  ;;  %v2855_v37 = vadd.f32 %v2854_v10, %v6225_v26  ;;  %3140 = vmatprep.mubr.f32.mxu1 %v2942_v5  ;;  %3285 = vmatprep.mubr.f32.mxu0 %v2944_v54  ;;  %v2945_v33 = vmax.f32 %v2692_v39, 0.0  ;;  %v2947_v38 = vmax.f32 %v2853_v36, 0.0 }
 0x754   : > { %v2697_v41 = vpop.f32.mrf.mxu1  ;;  %v2858_v42 = vpop.f32.mrf.mxu0  ;;  %3141 = vmatmul.mubr.f32.vlgmr.msra.gmra.mxu1 %v2941_v8  ;;  %3286 = vmatmul.mubr.f32.vlgmr.msra.gmra.mxu0 %v2943_v6 }
 0x755   : > { %v2946_v56 = vmax.f32 %v2694_v27, 0.0  ;;  %v2948_v0 = vmax.f32 %v2855_v37, 0.0  ;;  %4532 = vmatpush3.msra.mxu1 %v5988_v43  ;;  %v2698_v47 = vadd.f32 %v2697_v41, %v6219_v23  ;;  %v2859_v59 = vadd.f32 %v2858_v42, %v6221_v7 }
 0x756   : > { %v2699_v45 = vpop.f32.mrf.mxu1  ;;  %v2860_v30 = vpop.f32.mrf.mxu0  ;;  %4517 = vmatprep.subr.mxu1 %v5992_v15 }
 0x757   : > { %v2700_v54 = vadd.f32 %v2699_v45, %v6223_v58  ;;  %v2861_v5 = vadd.f32 %v2860_v30, %v6225_v26  ;;  %3145 = vmatprep.mubr.f32.mxu1 %v2946_v56  ;;  %3290 = vmatprep.mubr.f32.mxu0 %v2948_v0  ;;  %v2949_v39 = vmax.f32 %v2698_v47, 0.0  ;;  %v2951_v36 = vmax.f32 %v2859_v59, 0.0 }
 0x758   : > { %v2703_v6 = vpop.f32.mrf.mxu1  ;;  %v2864_v37 = vpop.f32.mrf.mxu0  ;;  %3146 = vmatmul.mubr.f32.gmra.mxu1 %v2945_v33  ;;  %3291 = vmatmul.mubr.f32.gmra.mxu0 %v2947_v38 }
 0x759   : > { %v2950_v43 = vmax.f32 %v2700_v54, 0.0  ;;  %v2952_v8 = vmax.f32 %v2861_v5, 0.0  ;;  %4533 = vmatpush3.msra.mxu1 %v6003_v52  ;;  %v2704_v10 = vadd.f32 %v2703_v6, %v6219_v23  ;;  %v2865_v15 = vadd.f32 %v2864_v37, %v6221_v7 }
 0x75a   : > { %v2705_v27 = vpop.f32.mrf.mxu1  ;;  %v2866_v45 = vpop.f32.mrf.mxu0  ;;  %4518 = vmatprep.subr.mxu1 %v6007_v4 }
 0x75b   : > { %v2706_v41 = vadd.f32 %v2705_v27, %v6223_v58  ;;  %v2867_v42 = vadd.f32 %v2866_v45, %v6225_v26  ;;  %3150 = vmatprep.mubr.f32.mxu1 %v2950_v43  ;;  %3295 = vmatprep.mubr.f32.mxu0 %v2952_v8  ;;  %v2953_v38 = vmax.f32 %v2704_v10, 0.0  ;;  %v2955_v47 = vmax.f32 %v2865_v15, 0.0 }
 0x75c   : > { %v2709_v56 = vpop.f32.mrf.mxu1  ;;  %v2870_v0 = vpop.f32.mrf.mxu0  ;;  %3151 = vmatmul.mubr.f32.gmra.mxu1 %v2949_v39  ;;  %3296 = vmatmul.mubr.f32.gmra.mxu0 %v2951_v36 }
 0x75d   : > { %v2954_v52 = vmax.f32 %v2706_v41, 0.0  ;;  %v2956_v33 = vmax.f32 %v2867_v42, 0.0  ;;  %4534 = vmatpush3.msra.mxu1 %v6018_v20  ;;  %v2710_v59 = vadd.f32 %v2709_v56, %v6219_v23  ;;  %v2871_v4 = vadd.f32 %v2870_v0, %v6221_v7 }
 0x75e   : > { %v2711_v30 = vpop.f32.mrf.mxu1  ;;  %v2872_v54 = vpop.f32.mrf.mxu0  ;;  %4519 = vmatprep.subr.mxu1 %v6022_v61 }
 0x75f   : > { %v2712_v5 = vadd.f32 %v2711_v30, %v6223_v58  ;;  %v2873_v6 = vadd.f32 %v2872_v54, %v6225_v26  ;;  %3155 = vmatprep.mubr.f32.mxu1 %v2954_v52  ;;  %3300 = vmatprep.mubr.f32.mxu0 %v2956_v33  ;;  %v2957_v39 = vmax.f32 %v2710_v59, 0.0  ;;  %v2959_v36 = vmax.f32 %v2871_v4, 0.0 }
 0x760   : > { %v2715_v37 = vpop.f32.mrf.mxu1  ;;  %v2876_v43 = vpop.f32.mrf.mxu0  ;;  %3156 = vmatmul.mubr.f32.gmra.mxu1 %v2953_v38  ;;  %3301 = vmatmul.mubr.f32.gmra.mxu0 %v2955_v47 }
 0x761   : > { %v2958_v20 = vmax.f32 %v2712_v5, 0.0  ;;  %v2960_v8 = vmax.f32 %v2873_v6, 0.0  ;;  %4535 = vmatpush3.msra.mxu1 %v6033_v62  ;;  %v2716_v10 = vadd.f32 %v2715_v37, %v6219_v23  ;;  %v2877_v61 = vadd.f32 %v2876_v43, %v6221_v7 }
 0x762   : > { %v2717_v15 = vpop.f32.mrf.mxu1  ;;  %v2878_v27 = vpop.f32.mrf.mxu0  ;;  %4520 = vmatprep.subr.mxu1 %v6037_v63 }
 0x763   : > { %v2718_v45 = vadd.f32 %v2717_v15, %v6223_v58  ;;  %v2879_v41 = vadd.f32 %v2878_v27, %v6225_v26  ;;  %3160 = vmatprep.mubr.f32.mxu1 %v2958_v20  ;;  %3305 = vmatprep.mubr.f32.mxu0 %v2960_v8  ;;  %v2961_v52 = vmax.f32 %v2716_v10, 0.0  ;;  %v2963_v33 = vmax.f32 %v2877_v61, 0.0 }
 0x764   : > { %v2721_v42 = vpop.f32.mrf.mxu1  ;;  %v2882_v56 = vpop.f32.mrf.mxu0  ;;  %3161 = vmatmul.mubr.f32.gmra.mxu1 %v2957_v39  ;;  %3306 = vmatmul.mubr.f32.gmra.mxu0 %v2959_v36 }
 0x765   : > { %v2962_v62 = vmax.f32 %v2718_v45, 0.0  ;;  %v2964_v0 = vmax.f32 %v2879_v41, 0.0  ;;  %4536 = vmatpush3.msra.mxu1 %v6048_v2  ;;  %v2722_v38 = vadd.f32 %v2721_v42, %v6219_v23  ;;  %v2883_v63 = vadd.f32 %v2882_v56, %v6221_v7 }
 0x766   : > { %v2723_v47 = vpop.f32.mrf.mxu1  ;;  %v2884_v59 = vpop.f32.mrf.mxu0  ;;  %4521 = vmatprep.subr.mxu1 %v6052_v11 }
 0x767   : > { %v2724_v4 = vadd.f32 %v2723_v47, %v6223_v58  ;;  %v2885_v30 = vadd.f32 %v2884_v59, %v6225_v26  ;;  %3165 = vmatprep.mubr.f32.mxu1 %v2962_v62  ;;  %3310 = vmatprep.mubr.f32.mxu0 %v2964_v0  ;;  %v2965_v37 = vmax.f32 %v2722_v38, 0.0  ;;  %v2967_v43 = vmax.f32 %v2883_v63, 0.0 }
 0x768   : > { %v2727_v54 = vpop.f32.mrf.mxu1  ;;  %v2888_v5 = vpop.f32.mrf.mxu0  ;;  %3166 = vmatmul.mubr.f32.gmra.mxu1 %v2961_v52  ;;  %3311 = vmatmul.mubr.f32.gmra.mxu0 %v2963_v33 }
 0x769   : > { %v2966_v2 = vmax.f32 %v2724_v4, 0.0  ;;  %v2968_v6 = vmax.f32 %v2885_v30, 0.0  ;;  %4537 = vmatpush3.msra.mxu1 %v6063_v29  ;;  %v2728_v20 = vadd.f32 %v2727_v54, %v6219_v23  ;;  %v2889_v11 = vadd.f32 %v2888_v5, %v6221_v7 }
 0x76a   : > { %v2729_v8 = vpop.f32.mrf.mxu1  ;;  %v2890_v39 = vpop.f32.mrf.mxu0  ;;  %4522 = vmatprep.subr.mxu1 %v6067_v9 }
 0x76b   : > { %v2730_v36 = vadd.f32 %v2729_v8, %v6223_v58  ;;  %v2891_v10 = vadd.f32 %v2890_v39, %v6225_v26  ;;  %3170 = vmatprep.mubr.f32.mxu1 %v2966_v2  ;;  %3315 = vmatprep.mubr.f32.mxu0 %v2968_v6  ;;  %v2969_v45 = vmax.f32 %v2728_v20, 0.0  ;;  %v2971_v41 = vmax.f32 %v2889_v11, 0.0 }
 0x76c   : > { %v2733_v61 = vpop.f32.mrf.mxu1  ;;  %v2894_v15 = vpop.f32.mrf.mxu0  ;;  %3171 = vmatmul.mubr.f32.gmra.mxu1 %v2965_v37  ;;  %3316 = vmatmul.mubr.f32.gmra.mxu0 %v2967_v43 }
 0x76d   : > { %v2970_v29 = vmax.f32 %v2730_v36, 0.0  ;;  %v2972_v27 = vmax.f32 %v2891_v10, 0.0  ;;  %4538 = vmatpush3.msra.mxu1 %v6078_v40  ;;  %v2734_v42 = vadd.f32 %v2733_v61, %v6219_v23  ;;  %v2895_v9 = vadd.f32 %v2894_v15, %v6221_v7 }
 0x76e   : > { %v2735_v56 = vpop.f32.mrf.mxu1  ;;  %v2896_v62 = vpop.f32.mrf.mxu0  ;;  %4523 = vmatprep.subr.mxu1 %v6082_v19 }
 0x76f   : > { %v2736_v0 = vadd.f32 %v2735_v56, %v6223_v58  ;;  %v2897_v52 = vadd.f32 %v2896_v62, %v6225_v26  ;;  %3175 = vmatprep.mubr.f32.mxu1 %v2970_v29  ;;  %3320 = vmatprep.mubr.f32.mxu0 %v2972_v27  ;;  %v2973_v47 = vmax.f32 %v2734_v42, 0.0  ;;  %v2975_v59 = vmax.f32 %v2895_v9, 0.0 }
 0x770   : > { %v2739_v33 = vpop.f32.mrf.mxu1  ;;  %v2900_v38 = vpop.f32.mrf.mxu0  ;;  %3176 = vmatmul.mubr.f32.gmra.mxu1 %v2969_v45  ;;  %3321 = vmatmul.mubr.f32.gmra.mxu0 %v2971_v41 }
 0x771   : > { %v2974_v40 = vmax.f32 %v2736_v0, 0.0  ;;  %v2976_v63 = vmax.f32 %v2897_v52, 0.0  ;;  %4539 = vmatpush3.msra.mxu1 %v6093_v31  ;;  %v2740_v4 = vadd.f32 %v2739_v33, %v6219_v23  ;;  %v2901_v19 = vadd.f32 %v2900_v38, %v6221_v7 }
 0x772   : > { %v2741_v30 = vpop.f32.mrf.mxu1  ;;  %v2902_v54 = vpop.f32.mrf.mxu0  ;;  %4524 = vmatprep.subr.mxu1 %v6097_v1 }
 0x773   : > { %v2742_v5 = vadd.f32 %v2741_v30, %v6223_v58  ;;  %v2903_v2 = vadd.f32 %v2902_v54, %v6225_v26  ;;  %3180 = vmatprep.mubr.f32.mxu1 %v2974_v40  ;;  %3325 = vmatprep.mubr.f32.mxu0 %v2976_v63  ;;  %v2977_v20 = vmax.f32 %v2740_v4, 0.0  ;;  %v2979_v11 = vmax.f32 %v2901_v19, 0.0 }
 0x774   : > { %v2745_v6 = vpop.f32.mrf.mxu1  ;;  %v2906_v37 = vpop.f32.mrf.mxu0  ;;  %3181 = vmatmul.mubr.f32.gmra.mxu1 %v2973_v47  ;;  %3326 = vmatmul.mubr.f32.gmra.mxu0 %v2975_v59 }
 0x775   : > { %v2978_v31 = vmax.f32 %v2742_v5, 0.0  ;;  %v2980_v43 = vmax.f32 %v2903_v2, 0.0  ;;  %4540 = vmatpush3.msra.mxu1 %v6108_v13  ;;  %v2746_v8 = vadd.f32 %v2745_v6, %v6219_v23  ;;  %v2907_v1 = vadd.f32 %v2906_v37, %v6221_v7 }
 0x776   : > { %v2747_v39 = vpop.f32.mrf.mxu1  ;;  %v2908_v36 = vpop.f32.mrf.mxu0  ;;  %4525 = vmatprep.subr.mxu1 %v6112_v16 }
 0x777   : > { %v2748_v10 = vadd.f32 %v2747_v39, %v6223_v58  ;;  %v2909_v61 = vadd.f32 %v2908_v36, %v6225_v26  ;;  %3185 = vmatprep.mubr.f32.mxu1 %v2978_v31  ;;  %3330 = vmatprep.mubr.f32.mxu0 %v2980_v43  ;;  %v2981_v45 = vmax.f32 %v2746_v8, 0.0  ;;  %v2983_v41 = vmax.f32 %v2907_v1, 0.0 }
 0x778   : > { %v2751_v15 = vpop.f32.mrf.mxu1  ;;  %v2912_v29 = vpop.f32.mrf.mxu0  ;;  %3186 = vmatmul.mubr.f32.gmra.mxu1 %v2977_v20  ;;  %3331 = vmatmul.mubr.f32.gmra.mxu0 %v2979_v11 }
 0x779   : > { %v2982_v13 = vmax.f32 %v2748_v10, 0.0  ;;  %v2984_v27 = vmax.f32 %v2909_v61, 0.0  ;;  %4541 = vmatpush3.msra.mxu1 %v6123_v46  ;;  %v2752_v42 = vadd.f32 %v2751_v15, %v6219_v23  ;;  %v2913_v16 = vadd.f32 %v2912_v29, %v6221_v7 }
 0x77a   : > { %v2753_v9 = vpop.f32.mrf.mxu1  ;;  %v2914_v56 = vpop.f32.mrf.mxu0  ;;  %4526 = vmatprep.subr.mxu1 %v6127_v35 }
 0x77b   : > { %v2754_v62 = vadd.f32 %v2753_v9, %v6223_v58  ;;  %v2915_v0 = vadd.f32 %v2914_v56, %v6225_v26  ;;  %3190 = vmatprep.mubr.f32.mxu1 %v2982_v13  ;;  %3335 = vmatprep.mubr.f32.mxu0 %v2984_v27  ;;  %v2985_v40 = vmax.f32 %v2752_v42, 0.0  ;;  %v2987_v63 = vmax.f32 %v2913_v16, 0.0 }
 0x77c   : > { %v2757_v52 = vpop.f32.mrf.mxu1  ;;  %v2918_v33 = vpop.f32.mrf.mxu0  ;;  %3191 = vmatmul.mubr.f32.gmra.mxu1 %v2981_v45  ;;  %3336 = vmatmul.mubr.f32.gmra.mxu0 %v2983_v41 }
 0x77d   : > { %v2986_v46 = vmax.f32 %v2754_v62, 0.0  ;;  %v2988_v38 = vmax.f32 %v2915_v0, 0.0  ;;  %4542 = vmatpush3.msra.mxu1 %v6138_v21  ;;  %v2758_v47 = vadd.f32 %v2757_v52, %v6219_v23  ;;  %v2919_v10 = vadd.f32 %v2918_v33, %v6221_v7 }
 0x77e   : > { %v2759_v59 = vpop.f32.mrf.mxu1  ;;  %v2920_v35 = vpop.f32.mrf.mxu0  ;;  %4527 = vmatprep.subr.mxu1 %v6142_v48 }
 0x77f   : > { %v2760_v4 = vadd.f32 %v2759_v59, %v6223_v58  ;;  %3195 = vmatprep.mubr.f32.mxu1 %v2986_v46  ;;  %3340 = vmatprep.mubr.f32.mxu0 %v2988_v38  ;;  %v2989_v21 = vmax.f32 %v2758_v47, 0.0  ;;  %v2921_v39 = vadd.f32 %v2920_v35, %v6225_v26  ;;  %v6325_v46 = vld [vmem:[%s6722_s15] ss:$0 sm:$0xff] }
 0x780   : > { %v2763_v19 = vpop.f32.mrf.mxu1  ;;  %v2924_v30 = vpop.f32.mrf.mxu0  ;;  %3196 = vmatmul.mubr.f32.gmra.mxu1 %v2985_v40  ;;  %3341 = vmatmul.mubr.f32.gmra.mxu0 %v2987_v63 }
 0x781   : > { %v2990_v54 = vmax.f32 %v2760_v4, 0.0  ;;  %4543 = vmatpush3.msra.mxu1 %v6153_v32  ;;  %v2764_v5 = vadd.f32 %v2763_v19, %v6219_v23  ;;  %v2992_v15 = vmax.f32 %v2921_v39, 0.0  ;;  %v2925_v29 = vadd.f32 %v2924_v30, %v6221_v7 }
 0x782   : > { %v2765_v2 = vpop.f32.mrf.mxu1  ;;  %4528 = vmatprep.subr.mxu1 %v6191_v24  ;;  %v2926_v48 = vpop.f32.mrf.mxu0 }
 0x783   : > { %v2766_v6 = vadd.f32 %v2765_v2, %v6223_v58  ;;  %3200 = vmatprep.mubr.f32.mxu1 %v2990_v54  ;;  %4544 = vmatpush3.msra.mxu1 %v6194_v18  ;;  %v2993_v32 = vmax.f32 %v2764_v5, 0.0  ;;  %v2995_v45 = vmax.f32 %v2925_v29, 0.0 }
 0x784   : > { %v2769_v37 = vpop.f32.mrf.mxu1  ;;  %3201 = vmatmul.mubr.f32.gmra.mxu1 %v2989_v21  ;;  %4529 = vmatprep.subr.mxu1 %v6197_v22  ;;  %v2930_v18 = vpop.f32.mrf.mxu0 }
 0x785   : > { %v2994_v31 = vmax.f32 %v2766_v6, 0.0  ;;  %4545 = vmatpush3.msra.mxu1 %v6200_v34  ;;  %v2770_v43 = vadd.f32 %v2769_v37, %v6219_v23  ;;  %v2931_v41 = vadd.f32 %v2930_v18, %v6221_v7 }
 0x786   : > { %v2771_v20 = vpop.f32.mrf.mxu1  ;;  %4530 = vmatprep.subr.mxu1 %v6203_v12  ;;  %v2932_v36 = vpop.f32.mrf.mxu0 }
 0x787   : > { %v2772_v24 = vadd.f32 %v2771_v20, %v6223_v58  ;;  %3205 = vmatprep.mubr.f32.mxu1 %v2994_v31  ;;  %4546 = vmatpush3.msra.mxu1 %v6206_v28  ;;  %v2997_v34 = vmax.f32 %v2770_v43, 0.0  ;;  %v2999_v9 = vmax.f32 %v2931_v41, 0.0 }
 0x788   : > { %v2775_v11 = vpop.f32.mrf.mxu1  ;;  %3206 = vmatmul.mubr.f32.gmra.mxu1 %v2993_v32  ;;  %4531 = vmatprep.subr.mxu1 %v6209_v44  ;;  %v2927_v44 = vadd.f32 %v2926_v48, %v6225_v26 }
 0x789   : > { %v2998_v22 = vmax.f32 %v2772_v24, 0.0  ;;  %4547 = vmatpush3.msra.mxu1 %v6212_v57  ;;  %v2776_v8 = vadd.f32 %v2775_v11, %v6219_v23  ;;  %v2936_v57 = vpop.f32.mrf.mxu0  ;;  %v2991_v23 = vmax.f32 %v2919_v10, 0.0 }
 0x78a   : > { %v2777_v1 = vpop.f32.mrf.mxu1  ;;  %v2996_v13 = vmax.f32 %v2927_v44, 0.0  ;;  %v2937_v56 = vadd.f32 %v2936_v57, %v6221_v7 }
 0x78b   : > { %v2778_v12 = vadd.f32 %v2777_v1, %v6223_v58  ;;  %3210 = vmatprep.mubr.f32.mxu1 %v2998_v22  ;;  %v3001_v61 = vmax.f32 %v2776_v8, 0.0  ;;  %v2933_v58 = vadd.f32 %v2932_v36, %v6225_v26  ;;  %v2938_v27 = vpop.f32.mrf.mxu0 }
 0x78c   : > { %3211 = vmatmul.mubr.f32.gmra.mxu1 %v2997_v34  ;;  %v2939_v16 = vadd.f32 %v2938_v27, %v6225_v26  ;;  %v3003_v0 = vmax.f32 %v2937_v56, 0.0 }
 0x78d   : > { %v3002_v28 = vmax.f32 %v2778_v12, 0.0  ;;  %v3000_v42 = vmax.f32 %v2933_v58, 0.0 }
 0x78e   : > { %v3004_v62 = vmax.f32 %v2939_v16, 0.0 }
 0x78f   : > { %3215 = vmatprep.mubr.f32.mxu1 %v3002_v28 }
 0x790   : > { %3216 = vmatmul.mubr.f32.gmra.mxu1 %v3001_v61 }
 0x791   : > { %3345 = vmatprep.mubr.f32.mxu1 %v2992_v15 }
 0x794   : > { %3346 = vmatmul.mubr.f32.vlgmr.msra.gmra.mxu1 %v2991_v23 }
 0x795   : > { %3350 = vmatprep.mubr.f32.mxu1 %v2996_v13 }
 0x798   : > { %3351 = vmatmul.mubr.f32.gmra.mxu1 %v2995_v45 }
 0x799   : > { %3355 = vmatprep.mubr.f32.mxu1 %v3000_v42 }
 0x79c   : > { %3356 = vmatmul.mubr.f32.gmra.mxu1 %v2999_v9 }
 0x79d   : > { %3360 = vmatprep.mubr.f32.mxu1 %v3004_v62 }
 0x7a0   : > { %3361 = vmatmul.mubr.f32.gmra.mxu1 %v3003_v0 }
 0x814   : > { %v4108_v52 = vpop.f32.mrf.mxu1  ;;  %v4188_v33 = vpop.f32.mrf.mxu0 }
 0x816   : > { %v4109_v38 = vpop.f32.mrf.mxu1  ;;  %v4189_v40 = vpop.f32.mrf.mxu0 }
 0x817   : > { %v4110_v26 = vadd.f32 %v4109_v38, %v4108_v52  ;;  %v4190_v7 = vadd.f32 %v4189_v40, %v4188_v33 }
 0x818   : > { %v4111_v63 = vpop.f32.mrf.mxu1  ;;  %v4191_v47 = vpop.f32.mrf.mxu0 }
 0x819   : > { %v3143_v59 = vadd.f32 %v4110_v26, %v6325_v46 }
 0x81a   : > { %v4112_v35 = vpop.f32.mrf.mxu1  ;;  %v4192_v4 = vpop.f32.mrf.mxu0 }
 0x81b   : > { %v3288_v19 = vadd.f32 %v4190_v7, %v3143_v59  ;;  %v4113_v30 = vadd.f32 %v4112_v35, %v4111_v63  ;;  %v4193_v2 = vadd.f32 %v4192_v4, %v4191_v47 }
 0x81c   : > { %v4114_v54 = vpop.f32.mrf.mxu1  ;;  %v4194_v21 = vpop.f32.mrf.mxu0 }
 0x81d   : > { %v3148_v5 = vadd.f32 %v4113_v30, %v6325_v46  ;;  %v6330_v6 = vadd.f32 %v3288_v19, %v5984_v3 }
 0x81e   : > { %v4115_v48 = vpop.f32.mrf.mxu1  ;;  %v4195_v37 = vpop.f32.mrf.mxu0 }
 0x81f   : > { %v3293_v31 = vadd.f32 %v4193_v2, %v3148_v5  ;;  %v4116_v32 = vadd.f32 %v4115_v48, %v4114_v54  ;;  %3382 = vadd.xlane.f32.xlu0 %v6330_v6  ;;  %v4196_v18 = vadd.f32 %v4195_v37, %v4194_v21 }
 0x820   : > { %v4117_v43 = vpop.f32.mrf.mxu1  ;;  %v4197_v20 = vpop.f32.mrf.mxu0 }
 0x821   : > { %v3153_v24 = vadd.f32 %v4116_v32, %v6325_v46  ;;  %v6335_v11 = vadd.f32 %v3293_v31, %v5997_v25 }
 0x822   : > { %v4118_v22 = vpop.f32.mrf.mxu1  ;;  %v4198_v34 = vpop.f32.mrf.mxu0 }
 0x823   : > { %v3298_v8 = vadd.f32 %v4196_v18, %v3153_v24  ;;  %v4119_v1 = vadd.f32 %v4118_v22, %v4117_v43  ;;  %3384 = vadd.xlane.f32.xlu1 %v6335_v11  ;;  %v4199_v36 = vadd.f32 %v4198_v34, %v4197_v20 }
 0x824   : > { %v4120_v3 = vpop.f32.mrf.mxu1  ;;  %v4200_v39 = vpop.f32.mrf.mxu0 }
 0x825   : > { %v3158_v12 = vadd.f32 %v4119_v1, %v6325_v46  ;;  %v6340_v28 = vadd.f32 %v3298_v8, %v6012_v55 }
 0x826   : > { %v4121_v10 = vpop.f32.mrf.mxu1  ;;  %v4201_v61 = vpop.f32.mrf.mxu0 }
 0x827   : > { %v3303_v15 = vadd.f32 %v4199_v36, %v3158_v12  ;;  %v4122_v44 = vadd.f32 %v4121_v10, %v4120_v3  ;;  %3386 = vadd.xlane.f32.xlu0 %v6340_v28  ;;  %v4202_v29 = vadd.f32 %v4201_v61, %v4200_v39 }
 0x828   : > { %v4123_v25 = vpop.f32.mrf.mxu1  ;;  %v4203_v57 = vpop.f32.mrf.mxu0 }
 0x829   : > { %v3163_v23 = vadd.f32 %v4122_v44, %v6325_v46  ;;  %v6345_v13 = vadd.f32 %v3303_v15, %v6027_v53 }
 0x82a   : > { %v4124_v58 = vpop.f32.mrf.mxu1  ;;  %v4204_v27 = vpop.f32.mrf.mxu0 }
 0x82b   : > { %v3308_v45 = vadd.f32 %v4202_v29, %v3163_v23  ;;  %v4125_v41 = vadd.f32 %v4124_v58, %v4123_v25  ;;  %3388 = vadd.xlane.f32.xlu1 %v6345_v13  ;;  %v4205_v9 = vadd.f32 %v4204_v27, %v4203_v57 }
 0x82c   : > { %v4126_v55 = vpop.f32.mrf.mxu1  ;;  %v4206_v42 = vpop.f32.mrf.mxu0 }
 0x82d   : > { %v3168_v16 = vadd.f32 %v4125_v41, %v6325_v46  ;;  %v6350_v56 = vadd.f32 %v3308_v45, %v6042_v49  ;;  %v6723_v41 = vld [vmem:[#allocation30_spill] sm:$0xff] }
 0x82e   : > { %v4127_v62 = vpop.f32.mrf.mxu1  ;;  %v4207_v0 = vpop.f32.mrf.mxu0 }
 0x82f   : > { %v3313_v52 = vadd.f32 %v4205_v9, %v3168_v16  ;;  %v4128_v33 = vadd.f32 %v4127_v62, %v4126_v55  ;;  %3390 = vadd.xlane.f32.xlu0 %v6350_v56  ;;  %v4208_v26 = vadd.f32 %v4207_v0, %v4206_v42 }
 0x830   : > { %v4129_v53 = vpop.f32.mrf.mxu1  ;;  %v4209_v38 = vpop.f32.mrf.mxu0 }
 0x831   : > { %v3173_v40 = vadd.f32 %v4128_v33, %v6325_v46  ;;  %v6355_v63 = vadd.f32 %v3313_v52, %v6057_v14 }
 0x832   : > { %v4130_v47 = vpop.f32.mrf.mxu1  ;;  %v4210_v59 = vpop.f32.mrf.mxu0 }
 0x833   : > { %v3318_v7 = vadd.f32 %v4208_v26, %v3173_v40  ;;  %v4131_v35 = vadd.f32 %v4130_v47, %v4129_v53  ;;  %3392 = vadd.xlane.f32.xlu1 %v6355_v63  ;;  %v4211_v30 = vadd.f32 %v4210_v59, %v4209_v38 }
 0x834   : > { %v4132_v49 = vpop.f32.mrf.mxu1  ;;  %v4212_v4 = vpop.f32.mrf.mxu0 }
 0x835   : > { %v3178_v19 = vadd.f32 %v4131_v35, %v6325_v46  ;;  %v6360_v54 = vadd.f32 %v3318_v7, %v6072_v17 }
 0x836   : > { %v4133_v21 = vpop.f32.mrf.mxu1  ;;  %v4213_v5 = vpop.f32.mrf.mxu0 }
 0x837   : > { %v3323_v2 = vadd.f32 %v4211_v30, %v3178_v19  ;;  %v4134_v48 = vadd.f32 %v4133_v21, %v4132_v49  ;;  %3394 = vadd.xlane.f32.xlu0 %v6360_v54  ;;  %v4214_v32 = vadd.f32 %v4213_v5, %v4212_v4 }
 0x838   : > { %v4135_v14 = vpop.f32.mrf.mxu1  ;;  %v4215_v37 = vpop.f32.mrf.mxu0 }
 0x839   : > { %v3183_v31 = vadd.f32 %v4134_v48, %v6325_v46  ;;  %v6365_v43 = vadd.f32 %v3323_v2, %v6087_v51  ;;  %v6725_v2 = vld [vmem:[#allocation32_spill] sm:$0xff] }
 0x83a   : > { %v4136_v20 = vpop.f32.mrf.mxu1  ;;  %v4216_v24 = vpop.f32.mrf.mxu0 }
 0x83b   : > { %v3328_v18 = vadd.f32 %v4214_v32, %v3183_v31  ;;  %v4137_v22 = vadd.f32 %v4136_v20, %v4135_v14  ;;  %3396 = vadd.xlane.f32.xlu1 %v6365_v43  ;;  %v4217_v1 = vadd.f32 %v4216_v24, %v4215_v37 }
 0x83c   : > { %v4138_v17 = vpop.f32.mrf.mxu1  ;;  %v4218_v34 = vpop.f32.mrf.mxu0 }
 0x83d   : > { %v3188_v8 = vadd.f32 %v4137_v22, %v6325_v46  ;;  %v6370_v3 = vadd.f32 %v3328_v18, %v6102_v60  ;;  %v6726_v18 = vld [vmem:[#allocation33_spill] sm:$0xff] }
 0x83e   : > { %v4139_v39 = vpop.f32.mrf.mxu1  ;;  %v4219_v12 = vpop.f32.mrf.mxu0 }
 0x83f   : > { %v3333_v36 = vadd.f32 %v4217_v1, %v3188_v8  ;;  %v4140_v10 = vadd.f32 %v4139_v39, %v4138_v17  ;;  %3398 = vadd.xlane.f32.xlu0 %v6370_v3  ;;  %v4220_v44 = vadd.f32 %v4219_v12, %v4218_v34  ;;  %v6727_v12 = vld [vmem:[#allocation34_spill] sm:$0xff] }
 0x840   : > { %v4141_v51 = vpop.f32.mrf.mxu1  ;;  %v4221_v61 = vpop.f32.mrf.mxu0 }
 0x841   : > { %v3193_v15 = vadd.f32 %v4140_v10, %v6325_v46  ;;  %v6375_v25 = vadd.f32 %v3333_v36, %v6117_v50  ;;  %v6724_v50 = vld [vmem:[#allocation31_spill] sm:$0xff] }
 0x842   : > { %v4142_v57 = vpop.f32.mrf.mxu1  ;;  %v4222_v23 = vpop.f32.mrf.mxu0 }
 0x843   : > { %v3338_v29 = vadd.f32 %v4220_v44, %v3193_v15  ;;  %v4143_v58 = vadd.f32 %v4142_v57, %v4141_v51  ;;  %3400 = vadd.xlane.f32.xlu1 %v6375_v25  ;;  %v4223_v45 = vadd.f32 %v4222_v23, %v4221_v61  ;;  %v6728_v51 = vld [vmem:[#allocation35_spill] sm:$0xff] }
 0x844   : > { %v4144_v60 = vpop.f32.mrf.mxu1 }
 0x845   : > { %v3198_v27 = vadd.f32 %v4143_v58, %v6325_v46  ;;  %v6380_v55 = vadd.f32 %v3338_v29, %v6723_v41 }
 0x846   : > { %v4145_v42 = vpop.f32.mrf.mxu1 }
 0x847   : > { %v3343_v16 = vadd.f32 %v4223_v45, %v3198_v27  ;;  %3402 = vadd.xlane.f32.xlu0 %v6380_v55  ;;  %v4146_v40 = vadd.f32 %v4145_v42, %v4144_v60 }
 0x848   : > { %v4147_v9 = vpop.f32.mrf.mxu1 }
 0x849   : > { %v6384_v62 = vadd.f32 %v3343_v16, %v6724_v50  ;;  %v3203_v59 = vadd.f32 %v4146_v40, %v6325_v46 }
 0x84a   : > { %v4148_v0 = vpop.f32.mrf.mxu1 }
 0x84b   : > { %3404 = vadd.xlane.f32.xlu1 %v6384_v62  ;;  %v4149_v7 = vadd.f32 %v4148_v0, %v4147_v9 }
 0x84c   : > { %v4150_v52 = vpop.f32.mrf.mxu1 }
 0x84d   : > { %v3208_v30 = vadd.f32 %v4149_v7, %v6325_v46 }
 0x84e   : > { %v4151_v33 = vpop.f32.mrf.mxu1 }
 0x84f   : > { %v4152_v21 = vadd.f32 %v4151_v33, %v4150_v52 }
 0x850   : > { %v4153_v53 = vpop.f32.mrf.mxu1 }
 0x851   : > { %v3213_v32 = vadd.f32 %v4152_v21, %v6325_v46 }
 0x852   : > { %v4154_v38 = vpop.f32.mrf.mxu1 }
 0x853   : > { %v4155_v20 = vadd.f32 %v4154_v38, %v4153_v53 }
 0x854   : > { %v4224_v26 = vpop.f32.mrf.mxu1 }
 0x855   : > { %v3218_v1 = vadd.f32 %v4155_v20, %v6325_v46 }
 0x856   : > { %v4225_v47 = vpop.f32.mrf.mxu1 }
 0x857   : > { %v4226_v35 = vadd.f32 %v4225_v47, %v4224_v26 }
 0x858   : > { %v4227_v49 = vpop.f32.mrf.mxu1 }
 0x859   : > { %v3348_v4 = vadd.f32 %v4226_v35, %v3203_v59 }
 0x85a   : > { %v4228_v19 = vpop.f32.mrf.mxu1 }
 0x85b   : > { %v4229_v5 = vadd.f32 %v4228_v19, %v4227_v49  ;;  %v6390_v48 = vadd.f32 %v3348_v4, %v6725_v2 }
 0x85c   : > { %v4230_v14 = vpop.f32.mrf.mxu1 }
 0x85d   : > { %v3353_v37 = vadd.f32 %v4229_v5, %v3208_v30  ;;  %3406 = vadd.xlane.f32.xlu0 %v6390_v48 }
 0x85e   : > { %v4231_v31 = vpop.f32.mrf.mxu1 }
 0x85f   : > { %v4232_v24 = vadd.f32 %v4231_v31, %v4230_v14  ;;  %v6395_v22 = vadd.f32 %v3353_v37, %v6726_v18 }
 0x860   : > { %v4233_v17 = vpop.f32.mrf.mxu1 }
 0x861   : > { %v3358_v34 = vadd.f32 %v4232_v24, %v3213_v32  ;;  %3408 = vadd.xlane.f32.xlu1 %v6395_v22 }
 0x862   : > { %v4234_v8 = vpop.f32.mrf.mxu1 }
 0x863   : > { %v4235_v39 = vadd.f32 %v4234_v8, %v4233_v17  ;;  %v6400_v36 = vadd.f32 %v3358_v34, %v6727_v12 }
 0x865   : > { %v3363_v10 = vadd.f32 %v4235_v39, %v3218_v1  ;;  %3410 = vadd.xlane.f32.xlu0 %v6400_v36 }
 0x867   : > { %v6404_v61 = vadd.f32 %v3363_v10, %v6728_v51 }
 0x869   : > { %3412 = vadd.xlane.f32.xlu1 %v6404_v61 }
 0x8a8   : > { %v3383_v15 = vpop.xlane.xlu0 %3382 }
 0x8a9   : > { %v3414_v44 = vmul.f32 0.0078125, %v3383_v15 }
 0x8ab   : > { %v6408_v57 = vsub.f32 %v6330_v6, %v3414_v44 }
 0x8ac   : > { %v3385_v23 = vpop.xlane.xlu1 %3384 }
 0x8ad   : > { %v3415_v29 = vmul.f32 0.0078125, %v3385_v23  ;;  %v3446_v46 = vmul.f32 %v6408_v57, %v6408_v57 }
 0x8af   : > { %v6413_v58 = vsub.f32 %v6335_v11, %v3415_v29  ;;  %3462 = vadd.xlane.f32.xlu0 %v3446_v46 }
 0x8b0   : > { %v3387_v60 = vpop.xlane.xlu0 %3386 }
 0x8b1   : > { %v3416_v27 = vmul.f32 0.0078125, %v3387_v60  ;;  %v3447_v45 = vmul.f32 %v6413_v58, %v6413_v58 }
 0x8b3   : > { %v6418_v41 = vsub.f32 %v6340_v28, %v3416_v27  ;;  %3464 = vadd.xlane.f32.xlu1 %v3447_v45 }
 0x8b4   : > { %v3389_v6 = vpop.xlane.xlu1 %3388 }
 0x8b5   : > { %v3417_v42 = vmul.f32 0.0078125, %v3389_v6  ;;  %v3448_v16 = vmul.f32 %v6418_v41, %v6418_v41 }
 0x8b7   : > { %v6423_v9 = vsub.f32 %v6345_v13, %v3417_v42  ;;  %3466 = vadd.xlane.f32.xlu0 %v3448_v16 }
 0x8b8   : > { %v3391_v11 = vpop.xlane.xlu0 %3390 }
 0x8b9   : > { %v3418_v50 = vmul.f32 0.0078125, %v3391_v11  ;;  %v3449_v0 = vmul.f32 %v6423_v9, %v6423_v9 }
 0x8bb   : > { %v6428_v52 = vsub.f32 %v6350_v56, %v3418_v50  ;;  %3468 = vadd.xlane.f32.xlu1 %v3449_v0 }
 0x8bc   : > { %v3393_v28 = vpop.xlane.xlu1 %3392 }
 0x8bd   : > { %v3419_v33 = vmul.f32 0.0078125, %v3393_v28  ;;  %v3450_v53 = vmul.f32 %v6428_v52, %v6428_v52 }
 0x8bf   : > { %v6433_v38 = vsub.f32 %v6355_v63, %v3419_v33  ;;  %3470 = vadd.xlane.f32.xlu0 %v3450_v53  ;;  %v6490_v33 = vld [vmem:[%s6729_s16] ss:$0 sm:$0xff] }
 0x8c0   : > { %v3395_v13 = vpop.xlane.xlu0 %3394 }
 0x8c1   : > { %v3420_v40 = vmul.f32 0.0078125, %v3395_v13  ;;  %v3451_v26 = vmul.f32 %v6433_v38, %v6433_v38 }
 0x8c3   : > { %v6438_v47 = vsub.f32 %v6360_v54, %v3420_v40  ;;  %3472 = vadd.xlane.f32.xlu1 %v3451_v26  ;;  %v6496_v40 = vld [vmem:[%s6730_s9] ss:$0 sm:$0xff] }
 0x8c4   : > { %v3397_v56 = vpop.xlane.xlu1 %3396 }
 0x8c5   : > { %v3421_v59 = vmul.f32 0.0078125, %v3397_v56  ;;  %v3452_v7 = vmul.f32 %v6438_v47, %v6438_v47 }
 0x8c7   : > { %v6443_v35 = vsub.f32 %v6365_v43, %v3421_v59  ;;  %3474 = vadd.xlane.f32.xlu0 %v3452_v7 }
 0x8c8   : > { %v3399_v63 = vpop.xlane.xlu0 %3398 }
 0x8c9   : > { %v3422_v49 = vmul.f32 0.0078125, %v3399_v63  ;;  %v3453_v4 = vmul.f32 %v6443_v35, %v6443_v35 }
 0x8cb   : > { %v6448_v19 = vsub.f32 %v6370_v3, %v3422_v49  ;;  %3476 = vadd.xlane.f32.xlu1 %v3453_v4 }
 0x8cc   : > { %v3401_v54 = vpop.xlane.xlu1 %3400 }
 0x8cd   : > { %v3423_v30 = vmul.f32 0.0078125, %v3401_v54  ;;  %v3454_v21 = vmul.f32 %v6448_v19, %v6448_v19 }
 0x8cf   : > { %v6453_v5 = vsub.f32 %v6375_v25, %v3423_v30  ;;  %3478 = vadd.xlane.f32.xlu0 %v3454_v21 }
 0x8d0   : > { %v3403_v43 = vpop.xlane.xlu0 %3402 }
 0x8d1   : > { %v3424_v2 = vmul.f32 0.0078125, %v3403_v43  ;;  %v3455_v14 = vmul.f32 %v6453_v5, %v6453_v5 }
 0x8d3   : > { %v6458_v37 = vsub.f32 %v6380_v55, %v3424_v2  ;;  %3480 = vadd.xlane.f32.xlu1 %v3455_v14 }
 0x8d4   : > { %v3405_v3 = vpop.xlane.xlu1 %3404 }
 0x8d5   : > { %v3425_v31 = vmul.f32 0.0078125, %v3405_v3  ;;  %v3456_v32 = vmul.f32 %v6458_v37, %v6458_v37 }
 0x8d7   : > { %v6463_v20 = vsub.f32 %v6384_v62, %v3425_v31  ;;  %3482 = vadd.xlane.f32.xlu0 %v3456_v32 }
 0x8d9   : > { %v3457_v25 = vmul.f32 %v6463_v20, %v6463_v20 }
 0x8db   : > { %3484 = vadd.xlane.f32.xlu1 %v3457_v25 }
 0x8e6   : > { %v3407_v24 = vpop.xlane.xlu0 %3406 }
 0x8e7   : > { %v3426_v18 = vmul.f32 0.0078125, %v3407_v24 }
 0x8e9   : > { %v6468_v17 = vsub.f32 %v6390_v48, %v3426_v18 }
 0x8ea   : > { %v3409_v55 = vpop.xlane.xlu1 %3408 }
 0x8eb   : > { %v3427_v34 = vmul.f32 0.0078125, %v3409_v55  ;;  %v3458_v8 = vmul.f32 %v6468_v17, %v6468_v17 }
 0x8ed   : > { %v6473_v1 = vsub.f32 %v6395_v22, %v3427_v34  ;;  %3486 = vadd.xlane.f32.xlu0 %v3458_v8 }
 0x8ee   : > { %v3411_v62 = vpop.xlane.xlu0 %3410 }
 0x8ef   : > { %v3428_v39 = vmul.f32 0.0078125, %v3411_v62  ;;  %v3459_v12 = vmul.f32 %v6473_v1, %v6473_v1 }
 0x8f1   : > { %v6478_v10 = vsub.f32 %v6400_v36, %v3428_v39  ;;  %3488 = vadd.xlane.f32.xlu1 %v3459_v12 }
 0x8f2   : > { %v3413_v48 = vpop.xlane.xlu1 %3412 }
 0x8f3   : > { %v3429_v51 = vmul.f32 0.0078125, %v3413_v48  ;;  %v3460_v15 = vmul.f32 %v6478_v10, %v6478_v10 }
 0x8f5   : > { %v6483_v44 = vsub.f32 %v6404_v61, %v3429_v51  ;;  %3490 = vadd.xlane.f32.xlu0 %v3460_v15 }
 0x8f7   : > { %v3461_v22 = vmul.f32 %v6483_v44, %v6483_v44 }
 0x8f9   : > { %3492 = vadd.xlane.f32.xlu1 %v3461_v22 }
 0x938   : > { %v3463_v23 = vpop.xlane.xlu0 %3462 }
 0x939   : > { %v3494_v29 = vmul.f32 0.0078125, %v3463_v23 }
 0x93b   : > { %v3510_v46 = vadd.f32 1e-05, %v3494_v29 }
 0x93c   : > { %v3465_v60 = vpop.xlane.xlu1 %3464 }
 0x93d   : > { %4768 = vrsqrt.f32 %v3510_v46  ;;  %v3495_v36 = vmul.f32 0.0078125, %v3465_v60 }
 0x93f   : > { %v3511_v27 = vadd.f32 1e-05, %v3495_v36 }
 0x940   : > { %v3467_v45 = vpop.xlane.xlu0 %3466 }
 0x941   : > { %4770 = vrsqrt.f32 %v3511_v27  ;;  %v3496_v6 = vmul.f32 0.0078125, %v3467_v45 }
 0x943   : > { %v3512_v42 = vadd.f32 1e-05, %v3496_v6 }
 0x944   : > { %v3469_v16 = vpop.xlane.xlu1 %3468 }
 0x945   : > { %4772 = vrsqrt.f32 %v3512_v42  ;;  %v3497_v61 = vmul.f32 0.0078125, %v3469_v16 }
 0x947   : > { %v3513_v11 = vadd.f32 1e-05, %v3497_v61 }
 0x948   : > { %v3471_v50 = vpop.xlane.xlu0 %3470 }
 0x949   : > { %4774 = vrsqrt.f32 %v3513_v11  ;;  %v3498_v0 = vmul.f32 0.0078125, %v3471_v50 }
 0x94a   : > { %v4769_v28 = vpop.eup %4768 }
 0x94b   : > { %v3542_v53 = vmul.f32 %v4769_v28, %v6408_v57  ;;  %v3514_v13 = vadd.f32 1e-05, %v3498_v0 }
 0x94c   : > { %v3473_v26 = vpop.xlane.xlu1 %3472 }
 0x94d   : > { %v3565_v56 = vmul.f32 %v6490_v33, %v3542_v53  ;;  %4776 = vrsqrt.f32 %v3514_v13  ;;  %v3499_v59 = vmul.f32 0.0078125, %v3473_v26 }
 0x94e   : > { %v4771_v7 = vpop.eup %4770 }
 0x94f   : > { %v3588_v63 = vadd.f32 %v6496_v40, %v3565_v56  ;;  %v3543_v49 = vmul.f32 %v4771_v7, %v6413_v58  ;;  %v3515_v4 = vadd.f32 1e-05, %v3499_v59 }
 0x950   : > { %v3475_v54 = vpop.xlane.xlu0 %3474 }
 0x951   : > { %3604 = vst [vmem:[%s6503_s13] sm:$0xff] %v3588_v63  ;;  %v3566_v57 = vmul.f32 %v6490_v33, %v3543_v49  ;;  %4778 = vrsqrt.f32 %v3515_v4  ;;  %v3500_v30 = vmul.f32 0.0078125, %v3475_v54 }
 0x952   : > { %v4773_v21 = vpop.eup %4772 }
 0x953   : > { %v3589_v43 = vadd.f32 %v6496_v40, %v3566_v57  ;;  %v3544_v2 = vmul.f32 %v4773_v21, %v6418_v41  ;;  %v3516_v14 = vadd.f32 1e-05, %v3500_v30 }
 0x954   : > { %v3477_v58 = vpop.xlane.xlu1 %3476 }
 0x955   : > { %3605 = vst [vmem:[%s6503_s13 + $0x8] sm:$0xff] %v3589_v43  ;;  %v3567_v3 = vmul.f32 %v6490_v33, %v3544_v2  ;;  %4780 = vrsqrt.f32 %v3516_v14  ;;  %v3501_v31 = vmul.f32 0.0078125, %v3477_v58 }
 0x956   : > { %v4775_v32 = vpop.eup %4774 }
 0x957   : > { %v3590_v25 = vadd.f32 %v6496_v40, %v3567_v3  ;;  %v3545_v24 = vmul.f32 %v4775_v32, %v6423_v9  ;;  %v3517_v18 = vadd.f32 1e-05, %v3501_v31 }
 0x958   : > { %v3479_v55 = vpop.xlane.xlu0 %3478 }
 0x959   : > { %3606 = vst [vmem:[%s6503_s13 + $0x10] sm:$0xff] %v3590_v25  ;;  %v3568_v34 = vmul.f32 %v6490_v33, %v3545_v24  ;;  %4782 = vrsqrt.f32 %v3517_v18  ;;  %v3502_v41 = vmul.f32 0.0078125, %v3479_v55 }
 0x95a   : > { %v4777_v8 = vpop.eup %4776 }
 0x95b   : > { %v3591_v62 = vadd.f32 %v6496_v40, %v3568_v34  ;;  %v3546_v39 = vmul.f32 %v4777_v8, %v6428_v52  ;;  %v3518_v12 = vadd.f32 1e-05, %v3502_v41 }
 0x95c   : > { %v3481_v48 = vpop.xlane.xlu1 %3480 }
 0x95d   : > { %3607 = vst [vmem:[%s6503_s13 + $0x18] sm:$0xff] %v3591_v62  ;;  %v3569_v51 = vmul.f32 %v6490_v33, %v3546_v39  ;;  %4784 = vrsqrt.f32 %v3518_v12  ;;  %v3503_v9 = vmul.f32 0.0078125, %v3481_v48 }
 0x95e   : > { %v4779_v15 = vpop.eup %4778 }
 0x95f   : > { %v3592_v22 = vadd.f32 %v6496_v40, %v3569_v51  ;;  %v3547_v23 = vmul.f32 %v4779_v15, %v6433_v38  ;;  %v3519_v29 = vadd.f32 1e-05, %v3503_v9 }
 0x960   : > { %v3483_v46 = vpop.xlane.xlu0 %3482 }
 0x961   : > { %3608 = vst [vmem:[%s6503_s13 + $0x20] sm:$0xff] %v3592_v22  ;;  %v3570_v60 = vmul.f32 %v6490_v33, %v3547_v23  ;;  %4786 = vrsqrt.f32 %v3519_v29  ;;  %v3504_v52 = vmul.f32 0.0078125, %v3483_v46 }
 0x962   : > { %v4781_v36 = vpop.eup %4780 }
 0x963   : > { %v3593_v27 = vadd.f32 %v6496_v40, %v3570_v60  ;;  %v3548_v45 = vmul.f32 %v4781_v36, %v6438_v47  ;;  %v3520_v6 = vadd.f32 1e-05, %v3504_v52 }
 0x964   : > { %v3485_v42 = vpop.xlane.xlu1 %3484 }
 0x965   : > { %3609 = vst [vmem:[%s6503_s13 + $0x28] sm:$0xff] %v3593_v27  ;;  %v3571_v16 = vmul.f32 %v6490_v33, %v3548_v45  ;;  %4788 = vrsqrt.f32 %v3520_v6  ;;  %v3505_v38 = vmul.f32 0.0078125, %v3485_v42 }
 0x966   : > { %v4783_v61 = vpop.eup %4782 }
 0x967   : > { %v3594_v11 = vadd.f32 %v6496_v40, %v3571_v16  ;;  %v3549_v50 = vmul.f32 %v4783_v61, %v6443_v35  ;;  %v3521_v0 = vadd.f32 1e-05, %v3505_v38 }
 0x969   : > { %3610 = vst [vmem:[%s6503_s13 + $0x30] sm:$0xff] %v3594_v11  ;;  %v3572_v28 = vmul.f32 %v6490_v33, %v3549_v50  ;;  %4790 = vrsqrt.f32 %v3521_v0 }
 0x96a   : > { %v4785_v47 = vpop.eup %4784 }
 0x96b   : > { %v3595_v53 = vadd.f32 %v6496_v40, %v3572_v28  ;;  %v3550_v13 = vmul.f32 %v4785_v47, %v6448_v19 }
 0x96d   : > { %3611 = vst [vmem:[%s6503_s13 + $0x38] sm:$0xff] %v3595_v53  ;;  %v3573_v26 = vmul.f32 %v6490_v33, %v3550_v13 }
 0x96e   : > { %v4787_v56 = vpop.eup %4786 }
 0x96f   : > { %v3596_v59 = vadd.f32 %v6496_v40, %v3573_v26  ;;  %v3551_v35 = vmul.f32 %v4787_v56, %v6453_v5 }
 0x971   : > { %3612 = vst [vmem:[%s6503_s13 + $0x40] sm:$0xff] %v3596_v59  ;;  %v3574_v7 = vmul.f32 %v6490_v33, %v3551_v35 }
 0x972   : > { %v4789_v63 = vpop.eup %4788 }
 0x973   : > { %v3597_v49 = vadd.f32 %v6496_v40, %v3574_v7  ;;  %v3552_v4 = vmul.f32 %v4789_v63, %v6458_v37 }
 0x975   : > { %3613 = vst [vmem:[%s6503_s13 + $0x48] sm:$0xff] %v3597_v49  ;;  %v3575_v19 = vmul.f32 %v6490_v33, %v3552_v4 }
 0x976   : > { %v4791_v54 = vpop.eup %4790  ;;  %v3487_v57 = vpop.xlane.xlu0 %3486 }
 0x977   : > { %v3598_v30 = vadd.f32 %v6496_v40, %v3575_v19  ;;  %v3553_v21 = vmul.f32 %v4791_v54, %v6463_v20  ;;  %v3506_v43 = vmul.f32 0.0078125, %v3487_v57 }
 0x979   : > { %3614 = vst [vmem:[%s6503_s13 + $0x50] sm:$0xff] %v3598_v30  ;;  %v3576_v5 = vmul.f32 %v6490_v33, %v3553_v21  ;;  %v3522_v2 = vadd.f32 1e-05, %v3506_v43 }
 0x97a   : > { %v3489_v14 = vpop.xlane.xlu1 %3488 }
 0x97b   : > { %v3599_v58 = vadd.f32 %v6496_v40, %v3576_v5  ;;  %4792 = vrsqrt.f32 %v3522_v2  ;;  %v3507_v3 = vmul.f32 0.0078125, %v3489_v14 }
 0x97d   : > { %3615 = vst [vmem:[%s6503_s13 + $0x58] sm:$0xff] %v3599_v58  ;;  %v3523_v37 = vadd.f32 1e-05, %v3507_v3 }
 0x97e   : > { %v3491_v31 = vpop.xlane.xlu0 %3490 }
 0x97f   : > { %4794 = vrsqrt.f32 %v3523_v37  ;;  %v3508_v32 = vmul.f32 0.0078125, %v3491_v31 }
 0x981   : > { %v3524_v25 = vadd.f32 1e-05, %v3508_v32 }
 0x982   : > { %v3493_v24 = vpop.xlane.xlu1 %3492 }
 0x983   : > { %4796 = vrsqrt.f32 %v3524_v25  ;;  %v3509_v20 = vmul.f32 0.0078125, %v3493_v24 }
 0x985   : > { %v3525_v18 = vadd.f32 1e-05, %v3509_v20 }
 0x987   : > { %4798 = vrsqrt.f32 %v3525_v18 }
 0x988   : > { %v4793_v55 = vpop.eup %4792 }
 0x989   : > { %v3554_v34 = vmul.f32 %v4793_v55, %v6468_v17 }
 0x98b   : > { %v3577_v41 = vmul.f32 %v6490_v33, %v3554_v34 }
 0x98c   : > { %v4795_v8 = vpop.eup %4794 }
 0x98d   : > { %v3600_v62 = vadd.f32 %v6496_v40, %v3577_v41  ;;  %v3555_v39 = vmul.f32 %v4795_v8, %v6473_v1 }
 0x98f   : > { %3616 = vst [vmem:[%s6503_s13 + $0x60] sm:$0xff] %v3600_v62  ;;  %v3578_v12 = vmul.f32 %v6490_v33, %v3555_v39 }
 0x990   : > { %v4797_v48 = vpop.eup %4796 }
 0x991   : > { %v3601_v51 = vadd.f32 %v6496_v40, %v3578_v12  ;;  %v3556_v9 = vmul.f32 %v4797_v48, %v6478_v10 }
 0x993   : > { %3617 = vst [vmem:[%s6503_s13 + $0x68] sm:$0xff] %v3601_v51  ;;  %v3579_v17 = vmul.f32 %v6490_v33, %v3556_v9 }
 0x994   : > { %v4799_v15 = vpop.eup %4798 }
 0x995   : > { %v3602_v22 = vadd.f32 %v6496_v40, %v3579_v17  ;;  %v3557_v23 = vmul.f32 %v4799_v15, %v6483_v44 }
 0x997   : > { %3618 = vst [vmem:[%s6503_s13 + $0x70] sm:$0xff] %v3602_v22  ;;  %v3580_v1 = vmul.f32 %v6490_v33, %v3557_v23 }
 0x999   : > { %v3603_v10 = vadd.f32 %v6496_v40, %v3580_v1 }
 0x99b   : > { %3619 = vst [vmem:[%s6503_s13 + $0x78] sm:$0xff] %v3603_v10 }
 0x99c   : > { %5069 = shalt.err (!%p5066_p12)
}
 0x99d   : > { %s5070_s24 = scalar_lea.hbm %s6568_s18, 2048  ;;  %s5074_s15 = scalar_lea.hbm %s6732_s17, 4096 }
 0x99e   : > { %p5071_p9 = scmp.ne.s32.totalorder %s6568_s18, %s5070_s24  ;;  %p5075_p10 = scmp.lt.s32.totalorder %s6568_s18, %s6732_s17 }
 0x99f   : > { %p5076_p4 = scmp.lt.s32.totalorder %s5074_s15, %s5070_s24 }
 0x9a0   : > { %p5072_p0 = pnand %p5071_p9, %p6733_p3 }
 0x9a1   : > { %p5077_p13 = por %p5076_p4, %p5075_p10 }
 0x9a2   : > { %p5073_p2 = pneg %p5072_p0 }
 0x9a4   : > { %p5078_p1 = pnand %p5077_p13, %p5073_p2 }
 0x9a6   : > { %5081 = shalt.err (!%p5078_p1)
}
 0x9a7   : > { %s5153_s16 = smov 128   ;;  %s5154_s26 = smov 8  }
 0x9a8   : > { %4578 = dma.vmem_to_hbm [thread:$0]  (%p6733_p3), %s6570_s7, 2048, %s6568_s18, %s3621_s22, %s5153_s16, %s5153_s16, %s5154_s26  }
 0x9a9 PF: > { %s6734_s1 = sld [smem:[#allocation24_spill]]  ;;  %p6737_p7 = scmp.ge.s32.totalorder %s5136_s27, 2 }
 0x9aa   : > { %s6735_s9 = sld [smem:[#allocation29_spill]] }
 0x9af   : > { %s3660_s13 = sand.u32 1, %s6734_s1  }
 0x9b0   : > { %p6736_p6 = scmp.ne.s32.totalorder %s6735_s9, 0  ;;  %s3661_s29 = scalar_lea.sflag [#allocation4], %s3660_s13 }
 0x9b2   : > { %p4610_p5 = pnand %p6737_p7, %p6736_p6 }
 0x9b4   : > { %p4611_p11 = pneg %p4610_p5 }
 0x9b6   : > { %5119 = dma.done.wait (%p4611_p11), %s3661_s29, 2048  }
 0x9b7   : > { %5121 = vsyncadd (%p4611_p11), %s3661_s29, 4294965248  ;;  %s6738_s27 = sld [smem:[#allocation26_spill]]  ;;  %s6741_s24 = smov %s5128_s25 }
 0x9b8   : > { %s6739_s10 = sld [smem:[#allocation25_spill]] }
 0x9b9   : > { %s6740_s26 = sld [smem:[#allocation27_spill]] }
 0x9bd   : > { %p37_p8 = scmp.ge.s32.totalorder %s6738_s27, 4  }
 0x9be   : > { %s6742_s25 = smov %s6739_s10 }
 0x9bf   :  { %39 = sbr.rel (!%p37_p8) target bundleno = 25 (0x19), region = 189 }
 0x9c4   :  { %3675 = vsyncpa [#allocation3], 1 }
 0x9c5   :  { %3677 = vsyncpa [#allocation3 + $0x1], 1 }
 0x9c6   :  { %3678 = vsyncpa [#allocation6], 1 }
 0x9c7   :  { %3680 = vsyncpa [#allocation6 + $0x1], 1 }
 0x9c8   :  { %3681 = vsyncpa [#allocation9], 1 }
 0x9c9   :  { %3682 = vsyncpa [#allocation12], 1 }
 0x9ca   :  { %3683 = vsyncpa [#allocation15], 1 }
 0x9cb   :  { %3684 = vsyncpa [#allocation4], 1 }
 0x9cc   :  { %3686 = vsyncpa [#allocation4 + $0x1], 1 }

</bundles_post_ra>
